<compile_context>
chip_gen: v7x
topology: tpu7x:2x2x1
jax: 0.10.0
libtpu: 0.0.40
codegen_flags: <defaults>
</compile_context>

<pallas_src>
import functools

import jax
import jax.numpy as jnp
from jax.experimental import pallas as pl
from jax.experimental.pallas import tpu as pltpu


def _round_up(x, m):
    return (x + m - 1) // m * m


def _pad_to(a, shape):
    pads = [(0, s - d) for d, s in zip(a.shape, shape)]
    return jnp.pad(a, pads)


# ---------------------------------------------------------------------------
# Fused GraphNet-layer kernel (grid over edge tiles)
# ---------------------------------------------------------------------------
def graphnet_kernel(
    # tiled over E
    edge_in_ref,   # (tE, K_e)    bf16  concat([x[row], x[col], edge_attr])
    row_ref,       # (1, tE)      int32 destination node (padded rows == N sentinel)
    # resident (constant index map)
    x_ref,         # (N, Fn)      bf16
    nscale_ref,    # (N, 1)       f32   1/count (mean) or 1.0 (sum)
    we1_ref, be1_ref, we2_ref, be2_ref,              # edge MLP (g folded in be1)
    wn1x_ref, wn1a_ref, bn1_ref, wn2_ref, bn2_ref,   # node MLP (g folded in bn1)
    wg1n_ref, wg1e_ref, bg1_ref, wg2_ref, bg2_ref,   # global MLP (g folded in bg1)
    # outputs
    edge_out_ref,  # (tE, Fe_out) bf16  (true width, not lane-padded)
    node_out_ref,  # (N, Fn_pad)  bf16
    g_out_ref,     # (1, G_pad)   f32
    # scratch (persists across grid steps)
    acc_ref,       # (N, Fe_pad)  f32   scatter-sum accumulator
    *, n_nodes, inv_n, inv_e,
):
    e = pl.program_id(0)
    f32 = jnp.float32
    bf16 = jnp.bfloat16
    dot = lambda a, b: jnp.dot(a, b, preferred_element_type=f32)
    tile_e = row_ref.shape[1]

    @pl.when(e == 0)
    def _():
        acc_ref[...] = jnp.zeros_like(acc_ref)

    # ---- edge MLP:  relu(cat @ W1 + b1_eff) @ W2 + b2 ----
    h_e = jnp.maximum(dot(edge_in_ref[...], we1_ref[...]) + be1_ref[...], 0.0)
    edge_emb = dot(h_e.astype(bf16), we2_ref[...]) + be2_ref[...]     # (tE, Fe_pad) f32
    edge_out_ref[...] = edge_emb[:, :edge_out_ref.shape[1]].astype(edge_out_ref.dtype)

    # ---- scatter-add onto nodes: bf16 one-hot in registers, contracted on MXU.
    # Padded edge rows carry the sentinel index n_nodes -> all-zero one-hot column,
    # so no mask multiply is needed.
    node_ids = jax.lax.broadcasted_iota(jnp.int32, (n_nodes, tile_e), 0)
    onehot = (node_ids == row_ref[...]).astype(bf16)                  # (N, tE)
    acc_ref[...] += dot(onehot, edge_emb.astype(bf16))

    # ---- node + global blocks once, on the last tile ----
    # TODO(synk): give this epilogue its own node-tiled grid axis / pallas_call
    #             so it pipelines and can use the second v7x TensorCore.
    @pl.when(e == pl.num_programs(0) - 1)
    def _():
        agg = (acc_ref[...] * nscale_ref[...]).astype(bf16)            # (N, Fe_pad)
        pre_n = (dot(x_ref[...], wn1x_ref[...])
                 + dot(agg, wn1a_ref[...])
                 + bn1_ref[...])
        h_n = jnp.maximum(pre_n, 0.0)
        node_emb = dot(h_n.astype(bf16), wn2_ref[...]) + bn2_ref[...]  # (N, Fn_pad) f32
        node_out_ref[...] = node_emb.astype(node_out_ref.dtype)

        # column-sum of the pre-scale accumulator == sum over all real edges
        edge_sum = jnp.sum(acc_ref[...], axis=0, keepdims=True)        # (1, Fe_pad)
        node_mean = (jnp.sum(node_emb, axis=0, keepdims=True) * inv_n).astype(bf16)
        edge_mean = (edge_sum * inv_e).astype(bf16)
        pre_g = (dot(node_mean, wg1n_ref[...])
                 + dot(edge_mean, wg1e_ref[...])
                 + bg1_ref[...])
        h_g = jnp.maximum(pre_g, 0.0)
        g_out_ref[...] = (dot(h_g.astype(bf16), wg2_ref[...])
                          + bg2_ref[...]).astype(g_out_ref.dtype)


# ---------------------------------------------------------------------------
# Weight preparation: split W1, fold globals into biases, pad lane-dense, cast
# ---------------------------------------------------------------------------
def _prep_layer_weights(layer_params, g, Fn, G, lane=128):
    bf16, f32 = jnp.bfloat16, jnp.float32
    g = g.astype(f32)

    H = layer_params["edge"]["W1"].shape[1]
    Fe_out = layer_params["edge"]["W2"].shape[1]
    H_pad = _round_up(H, lane)
    Fe_pad = _round_up(Fe_out, lane)
    Fn_pad = _round_up(Fn, lane)
    G_pad = _round_up(G, lane)

    # edge MLP: W1 rows ordered [g, sender, receiver, edge_attr]
    We1 = layer_params["edge"]["W1"].astype(f32)
    be1 = layer_params["edge"]["b1"].astype(f32) + g @ We1[:G]
    we1 = _pad_to(We1[G:], (We1.shape[0] - G, H_pad)).astype(bf16)
    be1 = _pad_to(be1, (1, H_pad))
    we2 = _pad_to(layer_params["edge"]["W2"].astype(f32), (H_pad, Fe_pad)).astype(bf16)
    be2 = _pad_to(layer_params["edge"]["b2"].astype(f32), (1, Fe_pad))

    # node MLP: W1 rows ordered [g, x, aggregation]
    Wn1 = layer_params["node"]["W1"].astype(f32)
    bn1 = layer_params["node"]["b1"].astype(f32) + g @ Wn1[:G]
    wn1x = _pad_to(Wn1[G:G + Fn], (Fn, H_pad)).astype(bf16)
    wn1a = _pad_to(Wn1[G + Fn:], (Fe_pad, H_pad)).astype(bf16)
    bn1 = _pad_to(bn1, (1, H_pad))
    wn2 = _pad_to(layer_params["node"]["W2"].astype(f32), (H_pad, Fn_pad)).astype(bf16)
    bn2 = _pad_to(layer_params["node"]["b2"].astype(f32), (1, Fn_pad))

    # global MLP: W1 rows ordered [g, node_mean, edge_mean]
    Wg1 = layer_params["glob"]["W1"].astype(f32)
    bg1 = layer_params["glob"]["b1"].astype(f32) + g @ Wg1[:G]
    wg1n = _pad_to(Wg1[G:G + Fn], (Fn_pad, H_pad)).astype(bf16)
    wg1e = _pad_to(Wg1[G + Fn:], (Fe_pad, H_pad)).astype(bf16)
    bg1 = _pad_to(bg1, (1, H_pad))
    wg2 = _pad_to(layer_params["glob"]["W2"].astype(f32), (H_pad, G_pad)).astype(bf16)
    bg2 = _pad_to(layer_params["glob"]["b2"].astype(f32), (1, G_pad))

    weights = (we1, be1, we2, be2,
               wn1x, wn1a, bn1, wn2, bn2,
               wg1n, wg1e, bg1, wg2, bg2)
    dims = dict(Fe_out=Fe_out, Fe_pad=Fe_pad, Fn_pad=Fn_pad, G_pad=G_pad)
    return weights, dims


# ---------------------------------------------------------------------------
# VMEM budgeting: footprint estimate + per-generation limit
# ---------------------------------------------------------------------------
def _estimate_vmem_bytes(weights, N, Fn, Fn_pad, Fe_pad, G_pad, tile_e, K_e, Fe_out):
    db = 2  # default double-buffering of pipelined refs
    tiled_io = db * (tile_e * K_e * 2 + tile_e * 4 + tile_e * Fe_out * 2)
    resident_in = db * (N * Fn * 2 + N * 4)
    w_bytes = db * sum(int(w.size) * w.dtype.itemsize for w in weights)
    resident_out = db * (N * Fn_pad * 2 + G_pad * 4)
    scratch = N * Fe_pad * 4
    return tiled_io + resident_in + w_bytes + resident_out + scratch


def _pick_vmem_limit(needed_bytes):
    cap = 64 * 1024 * 1024
    try:
        info = pltpu.get_tpu_info()
        cap = int(getattr(info, "vmem_capacity_bytes", cap) or cap)
    except Exception:
        pass
    ceiling = (cap * 3) // 4                  # leave headroom (v7x has only 64 MiB)
    want = 2 * needed_bytes + (8 << 20)       # 2x margin + fixed slack
    return int(min(max(want, 32 << 20), ceiling))


# ---------------------------------------------------------------------------
# One GraphNet layer (JAX glue + pallas_call)
# ---------------------------------------------------------------------------
def graphnet_forward(layer_params, x, edge_index, edge_attr, g, aggregate, *, tile_e=512):
    f32, bf16 = jnp.float32, jnp.bfloat16
    row, col = edge_index[0], edge_index[1]
    if edge_attr.ndim == 1:
        edge_attr = edge_attr.reshape(-1, 1)

    N, Fn = x.shape
    E = edge_attr.shape[0]
    G = g.shape[1]

    weights, d = _prep_layer_weights(layer_params, g, Fn, G)
    Fe_out, Fe_pad, Fn_pad, G_pad = d["Fe_out"], d["Fe_pad"], d["Fn_pad"], d["G_pad"]

    # gather + concat edge inputs once in glue -> one K = 2*Fn + Fe matmul operand
    x_bf = x.astype(bf16)
    edge_in = jnp.concatenate([x_bf[row], x_bf[col], edge_attr.astype(bf16)], axis=1)

    E_pad = _round_up(E, tile_e)
    edge_in = jnp.pad(edge_in, ((0, E_pad - E), (0, 0)))
    # sentinel index N for padded edges -> all-zero one-hot column inside the kernel
    row_pad = jnp.pad(row.astype(jnp.int32), (0, E_pad - E),
                      constant_values=N).reshape(1, E_pad)

    # per-node post-scale applied to the accumulated scatter-sum
    cnt = jnp.zeros((N,), f32).at[row].add(1.0)
    if aggregate == "mean":
        nscale = (1.0 / jnp.maximum(cnt, 1.0)).reshape(N, 1)   # empty groups -> 0
    elif aggregate == "sum":
        nscale = jnp.ones((N, 1), f32)
    else:
        raise NotImplementedError(aggregate)  # TODO(synk): max / softmax aggregation

    grid = (E_pad // tile_e,)
    K_e = edge_in.shape[1]

    def full(shape):
        nd = len(shape)
        return pl.BlockSpec(shape, lambda *_: (0,) * nd)

    in_specs = [
        pl.BlockSpec((tile_e, K_e), lambda e: (e, 0)),    # edge_in   (tiled over E)
        pl.BlockSpec((1, tile_e), lambda e: (0, e)),      # row idx   (tiled over E)
        full((N, Fn)),                                    # x         (resident)
        full((N, 1)),                                     # nscale    (resident)
    ] + [full(w.shape) for w in weights]                  # weights   (resident)

    out_shape = (
        jax.ShapeDtypeStruct((E_pad, Fe_out), bf16),      # true width, not lane-padded
        jax.ShapeDtypeStruct((N, Fn_pad), bf16),
        jax.ShapeDtypeStruct((1, G_pad), f32),
    )
    out_specs = (
        pl.BlockSpec((tile_e, Fe_out), lambda e: (e, 0)),
        full((N, Fn_pad)),
        full((1, G_pad)),
    )

    kernel = functools.partial(
        graphnet_kernel,
        n_nodes=N, inv_n=1.0 / N, inv_e=1.0 / E)

    vmem_needed = _estimate_vmem_bytes(
        weights, N, Fn, Fn_pad, Fe_pad, G_pad, tile_e, K_e, Fe_out)

    edge_out, node_out, g_out = pl.pallas_call(
        kernel,
        grid=grid,
        in_specs=in_specs,
        out_specs=out_specs,
        out_shape=out_shape,
        scratch_shapes=[
            pltpu.VMEM((N, Fe_pad), f32),   # scatter-sum accumulator
        ],
        compiler_params=pltpu.CompilerParams(
            # E axis feeds the node accumulator -> must be sequential
            dimension_semantics=("arbitrary",),
            vmem_limit_bytes=_pick_vmem_limit(vmem_needed),
        ),
    )(edge_in, row_pad, x_bf, nscale, *weights)

    # slice away edge-row padding and lane padding
    return edge_out[:E], node_out[:, :Fn], g_out[:, :G]


# ---------------------------------------------------------------------------
# MP_Block forward
# ---------------------------------------------------------------------------
def mp_block_forward(params, x, edge_index, edge_attr, global_features, *, tile_e=512):
    # TODO(synk): fuse l1+l2 into a single pallas_call so e1/n1/g1 never round-trip HBM.
    e1, n1, g1 = graphnet_forward(params["l1"], x, edge_index, edge_attr,
                                  global_features, aggregate="mean", tile_e=tile_e)
    edge_index_T = jnp.stack([edge_index[1], edge_index[0]], axis=0)
    e2, n2, g2 = graphnet_forward(params["l2"], n1, edge_index_T, e1,
                                  g1, aggregate="sum", tile_e=tile_e)
    return (e2.astype(jnp.float32), n2.astype(jnp.float32), g2.astype(jnp.float32))


# ---------------------------------------------------------------------------
# Deterministic synthetic parameter init (shapes follow the torch __init__)
# ---------------------------------------------------------------------------
def mlp_params(key, d_in, d_hidden, d_out):
    k1, k2, k3, k4 = jax.random.split(key, 4)
    f32 = jnp.float32
    return {
        "W1": jax.random.normal(k1, (d_in, d_hidden), f32) / jnp.sqrt(float(d_in)),
        "b1": jax.random.normal(k2, (1, d_hidden), f32) * 0.01,
        "W2": jax.random.normal(k3, (d_hidden, d_out), f32) / jnp.sqrt(float(d_hidden)),
        "b2": jax.random.normal(k4, (1, d_out), f32) * 0.01,
    }


def make_mp_block_params(key, *, last, edge_features_in, edge_features_hidden,
                         node_features, global_features, hidden_size):
    Fe_in, Fe_hid = edge_features_in, edge_features_hidden
    Fn, G, H = node_features, global_features, hidden_size
    Fe_out_final = 1 if last else Fe_hid
    ks = jax.random.split(key, 6)
    l1 = {
        "edge": mlp_params(ks[0], G + Fe_in + 2 * Fn, H, Fe_hid),
        "node": mlp_params(ks[1], G + Fe_hid + Fn, H, Fn),
        "glob": mlp_params(ks[2], Fe_hid + Fn + G, H, G),
    }
    l2 = {
        "edge": mlp_params(ks[3], G + Fe_hid + 2 * Fn, H, Fe_out_final),
        "node": mlp_params(ks[4], G + Fe_out_final + Fn, H, Fn),
        "glob": mlp_params(ks[5], Fe_out_final + Fn + G, H, G),
    }
    return {"l1": l1, "l2": l2}


# ---------------------------------------------------------------------------
if __name__ == "__main__":
    # small, forward-consistent shapes (E chosen so the grid has 3 edge tiles)
    N = 64              # nodes
    E = 1200            # edges  -> padded to 1536 = 3 tiles of 512
    Fn = 8              # node_features
    Fe_in = 4           # edge_features_in
    Fe_hid = 8          # edge_features_hidden
    G = 4               # global_features
    H = 32              # hidden_size
    last = True         # -> final edge_features_out = 1

    key = jax.random.PRNGKey(0)
    kx, ke, ka, kg, kp = jax.random.split(key, 5)

    x = jax.random.normal(kx, (N, Fn), jnp.float32)
    edge_index = jax.random.randint(ke, (2, E), 0, N, dtype=jnp.int32)
    edge_attr = jax.random.normal(ka, (E, Fe_in), jnp.float32)
    g = jax.random.normal(kg, (1, G), jnp.float32)

    params = make_mp_block_params(
        kp, last=last, edge_features_in=Fe_in, edge_features_hidden=Fe_hid,
        node_features=Fn, global_features=G, hidden_size=H)

    fwd = jax.jit(functools.partial(mp_block_forward, tile_e=512))
    edge_emb, node_emb, g_out = fwd(params, x, edge_index, edge_attr, g)
    jax.block_until_ready((edge_emb, node_emb, g_out))

    assert edge_emb.shape == (E, 1)
    assert node_emb.shape == (N, Fn)
    assert g_out.shape == (1, G)
    print("KERNEL_OK")
</pallas_src>

<mosaic_0001>
module attributes {stable_mosaic.version = 11 : i64} {
  func.func private @main(%arg0: i32) attributes {dimension_semantics = [#tpu.dimension_semantics<core_parallel>], iteration_bounds = array<i64: 2>, tpu.core_type = #tpu.core_type<sc_scalar_subcore>, window_params = []} {
    return
  }
}

module attributes {stable_mosaic.version = 11 : i64} {
  func.func private @main(%arg0: i32) attributes {dimension_semantics = [#tpu.dimension_semantics<core_parallel>], iteration_bounds = array<i64: 2>, tpu.core_type = #tpu.core_type<sc_scalar_subcore>, window_params = []} {
    return
  }
}

module attributes {stable_mosaic.version = 11 : i64} {
  func.func @graphnet_kernel(%arg0: i32, %arg1: memref<512x20xbf16, #tpu.memory_space<vmem>>, %arg2: memref<1x512xi32, #tpu.memory_space<vmem>>, %arg3: memref<64x8xbf16, #tpu.memory_space<vmem>>, %arg4: memref<64x1xf32, #tpu.memory_space<vmem>>, %arg5: memref<20x128xbf16, #tpu.memory_space<vmem>>, %arg6: memref<1x128xf32, #tpu.memory_space<vmem>>, %arg7: memref<128x128xbf16, #tpu.memory_space<vmem>>, %arg8: memref<1x128xf32, #tpu.memory_space<vmem>>, %arg9: memref<8x128xbf16, #tpu.memory_space<vmem>>, %arg10: memref<128x128xbf16, #tpu.memory_space<vmem>>, %arg11: memref<1x128xf32, #tpu.memory_space<vmem>>, %arg12: memref<128x128xbf16, #tpu.memory_space<vmem>>, %arg13: memref<1x128xf32, #tpu.memory_space<vmem>>, %arg14: memref<128x128xbf16, #tpu.memory_space<vmem>>, %arg15: memref<128x128xbf16, #tpu.memory_space<vmem>>, %arg16: memref<1x128xf32, #tpu.memory_space<vmem>>, %arg17: memref<128x128xbf16, #tpu.memory_space<vmem>>, %arg18: memref<1x128xf32, #tpu.memory_space<vmem>>, %arg19: memref<512x8xbf16, #tpu.memory_space<vmem>>, %arg20: memref<64x128xbf16, #tpu.memory_space<vmem>>, %arg21: memref<1x128xf32, #tpu.memory_space<vmem>>, %arg22: memref<64x128xf32, #tpu.memory_space<vmem>>) attributes {dimension_semantics = [#tpu.dimension_semantics<arbitrary>], iteration_bounds = array<i64: 3>, scalar_prefetch = 0 : i64, scratch_operands = 1 : i64, tpu.core_type = #tpu.core_type<tc>, window_params = [{transform_indices = @transform_0, window_bounds = array<i64: 512, 20>}, {transform_indices = @transform_1, window_bounds = array<i64: 1, 512>}, {pipeline_mode = #tpu.pipeline_mode<synchronous>, transform_indices = @transform_2, window_bounds = array<i64: 64, 8>}, {pipeline_mode = #tpu.pipeline_mode<synchronous>, transform_indices = @transform_3, window_bounds = array<i64: 64, 1>}, {pipeline_mode = #tpu.pipeline_mode<synchronous>, transform_indices = @transform_4, window_bounds = array<i64: 20, 128>}, {pipeline_mode = #tpu.pipeline_mode<synchronous>, transform_indices = @transform_5, window_bounds = array<i64: 1, 128>}, {pipeline_mode = #tpu.pipeline_mode<synchronous>, transform_indices = @transform_6, window_bounds = array<i64: 128, 128>}, {pipeline_mode = #tpu.pipeline_mode<synchronous>, transform_indices = @transform_7, window_bounds = array<i64: 1, 128>}, {pipeline_mode = #tpu.pipeline_mode<synchronous>, transform_indices = @transform_8, window_bounds = array<i64: 8, 128>}, {pipeline_mode = #tpu.pipeline_mode<synchronous>, transform_indices = @transform_9, window_bounds = array<i64: 128, 128>}, {pipeline_mode = #tpu.pipeline_mode<synchronous>, transform_indices = @transform_10, window_bounds = array<i64: 1, 128>}, {pipeline_mode = #tpu.pipeline_mode<synchronous>, transform_indices = @transform_11, window_bounds = array<i64: 128, 128>}, {pipeline_mode = #tpu.pipeline_mode<synchronous>, transform_indices = @transform_12, window_bounds = array<i64: 1, 128>}, {pipeline_mode = #tpu.pipeline_mode<synchronous>, transform_indices = @transform_13, window_bounds = array<i64: 128, 128>}, {pipeline_mode = #tpu.pipeline_mode<synchronous>, transform_indices = @transform_14, window_bounds = array<i64: 128, 128>}, {pipeline_mode = #tpu.pipeline_mode<synchronous>, transform_indices = @transform_15, window_bounds = array<i64: 1, 128>}, {pipeline_mode = #tpu.pipeline_mode<synchronous>, transform_indices = @transform_16, window_bounds = array<i64: 128, 128>}, {pipeline_mode = #tpu.pipeline_mode<synchronous>, transform_indices = @transform_17, window_bounds = array<i64: 1, 128>}, {transform_indices = @transform_18, window_bounds = array<i64: 512, 8>}, {pipeline_mode = #tpu.pipeline_mode<synchronous>, transform_indices = @transform_19, window_bounds = array<i64: 64, 128>}, {pipeline_mode = #tpu.pipeline_mode<synchronous>, transform_indices = @transform_20, window_bounds = array<i64: 1, 128>}]} {
    %c0_i32 = arith.constant 0 : i32
    %0 = arith.cmpi eq, %arg0, %c0_i32 : i32
    %1 = arith.extui %0 : i1 to i32
    %c0_i32_0 = arith.constant 0 : i32
    %2 = arith.cmpi ne, %1, %c0_i32_0 : i32
    scf.if %2 {
      %cst_22 = arith.constant 0.000000e+00 : f32
      %35 = vector.broadcast %cst_22 : f32 to vector<64x128xf32>
      %c0_23 = arith.constant 0 : index
      %c0_24 = arith.constant 0 : index
      %36 = vector.load %arg22[%c0_23, %c0_24] : memref<64x128xf32, #tpu.memory_space<vmem>>, vector<64x128xf32>
      tpu.vector_store %arg22[%c0_23, %c0_24], %35 {strides = array<i32>} : memref<64x128xf32, #tpu.memory_space<vmem>>, vector<64x128xf32>,
    } else {
    }
    %c0 = arith.constant 0 : index
    %c0_1 = arith.constant 0 : index
    %3 = vector.load %arg1[%c0, %c0_1] : memref<512x20xbf16, #tpu.memory_space<vmem>>, vector<512x20xbf16>
    %c0_2 = arith.constant 0 : index
    %c0_3 = arith.constant 0 : index
    %4 = vector.load %arg5[%c0_2, %c0_3] : memref<20x128xbf16, #tpu.memory_space<vmem>>, vector<20x128xbf16>
    %cst = arith.constant dense<0.000000e+00> : vector<512x128xf32>
    %5 = tpu.matmul %3, %4, %cst {dimension_numbers = #tpu.dot_dimension_numbers<[1], [0], [0], [1], [0, 0, 1, 1], [], []>} : vector<512x20xbf16>, vector<20x128xbf16>, vector<512x128xf32> -> vector<512x128xf32>
    %c0_4 = arith.constant 0 : index
    %c0_5 = arith.constant 0 : index
    %6 = vector.load %arg6[%c0_4, %c0_5] : memref<1x128xf32, #tpu.memory_space<vmem>>, vector<1x128xf32>
    %7 = vector.broadcast %6 : vector<1x128xf32> to vector<512x128xf32>
    %8 = arith.addf %5, %7 : vector<512x128xf32>
    %cst_6 = arith.constant 0.000000e+00 : f32
    %9 = vector.broadcast %cst_6 : f32 to vector<512x128xf32>
    %10 = arith.maximumf %8, %9 : vector<512x128xf32>
    %11 = arith.truncf %10 : vector<512x128xf32> to vector<512x128xbf16>
    %c0_7 = arith.constant 0 : index
    %c0_8 = arith.constant 0 : index
    %12 = vector.load %arg7[%c0_7, %c0_8] : memref<128x128xbf16, #tpu.memory_space<vmem>>, vector<128x128xbf16>
    %cst_9 = arith.constant dense<0.000000e+00> : vector<512x128xf32>
    %13 = tpu.matmul %11, %12, %cst_9 {dimension_numbers = #tpu.dot_dimension_numbers<[1], [0], [0], [1], [0, 0, 1, 1], [], []>} : vector<512x128xbf16>, vector<128x128xbf16>, vector<512x128xf32> -> vector<512x128xf32>
    %c0_10 = arith.constant 0 : index
    %c0_11 = arith.constant 0 : index
    %14 = vector.load %arg8[%c0_10, %c0_11] : memref<1x128xf32, #tpu.memory_space<vmem>>, vector<1x128xf32>
    %15 = vector.broadcast %14 : vector<1x128xf32> to vector<512x128xf32>
    %16 = arith.addf %13, %15 : vector<512x128xf32>
    %17 = vector.extract_strided_slice %16 {offsets = [0, 0], sizes = [512, 8], strides = [1, 1]} : vector<512x128xf32> to vector<512x8xf32>
    %18 = arith.truncf %17 : vector<512x8xf32> to vector<512x8xbf16>
    %c0_12 = arith.constant 0 : index
    %c0_13 = arith.constant 0 : index
    %19 = vector.load %arg19[%c0_12, %c0_13] : memref<512x8xbf16, #tpu.memory_space<vmem>>, vector<512x8xbf16>
    tpu.vector_store %arg19[%c0_12, %c0_13], %18 {strides = array<i32>} : memref<512x8xbf16, #tpu.memory_space<vmem>>, vector<512x8xbf16>,
    %20 = tpu.iota {dimensions = array<i32: 0>} : vector<64x512xi32>
    %c0_14 = arith.constant 0 : index
    %c0_15 = arith.constant 0 : index
    %21 = vector.load %arg2[%c0_14, %c0_15] : memref<1x512xi32, #tpu.memory_space<vmem>>, vector<1x512xi32>
    %22 = vector.broadcast %21 : vector<1x512xi32> to vector<64x512xi32>
    %23 = arith.cmpi eq, %20, %22 : vector<64x512xi32>
    %24 = arith.extui %23 : vector<64x512xi1> to vector<64x512xi32>
    %25 = arith.sitofp %24 : vector<64x512xi32> to vector<64x512xf32>
    %26 = arith.truncf %25 : vector<64x512xf32> to vector<64x512xbf16>
    %c0_16 = arith.constant 0 : index
    %c0_17 = arith.constant 0 : index
    %27 = vector.load %arg22[%c0_16, %c0_17] : memref<64x128xf32, #tpu.memory_space<vmem>>, vector<64x128xf32>
    %28 = arith.truncf %16 : vector<512x128xf32> to vector<512x128xbf16>
    %cst_18 = arith.constant dense<0.000000e+00> : vector<64x128xf32>
    %29 = tpu.matmul %26, %28, %cst_18 {dimension_numbers = #tpu.dot_dimension_numbers<[1], [0], [0], [1], [0, 0, 1, 1], [], []>} : vector<64x512xbf16>, vector<512x128xbf16>, vector<64x128xf32> -> vector<64x128xf32>
    %30 = arith.addf %27, %29 : vector<64x128xf32>
    %c0_19 = arith.constant 0 : index
    %c0_20 = arith.constant 0 : index
    %31 = vector.load %arg22[%c0_19, %c0_20] : memref<64x128xf32, #tpu.memory_space<vmem>>, vector<64x128xf32>
    tpu.vector_store %arg22[%c0_19, %c0_20], %30 {strides = array<i32>} : memref<64x128xf32, #tpu.memory_space<vmem>>, vector<64x128xf32>,
    %c2_i32 = arith.constant 2 : i32
    %32 = arith.cmpi eq, %arg0, %c2_i32 : i32
    %33 = arith.extui %32 : i1 to i32
    %c0_i32_21 = arith.constant 0 : i32
    %34 = arith.cmpi ne, %33, %c0_i32_21 : i32
    scf.if %34 {
      %c0_22 = arith.constant 0 : index
      %c0_23 = arith.constant 0 : index
      %35 = vector.load %arg22[%c0_22, %c0_23] : memref<64x128xf32, #tpu.memory_space<vmem>>, vector<64x128xf32>
      %c0_24 = arith.constant 0 : index
      %c0_25 = arith.constant 0 : index
      %36 = vector.load %arg4[%c0_24, %c0_25] : memref<64x1xf32, #tpu.memory_space<vmem>>, vector<64x1xf32>
      %37 = vector.broadcast %36 : vector<64x1xf32> to vector<64x128xf32>
      %38 = arith.mulf %35, %37 : vector<64x128xf32>
      %39 = arith.truncf %38 : vector<64x128xf32> to vector<64x128xbf16>
      %c0_26 = arith.constant 0 : index
      %c0_27 = arith.constant 0 : index
      %40 = vector.load %arg3[%c0_26, %c0_27] : memref<64x8xbf16, #tpu.memory_space<vmem>>, vector<64x8xbf16>
      %c0_28 = arith.constant 0 : index
      %c0_29 = arith.constant 0 : index
      %41 = vector.load %arg9[%c0_28, %c0_29] : memref<8x128xbf16, #tpu.memory_space<vmem>>, vector<8x128xbf16>
      %cst_30 = arith.constant dense<0.000000e+00> : vector<64x128xf32>
      %42 = tpu.matmul %40, %41, %cst_30 {dimension_numbers = #tpu.dot_dimension_numbers<[1], [0], [0], [1], [0, 0, 1, 1], [], []>} : vector<64x8xbf16>, vector<8x128xbf16>, vector<64x128xf32> -> vector<64x128xf32>
      %c0_31 = arith.constant 0 : index
      %c0_32 = arith.constant 0 : index
      %43 = vector.load %arg10[%c0_31, %c0_32] : memref<128x128xbf16, #tpu.memory_space<vmem>>, vector<128x128xbf16>
      %cst_33 = arith.constant dense<0.000000e+00> : vector<64x128xf32>
      %44 = tpu.matmul %39, %43, %cst_33 {dimension_numbers = #tpu.dot_dimension_numbers<[1], [0], [0], [1], [0, 0, 1, 1], [], []>} : vector<64x128xbf16>, vector<128x128xbf16>, vector<64x128xf32> -> vector<64x128xf32>
      %45 = arith.addf %42, %44 : vector<64x128xf32>
      %c0_34 = arith.constant 0 : index
      %c0_35 = arith.constant 0 : index
      %46 = vector.load %arg11[%c0_34, %c0_35] : memref<1x128xf32, #tpu.memory_space<vmem>>, vector<1x128xf32>
      %47 = vector.broadcast %46 : vector<1x128xf32> to vector<64x128xf32>
      %48 = arith.addf %45, %47 : vector<64x128xf32>
      %cst_36 = arith.constant 0.000000e+00 : f32
      %49 = vector.broadcast %cst_36 : f32 to vector<64x128xf32>
      %50 = arith.maximumf %48, %49 : vector<64x128xf32>
      %51 = arith.truncf %50 : vector<64x128xf32> to vector<64x128xbf16>
      %c0_37 = arith.constant 0 : index
      %c0_38 = arith.constant 0 : index
      %52 = vector.load %arg12[%c0_37, %c0_38] : memref<128x128xbf16, #tpu.memory_space<vmem>>, vector<128x128xbf16>
      %cst_39 = arith.constant dense<0.000000e+00> : vector<64x128xf32>
      %53 = tpu.matmul %51, %52, %cst_39 {dimension_numbers = #tpu.dot_dimension_numbers<[1], [0], [0], [1], [0, 0, 1, 1], [], []>} : vector<64x128xbf16>, vector<128x128xbf16>, vector<64x128xf32> -> vector<64x128xf32>
      %c0_40 = arith.constant 0 : index
      %c0_41 = arith.constant 0 : index
      %54 = vector.load %arg13[%c0_40, %c0_41] : memref<1x128xf32, #tpu.memory_space<vmem>>, vector<1x128xf32>
      %55 = vector.broadcast %54 : vector<1x128xf32> to vector<64x128xf32>
      %56 = arith.addf %53, %55 : vector<64x128xf32>
      %57 = arith.truncf %56 : vector<64x128xf32> to vector<64x128xbf16>
      %c0_42 = arith.constant 0 : index
      %c0_43 = arith.constant 0 : index
      %58 = vector.load %arg20[%c0_42, %c0_43] : memref<64x128xbf16, #tpu.memory_space<vmem>>, vector<64x128xbf16>
      tpu.vector_store %arg20[%c0_42, %c0_43], %57 {strides = array<i32>} : memref<64x128xbf16, #tpu.memory_space<vmem>>, vector<64x128xbf16>,
      %c0_44 = arith.constant 0 : index
      %c0_45 = arith.constant 0 : index
      %59 = vector.load %arg22[%c0_44, %c0_45] : memref<64x128xf32, #tpu.memory_space<vmem>>, vector<64x128xf32>
      %cst_46 = arith.constant dense<0.000000e+00> : vector<128xf32>
      %60 = vector.multi_reduction <add>, %59, %cst_46 [0] : vector<64x128xf32> to vector<128xf32>
      %61 = vector.shape_cast %60 : vector<128xf32> to vector<1x128xf32>
      %cst_47 = arith.constant dense<0.000000e+00> : vector<128xf32>
      %62 = vector.multi_reduction <add>, %56, %cst_47 [0] : vector<64x128xf32> to vector<128xf32>
      %63 = vector.shape_cast %62 : vector<128xf32> to vector<1x128xf32>
      %cst_48 = arith.constant 1.562500e-02 : f32
      %64 = vector.broadcast %cst_48 : f32 to vector<1x128xf32>
      %65 = arith.mulf %63, %64 : vector<1x128xf32>
      %66 = arith.truncf %65 : vector<1x128xf32> to vector<1x128xbf16>
      %cst_49 = arith.constant 8.33333353E-4 : f32
      %67 = vector.broadcast %cst_49 : f32 to vector<1x128xf32>
      %68 = arith.mulf %61, %67 : vector<1x128xf32>
      %69 = arith.truncf %68 : vector<1x128xf32> to vector<1x128xbf16>
      %c0_50 = arith.constant 0 : index
      %c0_51 = arith.constant 0 : index
      %70 = vector.load %arg14[%c0_50, %c0_51] : memref<128x128xbf16, #tpu.memory_space<vmem>>, vector<128x128xbf16>
      %cst_52 = arith.constant dense<0.000000e+00> : vector<1x128xf32>
      %71 = tpu.matmul %66, %70, %cst_52 {dimension_numbers = #tpu.dot_dimension_numbers<[1], [0], [0], [1], [0, 0, 1, 1], [], []>} : vector<1x128xbf16>, vector<128x128xbf16>, vector<1x128xf32> -> vector<1x128xf32>
      %c0_53 = arith.constant 0 : index
      %c0_54 = arith.constant 0 : index
      %72 = vector.load %arg15[%c0_53, %c0_54] : memref<128x128xbf16, #tpu.memory_space<vmem>>, vector<128x128xbf16>
      %cst_55 = arith.constant dense<0.000000e+00> : vector<1x128xf32>
      %73 = tpu.matmul %69, %72, %cst_55 {dimension_numbers = #tpu.dot_dimension_numbers<[1], [0], [0], [1], [0, 0, 1, 1], [], []>} : vector<1x128xbf16>, vector<128x128xbf16>, vector<1x128xf32> -> vector<1x128xf32>
      %74 = arith.addf %71, %73 : vector<1x128xf32>
      %c0_56 = arith.constant 0 : index
      %c0_57 = arith.constant 0 : index
      %75 = vector.load %arg16[%c0_56, %c0_57] : memref<1x128xf32, #tpu.memory_space<vmem>>, vector<1x128xf32>
      %76 = arith.addf %74, %75 : vector<1x128xf32>
      %cst_58 = arith.constant 0.000000e+00 : f32
      %77 = vector.broadcast %cst_58 : f32 to vector<1x128xf32>
      %78 = arith.maximumf %76, %77 : vector<1x128xf32>
      %79 = arith.truncf %78 : vector<1x128xf32> to vector<1x128xbf16>
      %c0_59 = arith.constant 0 : index
      %c0_60 = arith.constant 0 : index
      %80 = vector.load %arg17[%c0_59, %c0_60] : memref<128x128xbf16, #tpu.memory_space<vmem>>, vector<128x128xbf16>
      %cst_61 = arith.constant dense<0.000000e+00> : vector<1x128xf32>
      %81 = tpu.matmul %79, %80, %cst_61 {dimension_numbers = #tpu.dot_dimension_numbers<[1], [0], [0], [1], [0, 0, 1, 1], [], []>} : vector<1x128xbf16>, vector<128x128xbf16>, vector<1x128xf32> -> vector<1x128xf32>
      %c0_62 = arith.constant 0 : index
      %c0_63 = arith.constant 0 : index
      %82 = vector.load %arg18[%c0_62, %c0_63] : memref<1x128xf32, #tpu.memory_space<vmem>>, vector<1x128xf32>
      %83 = arith.addf %81, %82 : vector<1x128xf32>
      %c0_64 = arith.constant 0 : index
      %c0_65 = arith.constant 0 : index
      %84 = vector.load %arg21[%c0_64, %c0_65] : memref<1x128xf32, #tpu.memory_space<vmem>>, vector<1x128xf32>
      tpu.vector_store %arg21[%c0_64, %c0_65], %83 {strides = array<i32>} : memref<1x128xf32, #tpu.memory_space<vmem>>, vector<1x128xf32>,
    } else {
    }
    return
  }
  func.func @transform_0(%arg0: i32) -> (i32, i32) {
    %c0_i32 = arith.constant 0 : i32
    %c0_i32_0 = arith.constant 0 : i32
    return %arg0, %c0_i32 : i32, i32
  }
  func.func @transform_1(%arg0: i32) -> (i32, i32) {
    %c0_i32 = arith.constant 0 : i32
    %c0_i32_0 = arith.constant 0 : i32
    return %c0_i32, %arg0 : i32, i32
  }
  func.func @transform_2(%arg0: i32) -> (i32, i32) {
    %c0_i32 = arith.constant 0 : i32
    %c0_i32_0 = arith.constant 0 : i32
    %c0_i32_1 = arith.constant 0 : i32
    return %c0_i32, %c0_i32_0 : i32, i32
  }
  func.func @transform_3(%arg0: i32) -> (i32, i32) {
    %c0_i32 = arith.constant 0 : i32
    %c0_i32_0 = arith.constant 0 : i32
    %c0_i32_1 = arith.constant 0 : i32
    return %c0_i32, %c0_i32_0 : i32, i32
  }
  func.func @transform_4(%arg0: i32) -> (i32, i32) {
    %c0_i32 = arith.constant 0 : i32
    %c0_i32_0 = arith.constant 0 : i32
    %c0_i32_1 = arith.constant 0 : i32
    return %c0_i32, %c0_i32_0 : i32, i32
  }
  func.func @transform_5(%arg0: i32) -> (i32, i32) {
    %c0_i32 = arith.constant 0 : i32
    %c0_i32_0 = arith.constant 0 : i32
    %c0_i32_1 = arith.constant 0 : i32
    return %c0_i32, %c0_i32_0 : i32, i32
  }
  func.func @transform_6(%arg0: i32) -> (i32, i32) {
    %c0_i32 = arith.constant 0 : i32
    %c0_i32_0 = arith.constant 0 : i32
    %c0_i32_1 = arith.constant 0 : i32
    return %c0_i32, %c0_i32_0 : i32, i32
  }
  func.func @transform_7(%arg0: i32) -> (i32, i32) {
    %c0_i32 = arith.constant 0 : i32
    %c0_i32_0 = arith.constant 0 : i32
    %c0_i32_1 = arith.constant 0 : i32
    return %c0_i32, %c0_i32_0 : i32, i32
  }
  func.func @transform_8(%arg0: i32) -> (i32, i32) {
    %c0_i32 = arith.constant 0 : i32
    %c0_i32_0 = arith.constant 0 : i32
    %c0_i32_1 = arith.constant 0 : i32
    return %c0_i32, %c0_i32_0 : i32, i32
  }
  func.func @transform_9(%arg0: i32) -> (i32, i32) {
    %c0_i32 = arith.constant 0 : i32
    %c0_i32_0 = arith.constant 0 : i32
    %c0_i32_1 = arith.constant 0 : i32
    return %c0_i32, %c0_i32_0 : i32, i32
  }
  func.func @transform_10(%arg0: i32) -> (i32, i32) {
    %c0_i32 = arith.constant 0 : i32
    %c0_i32_0 = arith.constant 0 : i32
    %c0_i32_1 = arith.constant 0 : i32
    return %c0_i32, %c0_i32_0 : i32, i32
  }
  func.func @transform_11(%arg0: i32) -> (i32, i32) {
    %c0_i32 = arith.constant 0 : i32
    %c0_i32_0 = arith.constant 0 : i32
    %c0_i32_1 = arith.constant 0 : i32
    return %c0_i32, %c0_i32_0 : i32, i32
  }
  func.func @transform_12(%arg0: i32) -> (i32, i32) {
    %c0_i32 = arith.constant 0 : i32
    %c0_i32_0 = arith.constant 0 : i32
    %c0_i32_1 = arith.constant 0 : i32
    return %c0_i32, %c0_i32_0 : i32, i32
  }
  func.func @transform_13(%arg0: i32) -> (i32, i32) {
    %c0_i32 = arith.constant 0 : i32
    %c0_i32_0 = arith.constant 0 : i32
    %c0_i32_1 = arith.constant 0 : i32
    return %c0_i32, %c0_i32_0 : i32, i32
  }
  func.func @transform_14(%arg0: i32) -> (i32, i32) {
    %c0_i32 = arith.constant 0 : i32
    %c0_i32_0 = arith.constant 0 : i32
    %c0_i32_1 = arith.constant 0 : i32
    return %c0_i32, %c0_i32_0 : i32, i32
  }
  func.func @transform_15(%arg0: i32) -> (i32, i32) {
    %c0_i32 = arith.constant 0 : i32
    %c0_i32_0 = arith.constant 0 : i32
    %c0_i32_1 = arith.constant 0 : i32
    return %c0_i32, %c0_i32_0 : i32, i32
  }
  func.func @transform_16(%arg0: i32) -> (i32, i32) {
    %c0_i32 = arith.constant 0 : i32
    %c0_i32_0 = arith.constant 0 : i32
    %c0_i32_1 = arith.constant 0 : i32
    return %c0_i32, %c0_i32_0 : i32, i32
  }
  func.func @transform_17(%arg0: i32) -> (i32, i32) {
    %c0_i32 = arith.constant 0 : i32
    %c0_i32_0 = arith.constant 0 : i32
    %c0_i32_1 = arith.constant 0 : i32
    return %c0_i32, %c0_i32_0 : i32, i32
  }
  func.func @transform_18(%arg0: i32) -> (i32, i32) {
    %c0_i32 = arith.constant 0 : i32
    %c0_i32_0 = arith.constant 0 : i32
    return %arg0, %c0_i32 : i32, i32
  }
  func.func @transform_19(%arg0: i32) -> (i32, i32) {
    %c0_i32 = arith.constant 0 : i32
    %c0_i32_0 = arith.constant 0 : i32
    %c0_i32_1 = arith.constant 0 : i32
    return %c0_i32, %c0_i32_0 : i32, i32
  }
  func.func @transform_20(%arg0: i32) -> (i32, i32) {
    %c0_i32 = arith.constant 0 : i32
    %c0_i32_0 = arith.constant 0 : i32
    %c0_i32_1 = arith.constant 0 : i32
    return %c0_i32, %c0_i32_0 : i32, i32
  }
}

module attributes {stable_mosaic.version = 11 : i64} {
  func.func @graphnet_kernel(%arg0: i32, %arg1: memref<512x24xbf16, #tpu.memory_space<vmem>>, %arg2: memref<1x512xi32, #tpu.memory_space<vmem>>, %arg3: memref<64x8xbf16, #tpu.memory_space<vmem>>, %arg4: memref<64x1xf32, #tpu.memory_space<vmem>>, %arg5: memref<24x128xbf16, #tpu.memory_space<vmem>>, %arg6: memref<1x128xf32, #tpu.memory_space<vmem>>, %arg7: memref<128x128xbf16, #tpu.memory_space<vmem>>, %arg8: memref<1x128xf32, #tpu.memory_space<vmem>>, %arg9: memref<8x128xbf16, #tpu.memory_space<vmem>>, %arg10: memref<128x128xbf16, #tpu.memory_space<vmem>>, %arg11: memref<1x128xf32, #tpu.memory_space<vmem>>, %arg12: memref<128x128xbf16, #tpu.memory_space<vmem>>, %arg13: memref<1x128xf32, #tpu.memory_space<vmem>>, %arg14: memref<128x128xbf16, #tpu.memory_space<vmem>>, %arg15: memref<128x128xbf16, #tpu.memory_space<vmem>>, %arg16: memref<1x128xf32, #tpu.memory_space<vmem>>, %arg17: memref<128x128xbf16, #tpu.memory_space<vmem>>, %arg18: memref<1x128xf32, #tpu.memory_space<vmem>>, %arg19: memref<512x1xbf16, #tpu.memory_space<vmem>>, %arg20: memref<64x128xbf16, #tpu.memory_space<vmem>>, %arg21: memref<1x128xf32, #tpu.memory_space<vmem>>, %arg22: memref<64x128xf32, #tpu.memory_space<vmem>>) attributes {dimension_semantics = [#tpu.dimension_semantics<arbitrary>], iteration_bounds = array<i64: 3>, scalar_prefetch = 0 : i64, scratch_operands = 1 : i64, tpu.core_type = #tpu.core_type<tc>, window_params = [{transform_indices = @transform_0, window_bounds = array<i64: 512, 24>}, {transform_indices = @transform_1, window_bounds = array<i64: 1, 512>}, {pipeline_mode = #tpu.pipeline_mode<synchronous>, transform_indices = @transform_2, window_bounds = array<i64: 64, 8>}, {pipeline_mode = #tpu.pipeline_mode<synchronous>, transform_indices = @transform_3, window_bounds = array<i64: 64, 1>}, {pipeline_mode = #tpu.pipeline_mode<synchronous>, transform_indices = @transform_4, window_bounds = array<i64: 24, 128>}, {pipeline_mode = #tpu.pipeline_mode<synchronous>, transform_indices = @transform_5, window_bounds = array<i64: 1, 128>}, {pipeline_mode = #tpu.pipeline_mode<synchronous>, transform_indices = @transform_6, window_bounds = array<i64: 128, 128>}, {pipeline_mode = #tpu.pipeline_mode<synchronous>, transform_indices = @transform_7, window_bounds = array<i64: 1, 128>}, {pipeline_mode = #tpu.pipeline_mode<synchronous>, transform_indices = @transform_8, window_bounds = array<i64: 8, 128>}, {pipeline_mode = #tpu.pipeline_mode<synchronous>, transform_indices = @transform_9, window_bounds = array<i64: 128, 128>}, {pipeline_mode = #tpu.pipeline_mode<synchronous>, transform_indices = @transform_10, window_bounds = array<i64: 1, 128>}, {pipeline_mode = #tpu.pipeline_mode<synchronous>, transform_indices = @transform_11, window_bounds = array<i64: 128, 128>}, {pipeline_mode = #tpu.pipeline_mode<synchronous>, transform_indices = @transform_12, window_bounds = array<i64: 1, 128>}, {pipeline_mode = #tpu.pipeline_mode<synchronous>, transform_indices = @transform_13, window_bounds = array<i64: 128, 128>}, {pipeline_mode = #tpu.pipeline_mode<synchronous>, transform_indices = @transform_14, window_bounds = array<i64: 128, 128>}, {pipeline_mode = #tpu.pipeline_mode<synchronous>, transform_indices = @transform_15, window_bounds = array<i64: 1, 128>}, {pipeline_mode = #tpu.pipeline_mode<synchronous>, transform_indices = @transform_16, window_bounds = array<i64: 128, 128>}, {pipeline_mode = #tpu.pipeline_mode<synchronous>, transform_indices = @transform_17, window_bounds = array<i64: 1, 128>}, {transform_indices = @transform_18, window_bounds = array<i64: 512, 1>}, {pipeline_mode = #tpu.pipeline_mode<synchronous>, transform_indices = @transform_19, window_bounds = array<i64: 64, 128>}, {pipeline_mode = #tpu.pipeline_mode<synchronous>, transform_indices = @transform_20, window_bounds = array<i64: 1, 128>}]} {
    %c0_i32 = arith.constant 0 : i32
    %0 = arith.cmpi eq, %arg0, %c0_i32 : i32
    %1 = arith.extui %0 : i1 to i32
    %c0_i32_0 = arith.constant 0 : i32
    %2 = arith.cmpi ne, %1, %c0_i32_0 : i32
    scf.if %2 {
      %cst_22 = arith.constant 0.000000e+00 : f32
      %35 = vector.broadcast %cst_22 : f32 to vector<64x128xf32>
      %c0_23 = arith.constant 0 : index
      %c0_24 = arith.constant 0 : index
      %36 = vector.load %arg22[%c0_23, %c0_24] : memref<64x128xf32, #tpu.memory_space<vmem>>, vector<64x128xf32>
      tpu.vector_store %arg22[%c0_23, %c0_24], %35 {strides = array<i32>} : memref<64x128xf32, #tpu.memory_space<vmem>>, vector<64x128xf32>,
    } else {
    }
    %c0 = arith.constant 0 : index
    %c0_1 = arith.constant 0 : index
    %3 = vector.load %arg1[%c0, %c0_1] : memref<512x24xbf16, #tpu.memory_space<vmem>>, vector<512x24xbf16>
    %c0_2 = arith.constant 0 : index
    %c0_3 = arith.constant 0 : index
    %4 = vector.load %arg5[%c0_2, %c0_3] : memref<24x128xbf16, #tpu.memory_space<vmem>>, vector<24x128xbf16>
    %cst = arith.constant dense<0.000000e+00> : vector<512x128xf32>
    %5 = tpu.matmul %3, %4, %cst {dimension_numbers = #tpu.dot_dimension_numbers<[1], [0], [0], [1], [0, 0, 1, 1], [], []>} : vector<512x24xbf16>, vector<24x128xbf16>, vector<512x128xf32> -> vector<512x128xf32>
    %c0_4 = arith.constant 0 : index
    %c0_5 = arith.constant 0 : index
    %6 = vector.load %arg6[%c0_4, %c0_5] : memref<1x128xf32, #tpu.memory_space<vmem>>, vector<1x128xf32>
    %7 = vector.broadcast %6 : vector<1x128xf32> to vector<512x128xf32>
    %8 = arith.addf %5, %7 : vector<512x128xf32>
    %cst_6 = arith.constant 0.000000e+00 : f32
    %9 = vector.broadcast %cst_6 : f32 to vector<512x128xf32>
    %10 = arith.maximumf %8, %9 : vector<512x128xf32>
    %11 = arith.truncf %10 : vector<512x128xf32> to vector<512x128xbf16>
    %c0_7 = arith.constant 0 : index
    %c0_8 = arith.constant 0 : index
    %12 = vector.load %arg7[%c0_7, %c0_8] : memref<128x128xbf16, #tpu.memory_space<vmem>>, vector<128x128xbf16>
    %cst_9 = arith.constant dense<0.000000e+00> : vector<512x128xf32>
    %13 = tpu.matmul %11, %12, %cst_9 {dimension_numbers = #tpu.dot_dimension_numbers<[1], [0], [0], [1], [0, 0, 1, 1], [], []>} : vector<512x128xbf16>, vector<128x128xbf16>, vector<512x128xf32> -> vector<512x128xf32>
    %c0_10 = arith.constant 0 : index
    %c0_11 = arith.constant 0 : index
    %14 = vector.load %arg8[%c0_10, %c0_11] : memref<1x128xf32, #tpu.memory_space<vmem>>, vector<1x128xf32>
    %15 = vector.broadcast %14 : vector<1x128xf32> to vector<512x128xf32>
    %16 = arith.addf %13, %15 : vector<512x128xf32>
    %17 = vector.extract_strided_slice %16 {offsets = [0, 0], sizes = [512, 1], strides = [1, 1]} : vector<512x128xf32> to vector<512x1xf32>
    %18 = arith.truncf %17 : vector<512x1xf32> to vector<512x1xbf16>
    %c0_12 = arith.constant 0 : index
    %c0_13 = arith.constant 0 : index
    %19 = vector.load %arg19[%c0_12, %c0_13] : memref<512x1xbf16, #tpu.memory_space<vmem>>, vector<512x1xbf16>
    tpu.vector_store %arg19[%c0_12, %c0_13], %18 {strides = array<i32>} : memref<512x1xbf16, #tpu.memory_space<vmem>>, vector<512x1xbf16>,
    %20 = tpu.iota {dimensions = array<i32: 0>} : vector<64x512xi32>
    %c0_14 = arith.constant 0 : index
    %c0_15 = arith.constant 0 : index
    %21 = vector.load %arg2[%c0_14, %c0_15] : memref<1x512xi32, #tpu.memory_space<vmem>>, vector<1x512xi32>
    %22 = vector.broadcast %21 : vector<1x512xi32> to vector<64x512xi32>
    %23 = arith.cmpi eq, %20, %22 : vector<64x512xi32>
    %24 = arith.extui %23 : vector<64x512xi1> to vector<64x512xi32>
    %25 = arith.sitofp %24 : vector<64x512xi32> to vector<64x512xf32>
    %26 = arith.truncf %25 : vector<64x512xf32> to vector<64x512xbf16>
    %c0_16 = arith.constant 0 : index
    %c0_17 = arith.constant 0 : index
    %27 = vector.load %arg22[%c0_16, %c0_17] : memref<64x128xf32, #tpu.memory_space<vmem>>, vector<64x128xf32>
    %28 = arith.truncf %16 : vector<512x128xf32> to vector<512x128xbf16>
    %cst_18 = arith.constant dense<0.000000e+00> : vector<64x128xf32>
    %29 = tpu.matmul %26, %28, %cst_18 {dimension_numbers = #tpu.dot_dimension_numbers<[1], [0], [0], [1], [0, 0, 1, 1], [], []>} : vector<64x512xbf16>, vector<512x128xbf16>, vector<64x128xf32> -> vector<64x128xf32>
    %30 = arith.addf %27, %29 : vector<64x128xf32>
    %c0_19 = arith.constant 0 : index
    %c0_20 = arith.constant 0 : index
    %31 = vector.load %arg22[%c0_19, %c0_20] : memref<64x128xf32, #tpu.memory_space<vmem>>, vector<64x128xf32>
    tpu.vector_store %arg22[%c0_19, %c0_20], %30 {strides = array<i32>} : memref<64x128xf32, #tpu.memory_space<vmem>>, vector<64x128xf32>,
    %c2_i32 = arith.constant 2 : i32
    %32 = arith.cmpi eq, %arg0, %c2_i32 : i32
    %33 = arith.extui %32 : i1 to i32
    %c0_i32_21 = arith.constant 0 : i32
    %34 = arith.cmpi ne, %33, %c0_i32_21 : i32
    scf.if %34 {
      %c0_22 = arith.constant 0 : index
      %c0_23 = arith.constant 0 : index
      %35 = vector.load %arg22[%c0_22, %c0_23] : memref<64x128xf32, #tpu.memory_space<vmem>>, vector<64x128xf32>
      %c0_24 = arith.constant 0 : index
      %c0_25 = arith.constant 0 : index
      %36 = vector.load %arg4[%c0_24, %c0_25] : memref<64x1xf32, #tpu.memory_space<vmem>>, vector<64x1xf32>
      %37 = vector.broadcast %36 : vector<64x1xf32> to vector<64x128xf32>
      %38 = arith.mulf %35, %37 : vector<64x128xf32>
      %39 = arith.truncf %38 : vector<64x128xf32> to vector<64x128xbf16>
      %c0_26 = arith.constant 0 : index
      %c0_27 = arith.constant 0 : index
      %40 = vector.load %arg3[%c0_26, %c0_27] : memref<64x8xbf16, #tpu.memory_space<vmem>>, vector<64x8xbf16>
      %c0_28 = arith.constant 0 : index
      %c0_29 = arith.constant 0 : index
      %41 = vector.load %arg9[%c0_28, %c0_29] : memref<8x128xbf16, #tpu.memory_space<vmem>>, vector<8x128xbf16>
      %cst_30 = arith.constant dense<0.000000e+00> : vector<64x128xf32>
      %42 = tpu.matmul %40, %41, %cst_30 {dimension_numbers = #tpu.dot_dimension_numbers<[1], [0], [0], [1], [0, 0, 1, 1], [], []>} : vector<64x8xbf16>, vector<8x128xbf16>, vector<64x128xf32> -> vector<64x128xf32>
      %c0_31 = arith.constant 0 : index
      %c0_32 = arith.constant 0 : index
      %43 = vector.load %arg10[%c0_31, %c0_32] : memref<128x128xbf16, #tpu.memory_space<vmem>>, vector<128x128xbf16>
      %cst_33 = arith.constant dense<0.000000e+00> : vector<64x128xf32>
      %44 = tpu.matmul %39, %43, %cst_33 {dimension_numbers = #tpu.dot_dimension_numbers<[1], [0], [0], [1], [0, 0, 1, 1], [], []>} : vector<64x128xbf16>, vector<128x128xbf16>, vector<64x128xf32> -> vector<64x128xf32>
      %45 = arith.addf %42, %44 : vector<64x128xf32>
      %c0_34 = arith.constant 0 : index
      %c0_35 = arith.constant 0 : index
      %46 = vector.load %arg11[%c0_34, %c0_35] : memref<1x128xf32, #tpu.memory_space<vmem>>, vector<1x128xf32>
      %47 = vector.broadcast %46 : vector<1x128xf32> to vector<64x128xf32>
      %48 = arith.addf %45, %47 : vector<64x128xf32>
      %cst_36 = arith.constant 0.000000e+00 : f32
      %49 = vector.broadcast %cst_36 : f32 to vector<64x128xf32>
      %50 = arith.maximumf %48, %49 : vector<64x128xf32>
      %51 = arith.truncf %50 : vector<64x128xf32> to vector<64x128xbf16>
      %c0_37 = arith.constant 0 : index
      %c0_38 = arith.constant 0 : index
      %52 = vector.load %arg12[%c0_37, %c0_38] : memref<128x128xbf16, #tpu.memory_space<vmem>>, vector<128x128xbf16>
      %cst_39 = arith.constant dense<0.000000e+00> : vector<64x128xf32>
      %53 = tpu.matmul %51, %52, %cst_39 {dimension_numbers = #tpu.dot_dimension_numbers<[1], [0], [0], [1], [0, 0, 1, 1], [], []>} : vector<64x128xbf16>, vector<128x128xbf16>, vector<64x128xf32> -> vector<64x128xf32>
      %c0_40 = arith.constant 0 : index
      %c0_41 = arith.constant 0 : index
      %54 = vector.load %arg13[%c0_40, %c0_41] : memref<1x128xf32, #tpu.memory_space<vmem>>, vector<1x128xf32>
      %55 = vector.broadcast %54 : vector<1x128xf32> to vector<64x128xf32>
      %56 = arith.addf %53, %55 : vector<64x128xf32>
      %57 = arith.truncf %56 : vector<64x128xf32> to vector<64x128xbf16>
      %c0_42 = arith.constant 0 : index
      %c0_43 = arith.constant 0 : index
      %58 = vector.load %arg20[%c0_42, %c0_43] : memref<64x128xbf16, #tpu.memory_space<vmem>>, vector<64x128xbf16>
      tpu.vector_store %arg20[%c0_42, %c0_43], %57 {strides = array<i32>} : memref<64x128xbf16, #tpu.memory_space<vmem>>, vector<64x128xbf16>,
      %c0_44 = arith.constant 0 : index
      %c0_45 = arith.constant 0 : index
      %59 = vector.load %arg22[%c0_44, %c0_45] : memref<64x128xf32, #tpu.memory_space<vmem>>, vector<64x128xf32>
      %cst_46 = arith.constant dense<0.000000e+00> : vector<128xf32>
      %60 = vector.multi_reduction <add>, %59, %cst_46 [0] : vector<64x128xf32> to vector<128xf32>
      %61 = vector.shape_cast %60 : vector<128xf32> to vector<1x128xf32>
      %cst_47 = arith.constant dense<0.000000e+00> : vector<128xf32>
      %62 = vector.multi_reduction <add>, %56, %cst_47 [0] : vector<64x128xf32> to vector<128xf32>
      %63 = vector.shape_cast %62 : vector<128xf32> to vector<1x128xf32>
      %cst_48 = arith.constant 1.562500e-02 : f32
      %64 = vector.broadcast %cst_48 : f32 to vector<1x128xf32>
      %65 = arith.mulf %63, %64 : vector<1x128xf32>
      %66 = arith.truncf %65 : vector<1x128xf32> to vector<1x128xbf16>
      %cst_49 = arith.constant 8.33333353E-4 : f32
      %67 = vector.broadcast %cst_49 : f32 to vector<1x128xf32>
      %68 = arith.mulf %61, %67 : vector<1x128xf32>
      %69 = arith.truncf %68 : vector<1x128xf32> to vector<1x128xbf16>
      %c0_50 = arith.constant 0 : index
      %c0_51 = arith.constant 0 : index
      %70 = vector.load %arg14[%c0_50, %c0_51] : memref<128x128xbf16, #tpu.memory_space<vmem>>, vector<128x128xbf16>
      %cst_52 = arith.constant dense<0.000000e+00> : vector<1x128xf32>
      %71 = tpu.matmul %66, %70, %cst_52 {dimension_numbers = #tpu.dot_dimension_numbers<[1], [0], [0], [1], [0, 0, 1, 1], [], []>} : vector<1x128xbf16>, vector<128x128xbf16>, vector<1x128xf32> -> vector<1x128xf32>
      %c0_53 = arith.constant 0 : index
      %c0_54 = arith.constant 0 : index
      %72 = vector.load %arg15[%c0_53, %c0_54] : memref<128x128xbf16, #tpu.memory_space<vmem>>, vector<128x128xbf16>
      %cst_55 = arith.constant dense<0.000000e+00> : vector<1x128xf32>
      %73 = tpu.matmul %69, %72, %cst_55 {dimension_numbers = #tpu.dot_dimension_numbers<[1], [0], [0], [1], [0, 0, 1, 1], [], []>} : vector<1x128xbf16>, vector<128x128xbf16>, vector<1x128xf32> -> vector<1x128xf32>
      %74 = arith.addf %71, %73 : vector<1x128xf32>
      %c0_56 = arith.constant 0 : index
      %c0_57 = arith.constant 0 : index
      %75 = vector.load %arg16[%c0_56, %c0_57] : memref<1x128xf32, #tpu.memory_space<vmem>>, vector<1x128xf32>
      %76 = arith.addf %74, %75 : vector<1x128xf32>
      %cst_58 = arith.constant 0.000000e+00 : f32
      %77 = vector.broadcast %cst_58 : f32 to vector<1x128xf32>
      %78 = arith.maximumf %76, %77 : vector<1x128xf32>
      %79 = arith.truncf %78 : vector<1x128xf32> to vector<1x128xbf16>
      %c0_59 = arith.constant 0 : index
      %c0_60 = arith.constant 0 : index
      %80 = vector.load %arg17[%c0_59, %c0_60] : memref<128x128xbf16, #tpu.memory_space<vmem>>, vector<128x128xbf16>
      %cst_61 = arith.constant dense<0.000000e+00> : vector<1x128xf32>
      %81 = tpu.matmul %79, %80, %cst_61 {dimension_numbers = #tpu.dot_dimension_numbers<[1], [0], [0], [1], [0, 0, 1, 1], [], []>} : vector<1x128xbf16>, vector<128x128xbf16>, vector<1x128xf32> -> vector<1x128xf32>
      %c0_62 = arith.constant 0 : index
      %c0_63 = arith.constant 0 : index
      %82 = vector.load %arg18[%c0_62, %c0_63] : memref<1x128xf32, #tpu.memory_space<vmem>>, vector<1x128xf32>
      %83 = arith.addf %81, %82 : vector<1x128xf32>
      %c0_64 = arith.constant 0 : index
      %c0_65 = arith.constant 0 : index
      %84 = vector.load %arg21[%c0_64, %c0_65] : memref<1x128xf32, #tpu.memory_space<vmem>>, vector<1x128xf32>
      tpu.vector_store %arg21[%c0_64, %c0_65], %83 {strides = array<i32>} : memref<1x128xf32, #tpu.memory_space<vmem>>, vector<1x128xf32>,
    } else {
    }
    return
  }
  func.func @transform_0(%arg0: i32) -> (i32, i32) {
    %c0_i32 = arith.constant 0 : i32
    %c0_i32_0 = arith.constant 0 : i32
    return %arg0, %c0_i32 : i32, i32
  }
  func.func @transform_1(%arg0: i32) -> (i32, i32) {
    %c0_i32 = arith.constant 0 : i32
    %c0_i32_0 = arith.constant 0 : i32
    return %c0_i32, %arg0 : i32, i32
  }
  func.func @transform_2(%arg0: i32) -> (i32, i32) {
    %c0_i32 = arith.constant 0 : i32
    %c0_i32_0 = arith.constant 0 : i32
    %c0_i32_1 = arith.constant 0 : i32
    return %c0_i32, %c0_i32_0 : i32, i32
  }
  func.func @transform_3(%arg0: i32) -> (i32, i32) {
    %c0_i32 = arith.constant 0 : i32
    %c0_i32_0 = arith.constant 0 : i32
    %c0_i32_1 = arith.constant 0 : i32
    return %c0_i32, %c0_i32_0 : i32, i32
  }
  func.func @transform_4(%arg0: i32) -> (i32, i32) {
    %c0_i32 = arith.constant 0 : i32
    %c0_i32_0 = arith.constant 0 : i32
    %c0_i32_1 = arith.constant 0 : i32
    return %c0_i32, %c0_i32_0 : i32, i32
  }
  func.func @transform_5(%arg0: i32) -> (i32, i32) {
    %c0_i32 = arith.constant 0 : i32
    %c0_i32_0 = arith.constant 0 : i32
    %c0_i32_1 = arith.constant 0 : i32
    return %c0_i32, %c0_i32_0 : i32, i32
  }
  func.func @transform_6(%arg0: i32) -> (i32, i32) {
    %c0_i32 = arith.constant 0 : i32
    %c0_i32_0 = arith.constant 0 : i32
    %c0_i32_1 = arith.constant 0 : i32
    return %c0_i32, %c0_i32_0 : i32, i32
  }
  func.func @transform_7(%arg0: i32) -> (i32, i32) {
    %c0_i32 = arith.constant 0 : i32
    %c0_i32_0 = arith.constant 0 : i32
    %c0_i32_1 = arith.constant 0 : i32
    return %c0_i32, %c0_i32_0 : i32, i32
  }
  func.func @transform_8(%arg0: i32) -> (i32, i32) {
    %c0_i32 = arith.constant 0 : i32
    %c0_i32_0 = arith.constant 0 : i32
    %c0_i32_1 = arith.constant 0 : i32
    return %c0_i32, %c0_i32_0 : i32, i32
  }
  func.func @transform_9(%arg0: i32) -> (i32, i32) {
    %c0_i32 = arith.constant 0 : i32
    %c0_i32_0 = arith.constant 0 : i32
    %c0_i32_1 = arith.constant 0 : i32
    return %c0_i32, %c0_i32_0 : i32, i32
  }
  func.func @transform_10(%arg0: i32) -> (i32, i32) {
    %c0_i32 = arith.constant 0 : i32
    %c0_i32_0 = arith.constant 0 : i32
    %c0_i32_1 = arith.constant 0 : i32
    return %c0_i32, %c0_i32_0 : i32, i32
  }
  func.func @transform_11(%arg0: i32) -> (i32, i32) {
    %c0_i32 = arith.constant 0 : i32
    %c0_i32_0 = arith.constant 0 : i32
    %c0_i32_1 = arith.constant 0 : i32
    return %c0_i32, %c0_i32_0 : i32, i32
  }
  func.func @transform_12(%arg0: i32) -> (i32, i32) {
    %c0_i32 = arith.constant 0 : i32
    %c0_i32_0 = arith.constant 0 : i32
    %c0_i32_1 = arith.constant 0 : i32
    return %c0_i32, %c0_i32_0 : i32, i32
  }
  func.func @transform_13(%arg0: i32) -> (i32, i32) {
    %c0_i32 = arith.constant 0 : i32
    %c0_i32_0 = arith.constant 0 : i32
    %c0_i32_1 = arith.constant 0 : i32
    return %c0_i32, %c0_i32_0 : i32, i32
  }
  func.func @transform_14(%arg0: i32) -> (i32, i32) {
    %c0_i32 = arith.constant 0 : i32
    %c0_i32_0 = arith.constant 0 : i32
    %c0_i32_1 = arith.constant 0 : i32
    return %c0_i32, %c0_i32_0 : i32, i32
  }
  func.func @transform_15(%arg0: i32) -> (i32, i32) {
    %c0_i32 = arith.constant 0 : i32
    %c0_i32_0 = arith.constant 0 : i32
    %c0_i32_1 = arith.constant 0 : i32
    return %c0_i32, %c0_i32_0 : i32, i32
  }
  func.func @transform_16(%arg0: i32) -> (i32, i32) {
    %c0_i32 = arith.constant 0 : i32
    %c0_i32_0 = arith.constant 0 : i32
    %c0_i32_1 = arith.constant 0 : i32
    return %c0_i32, %c0_i32_0 : i32, i32
  }
  func.func @transform_17(%arg0: i32) -> (i32, i32) {
    %c0_i32 = arith.constant 0 : i32
    %c0_i32_0 = arith.constant 0 : i32
    %c0_i32_1 = arith.constant 0 : i32
    return %c0_i32, %c0_i32_0 : i32, i32
  }
  func.func @transform_18(%arg0: i32) -> (i32, i32) {
    %c0_i32 = arith.constant 0 : i32
    %c0_i32_0 = arith.constant 0 : i32
    return %arg0, %c0_i32 : i32, i32
  }
  func.func @transform_19(%arg0: i32) -> (i32, i32) {
    %c0_i32 = arith.constant 0 : i32
    %c0_i32_0 = arith.constant 0 : i32
    %c0_i32_1 = arith.constant 0 : i32
    return %c0_i32, %c0_i32_0 : i32, i32
  }
  func.func @transform_20(%arg0: i32) -> (i32, i32) {
    %c0_i32 = arith.constant 0 : i32
    %c0_i32_0 = arith.constant 0 : i32
    %c0_i32_1 = arith.constant 0 : i32
    return %c0_i32, %c0_i32_0 : i32, i32
  }
}

</mosaic_0001>

<bundles_post_ra>
// kernel: mp_block_forward.2
= control target key start
LH: loop header
LB: loop body
LE: loop exit
PB: predicated region body
PF: predicated region fallthrough
CT: control target
= control target key end

     0   :  { %s5342_s0 = inlined_call_operand.vmem [shape: bf16[1536,20], index: 0, kind: input, shape index: {}]   ;;  %s5343_s1 = inlined_call_operand.vmem [shape: s32[1,1536], index: 1, kind: input, shape index: {}]   ;;  %s5344_s2 = inlined_call_operand.vmem [shape: bf16[64,8], index: 2, kind: input, shape index: {}]   ;;  %s5345_s3 = inlined_call_operand.vmem [shape: f32[64,1], index: 3, kind: input, shape index: {}]   ;;  %s5346_s4 = inlined_call_operand.vmem [shape: bf16[20,128], index: 4, kind: input, shape index: {}]   ;;  %s5347_s5 = inlined_call_operand.vmem [shape: f32[1,128], index: 5, kind: input, shape index: {}]   ;;  %s5348_s6 = inlined_call_operand.vmem [shape: bf16[128,128], index: 6, kind: input, shape index: {}]   ;;  %s5349_s7 = inlined_call_operand.vmem [shape: f32[1,128], index: 7, kind: input, shape index: {}]   ;;  %s5350_s8 = inlined_call_operand.vmem [shape: bf16[8,128], index: 8, kind: input, shape index: {}]   ;;  %s5351_s9 = inlined_call_operand.vmem [shape: bf16[128,128], index: 9, kind: input, shape index: {}]   ;;  %s5352_s10 = inlined_call_operand.vmem [shape: f32[1,128], index: 10, kind: input, shape index: {}]   ;;  %s5353_s11 = inlined_call_operand.vmem [shape: bf16[128,128], index: 11, kind: input, shape index: {}]   ;;  %s5354_s12 = inlined_call_operand.vmem [shape: f32[1,128], index: 12, kind: input, shape index: {}]   ;;  %s5355_s13 = inlined_call_operand.vmem [shape: bf16[128,128], index: 13, kind: input, shape index: {}]   ;;  %s5356_s14 = inlined_call_operand.vmem [shape: bf16[128,128], index: 14, kind: input, shape index: {}]   ;;  %s5357_s15 = inlined_call_operand.vmem [shape: f32[1,128], index: 15, kind: input, shape index: {}]   ;;  %s5358_s16 = inlined_call_operand.vmem [shape: bf16[128,128], index: 16, kind: input, shape index: {}]   ;;  %s5359_s17 = inlined_call_operand.vmem [shape: f32[1,128], index: 17, kind: input, shape index: {}]   ;;  %s5360_s18 = inlined_call_operand.vmem [shape: bf16[1536,8], index: 18, kind: output, shape index: {0}]   ;;  %s5361_s19 = inlined_call_operand.vmem [shape: bf16[64,128], index: 19, kind: output, shape index: {1}]   ;;  %s5362_s20 = inlined_call_operand.vmem [shape: f32[1,128], index: 20, kind: output, shape index: {2}]  }
   0x1   :  { %5367 = sst [smem:[#allocation4_spill]] %s5342_s0 }
   0x2   :  { %5368 = sst [smem:[#allocation5_spill]] %s5343_s1  ;;  %s4402_s1 = smov 0  }
   0x3   :  { %5369 = sst [smem:[#allocation6_spill]] %s5344_s2 }
   0x4   :  { %5370 = sst [smem:[#allocation7_spill]] %s5345_s3 }
   0x5   :  { %5371 = sst [smem:[#allocation8_spill]] %s5346_s4 }
   0x6 LB: > { %5372 = sst [smem:[#allocation3_spill]] %s4290_s1  ;;  %s4408_s22 = sadd.s32 4294967295, %s4290_s1   ;;  %s4290_s1 = sphi %s4402_s1, %s31_s1  }
   0x7   : > { %p3314_p0 = scmp.ge.s32.totalorder %s4290_s1, 1  ;;  %p568_p1 = scmp.lt.s32.totalorder %s4290_s1, 4 }
   0x9   : > { %p569_p2 = pnand %p3314_p0, %p568_p1 }
   0xa   : > { %s3315_s23 = sshll.u32 (!%p569_p2), %s4408_s22, 6  ;;  %s3317_s24 = sshll.u32 (!%p569_p2), %s4408_s22, 2 }
   0xb   : > { %572 = sbr.rel (%p569_p2) target bundleno = 1884 (0x75c), region = 92  ;;  %p631_p3 = scmp.lt.s32.totalorder (!%p569_p2), %s3315_s23, 191 }
   0xc   : > { %p637_p4 = scmp.lt.s32.totalorder (!%p569_p2), %s3317_s24, 11  ;;  %s5373_s26 = sld [smem:[#allocation4_spill]] (!%p569_p2) }
   0xd   : > { %s5374_s29 = sld [smem:[#allocation5_spill]] (!%p569_p2)  ;;  %p3320_p5 = scmp.ne.s32.totalorder (!%p569_p2), %s4408_s22, 0 }
  0x12   : > { %s5412_s23 = smov (!%p631_p3, %s3315_s23), 191  ;;  %s5414_s24 = smov (!%p637_p4, %s3317_s24), 11 }
  0x13   : > { %s3316_s2 = sshll.u32 %s5412_s23, 2  ;;  %s639_s30 = scalar_lea.vmem %s5374_s29, %s5414_s24  ;;  %v4292_v0 = vmov (!%p3320_p5), 0.0  }
  0x14   : > { %s4419_s27 = scalar_lea.vmem %s5373_s26, %s3316_s2  ;;  %s4428_s1 = scalar_lea.vmem %s5360_s18, %s3316_s2  ;;  %652 = vst [vmem:[#allocation2] sm:$0xff] (!%p3320_p5), %v4292_v0  ;;  %653 = vst [vmem:[#allocation2 + $0x8] sm:$0xff] (!%p3320_p5), %v4292_v0 }
  0x15   : > { %651 = sbr.rel (%p3320_p5) target bundleno = 28 (0x1c), region = 96  ;;  %654 = vst [vmem:[#allocation2 + $0x10] sm:$0xff] (!%p3320_p5), %v4292_v0  ;;  %655 = vst [vmem:[#allocation2 + $0x18] sm:$0xff] (!%p3320_p5), %v4292_v0 }
  0x16   : > { %656 = vst [vmem:[#allocation2 + $0x20] sm:$0xff] (!%p3320_p5), %v4292_v0  ;;  %657 = vst [vmem:[#allocation2 + $0x28] sm:$0xff] (!%p3320_p5), %v4292_v0 }
  0x17   : > { %658 = vst [vmem:[#allocation2 + $0x30] sm:$0xff] (!%p3320_p5), %v4292_v0  ;;  %659 = vst [vmem:[#allocation2 + $0x38] sm:$0xff] (!%p3320_p5), %v4292_v0 }
  0x1c PF: > { %s5375_s3 = sld [smem:[#allocation8_spill]]  ;;  %vm1000_vm0 = vcmask 1041408   ;;  %v4198_v3 = vld [vmem:[%s4419_s27] sm:$0xff]   ;;  %vm903_vm1 = vcmask 162816   ;;  %v4199_v5 = vld [vmem:[%s4419_s27 + $0x8] sm:$0xff]   ;;  %v4200_v6 = vld [vmem:[%s4419_s27 + $0x10] sm:$0xff]  }
  0x1d   : > { %3895 = vmatprep.mubr.msk.bf16.mxu0 %vm903_vm1, %v4198_v3  ;;  %v4201_v7 = vld [vmem:[%s4419_s27 + $0x18] sm:$0xff]   ;;  %v4202_v8 = vld [vmem:[%s4419_s27 + $0x20] sm:$0xff]   ;;  %v4203_v9 = vld [vmem:[%s4419_s27 + $0x28] sm:$0xff]   ;;  %p3525_p6 = scmp.ne.s32.totalorder %s4408_s22, 2 }
  0x1e   : > { %v4204_v10 = vld [vmem:[%s4419_s27 + $0x30] sm:$0xff]   ;;  %v4205_v11 = vld [vmem:[%s4419_s27 + $0x38] sm:$0xff]   ;;  %v4206_v12 = vld [vmem:[%s4419_s27 + $0x40] sm:$0xff]   ;;  %s5408_s0 = sld [smem:[#allocation7_spill]] (!%p3525_p6)  ;;  %s5409_s28 = sld [smem:[#allocation6_spill]] (!%p3525_p6) }
  0x1f   : > { %v4230_v13 = vld [vmem:[%s5348_s6] sm:$0xff]   ;;  %v4231_v14 = vld [vmem:[%s5348_s6 + $0x8] sm:$0xff]   ;;  %v4232_v16 = vld [vmem:[%s5348_s6 + $0x10] sm:$0xff]  }
  0x20   : > { %3959 = vmatprep.subr.bf16.mxu1 %v4230_v13  ;;  %v4207_v15 = vld [vmem:[%s4419_s27 + $0x48] sm:$0xff]   ;;  %v4208_v17 = vld [vmem:[%s4419_s27 + $0x50] sm:$0xff]   ;;  %v4233_v18 = vld [vmem:[%s5348_s6 + $0x18] sm:$0xff]  }
  0x21   : > { %3960 = vmatpush3.bf16.msra.mxu1 %v4230_v13  ;;  %v4209_v19 = vld [vmem:[%s4419_s27 + $0x58] sm:$0xff]   ;;  %v4234_v20 = vld [vmem:[%s5348_s6 + $0x20] sm:$0xff]   ;;  %v4235_v22 = vld [vmem:[%s5348_s6 + $0x28] sm:$0xff]  }
  0x22   : > { %v4196_v1 = vld [vmem:[%s5375_s3] sm:$0xff]   ;;  %v4197_v2 = vld [vmem:[%s5375_s3 + $0x8] ss:$0 sps:$4 sm:$0x33]   ;;  %3961 = vmatprep.subr.bf16.mxu1 %v4231_v14  ;;  %v4212_v24 = vld [vmem:[%s4419_s27 + $0x70] sm:$0xff]  }
  0x23   : > { %3891 = vmatprep.subr.bf16.mxu0 %v4196_v1  ;;  %v1002_v4 = vsel %vm1000_vm0, %v4197_v2, 0  ;;  %v4210_v21 = vld [vmem:[%s4419_s27 + $0x60] sm:$0xff]   ;;  %v4211_v23 = vld [vmem:[%s4419_s27 + $0x68] sm:$0xff]   ;;  %v4213_v25 = vld [vmem:[%s4419_s27 + $0x78] sm:$0xff]  }
  0x24   : > { %3892 = vmatpush3.bf16.msra.mxu0 %v4196_v1  ;;  %v4214_v26 = vld [vmem:[%s4419_s27 + $0x80] sm:$0xff]   ;;  %v4215_v27 = vld [vmem:[%s4419_s27 + $0x88] sm:$0xff]   ;;  %v4216_v28 = vld [vmem:[%s4419_s27 + $0x90] sm:$0xff]  }
  0x25   : > { %4181 = vmatprep.subr.msk.bf16.mxu0 %vm1000_vm0, %v4197_v2  ;;  %3962 = vmatpush3.bf16.msra.mxu1 %v4231_v14  ;;  %v4217_v29 = vld [vmem:[%s4419_s27 + $0x98] sm:$0xff]   ;;  %v4218_v30 = vld [vmem:[%s4419_s27 + $0xa0] sm:$0xff]   ;;  %v4219_v31 = vld [vmem:[%s4419_s27 + $0xa8] sm:$0xff]  }
  0x26   : > { %3963 = vmatprep.subr.bf16.mxu1 %v4232_v16  ;;  %v4220_v32 = vld [vmem:[%s4419_s27 + $0xb0] sm:$0xff]   ;;  %v4221_v33 = vld [vmem:[%s4419_s27 + $0xb8] sm:$0xff]   ;;  %v4222_v35 = vld [vmem:[%s4419_s27 + $0xc0] sm:$0xff]  }
  0x27   : > { %v4236_v34 = vld [vmem:[%s5348_s6 + $0x30] sm:$0xff]   ;;  %v4237_v36 = vld [vmem:[%s5348_s6 + $0x38] sm:$0xff]   ;;  %v4223_v37 = vld [vmem:[%s4419_s27 + $0xc8] sm:$0xff]  }
  0x28   : > { %3894 = vmatpush3.bf16.msra.mxu0 %v1002_v4  ;;  %v4224_v38 = vld [vmem:[%s4419_s27 + $0xd0] sm:$0xff]   ;;  %v4225_v39 = vld [vmem:[%s4419_s27 + $0xd8] sm:$0xff]   ;;  %v4226_v40 = vld [vmem:[%s4419_s27 + $0xe0] sm:$0xff]  }
  0x29   : > { %3964 = vmatpush3.bf16.msra.mxu1 %v4232_v16  ;;  %v4227_v41 = vld [vmem:[%s4419_s27 + $0xe8] sm:$0xff]   ;;  %v4228_v42 = vld [vmem:[%s4419_s27 + $0xf0] sm:$0xff]   ;;  %v4229_v43 = vld [vmem:[%s4419_s27 + $0xf8] sm:$0xff]  }
  0x2a   : > { %3965 = vmatprep.subr.bf16.mxu1 %v4233_v18  ;;  %v4528_v44 = vld [vmem:[%s5347_s5] ss:$0 sm:$0xff] }
  0x2b   : > { %3896 = vmatmul.mubr.msk.bf16.vlgmr.msra.gmra.mrb[0].mxu0 %vm903_vm1, %v4199_v5 }
  0x2c   : > { %3899 = vmatprep.mubr.msk.bf16.mxu0 %vm903_vm1, %v4200_v6 }
  0x2d   : > { %3966 = vmatpush3.bf16.msra.mxu1 %v4233_v18 }
  0x2e   : > { %3967 = vmatprep.subr.bf16.mxu1 %v4234_v20 }
  0x31   : > { %3968 = vmatpush3.bf16.msra.mxu1 %v4234_v20 }
  0x32   : > { %3969 = vmatprep.subr.bf16.mxu1 %v4235_v22 }
  0x33   : > { %3900 = vmatmul.mubr.msk.bf16.gmra.mrb[4].mxu0 %vm903_vm1, %v4201_v7 }
  0x34   : > { %3903 = vmatprep.mubr.msk.bf16.mxu0 %vm903_vm1, %v4202_v8 }
  0x35   : > { %3970 = vmatpush3.bf16.msra.mxu1 %v4235_v22 }
  0x36   : > { %3971 = vmatprep.subr.bf16.mxu1 %v4236_v34 }
  0x39   : > { %3972 = vmatpush3.bf16.msra.mxu1 %v4236_v34 }
  0x3a   : > { %3973 = vmatprep.subr.bf16.mxu1 %v4237_v36 }
  0x3b   : > { %3904 = vmatmul.mubr.msk.bf16.gmra.mrb[8].mxu0 %vm903_vm1, %v4203_v9 }
  0x3c   : > { %3907 = vmatprep.mubr.msk.bf16.mxu0 %vm903_vm1, %v4204_v10 }
  0x3d   : > { %3974 = vmatpush3.bf16.msra.mxu1 %v4237_v36 }
  0x43   : > { %3908 = vmatmul.mubr.msk.bf16.gmra.mrb[12].mxu0 %vm903_vm1, %v4205_v11 }
  0x44   : > { %3911 = vmatprep.mubr.msk.bf16.mxu0 %vm903_vm1, %v4206_v12 }
  0x4b   : > { %3912 = vmatmul.mubr.msk.bf16.gmra.mrb[16].mxu0 %vm903_vm1, %v4207_v15 }
  0x4c   : > { %3915 = vmatprep.mubr.msk.bf16.mxu0 %vm903_vm1, %v4208_v17 }
  0x53   : > { %3916 = vmatmul.mubr.msk.bf16.gmra.mrb[20].mxu0 %vm903_vm1, %v4209_v19 }
  0x54   : > { %3919 = vmatprep.mubr.msk.bf16.mxu0 %vm903_vm1, %v4210_v21 }
  0x5b   : > { %3920 = vmatmul.mubr.msk.bf16.gmra.mrb[24].mxu0 %vm903_vm1, %v4211_v23 }
  0x5c   : > { %3923 = vmatprep.mubr.msk.bf16.mxu0 %vm903_vm1, %v4212_v24 }
  0x63   : > { %3924 = vmatmul.mubr.msk.bf16.gmra.mrb[28].mxu0 %vm903_vm1, %v4213_v25 }
  0x64   : > { %3927 = vmatprep.mubr.msk.bf16.mxu0 %vm903_vm1, %v4214_v26 }
  0x6b   : > { %3928 = vmatmul.mubr.msk.bf16.gmra.mrb[32].mxu0 %vm903_vm1, %v4215_v27 }
  0x6c   : > { %3931 = vmatprep.mubr.msk.bf16.mxu0 %vm903_vm1, %v4216_v28 }
  0x73   : > { %3932 = vmatmul.mubr.msk.bf16.gmra.mrb[36].mxu0 %vm903_vm1, %v4217_v29 }
  0x74   : > { %3935 = vmatprep.mubr.msk.bf16.mxu0 %vm903_vm1, %v4218_v30 }
  0x7b   : > { %3936 = vmatmul.mubr.msk.bf16.gmra.mrb[40].mxu0 %vm903_vm1, %v4219_v31 }
  0x7c   : > { %3939 = vmatprep.mubr.msk.bf16.mxu0 %vm903_vm1, %v4220_v32 }
  0x83   : > { %3940 = vmatmul.mubr.msk.bf16.gmra.mrb[44].mxu0 %vm903_vm1, %v4221_v33 }
  0x84   : > { %3943 = vmatprep.mubr.msk.bf16.mxu0 %vm903_vm1, %v4222_v35 }
  0x8b   : > { %3944 = vmatmul.mubr.msk.bf16.gmra.mrb[48].mxu0 %vm903_vm1, %v4223_v37 }
  0x8c   : > { %3947 = vmatprep.mubr.msk.bf16.mxu0 %vm903_vm1, %v4224_v38 }
  0x93   : > { %3948 = vmatmul.mubr.msk.bf16.gmra.mrb[52].mxu0 %vm903_vm1, %v4225_v39 }
  0x94   : > { %3951 = vmatprep.mubr.msk.bf16.mxu0 %vm903_vm1, %v4226_v40 }
  0x9b   : > { %3952 = vmatmul.mubr.msk.bf16.gmra.mrb[56].mxu0 %vm903_vm1, %v4227_v41 }
  0x9c   : > { %3955 = vmatprep.mubr.msk.bf16.mxu0 %vm903_vm1, %v4228_v42 }
  0xa3   : > { %3956 = vmatmul.mubr.msk.bf16.gmra.mrb[60].mxu0 %vm903_vm1, %v4229_v43 }
  0xfe   : > { %v3897_v45 = vpop.f32.mrb[0].mxu0 }
  0xff   : > { %v1047_v46 = vadd.f32 %v3897_v45, %v4528_v44  ;;  %v1038_v47 = vpop.f32.mrb[1].mxu0 }
 0x100   : > { %v1039_v48 = vadd.f32 %v4528_v44, %v1038_v47  ;;  %v3898_v49 = vpop.f32.mrb[2].mxu0 }
 0x101   : > { %v1050_v50 = vadd.f32 %v3898_v49, %v4528_v44  ;;  %v1041_v51 = vpop.f32.mrb[3].mxu0  ;;  %v1295_v53 = vmax.f32 %v1047_v46, 0.0 }
 0x102   : > { %v1042_v52 = vadd.f32 %v4528_v44, %v1041_v51  ;;  %v1293_v55 = vmax.f32 %v1039_v48, 0.0 }
 0x103   : > { %v1296_v54 = vmax.f32 %v1050_v50, 0.0 }
 0x104   : > { %v1294_v56 = vmax.f32 %v1042_v52, 0.0 }
 0x105   : > { %v1358_v57 = vpack.c.bf16 %v1296_v54, %v1295_v53 }
 0x106   : > { %v3901_v58 = vpop.f32.mrb[4].mxu0  ;;  %v1357_v59 = vpack.c.bf16 %v1294_v56, %v1293_v55 }
 0x107   : > { %v1063_v60 = vadd.f32 %v3901_v58, %v4528_v44  ;;  %v1054_v61 = vpop.f32.mrb[5].mxu0 }
 0x108   : > { %v1055_v62 = vadd.f32 %v4528_v44, %v1054_v61  ;;  %v3902_v63 = vpop.f32.mrb[6].mxu0  ;;  %3975 = vmatprep.mubr.bf16.mxu1 %v1357_v59 }
 0x109   : > { %v1066_v0 = vadd.f32 %v3902_v63, %v4528_v44  ;;  %v1057_v1 = vpop.f32.mrb[7].mxu0  ;;  %3976 = vmatmul.mubr.bf16.vlgmr.msra.gmra.mrb[0].mxu1 %v1358_v57  ;;  %v1299_v3 = vmax.f32 %v1063_v60, 0.0 }
 0x10a   : > { %v1058_v2 = vadd.f32 %v4528_v44, %v1057_v1  ;;  %v1297_v5 = vmax.f32 %v1055_v62, 0.0 }
 0x10b   : > { %v1300_v4 = vmax.f32 %v1066_v0, 0.0 }
 0x10c   : > { %v1298_v6 = vmax.f32 %v1058_v2, 0.0 }
 0x10d   : > { %v1360_v7 = vpack.c.bf16 %v1300_v4, %v1299_v3 }
 0x10e   : > { %v1359_v8 = vpack.c.bf16 %v1298_v6, %v1297_v5  ;;  %v3905_v9 = vpop.f32.mrb[8].mxu0 }
 0x10f   : > { %v1079_v10 = vadd.f32 %v3905_v9, %v4528_v44  ;;  %v1070_v11 = vpop.f32.mrb[9].mxu0 }
 0x110   : > { %v1071_v12 = vadd.f32 %v4528_v44, %v1070_v11  ;;  %v3906_v13 = vpop.f32.mrb[10].mxu0  ;;  %3979 = vmatprep.mubr.bf16.mxu1 %v1359_v8 }
 0x111   : > { %v1082_v14 = vadd.f32 %v3906_v13, %v4528_v44  ;;  %v1073_v15 = vpop.f32.mrb[11].mxu0  ;;  %3980 = vmatmul.mubr.bf16.gmra.mrb[4].mxu1 %v1360_v7  ;;  %v1303_v17 = vmax.f32 %v1079_v10, 0.0 }
 0x112   : > { %v1074_v16 = vadd.f32 %v4528_v44, %v1073_v15  ;;  %v1301_v19 = vmax.f32 %v1071_v12, 0.0 }
 0x113   : > { %v1304_v18 = vmax.f32 %v1082_v14, 0.0 }
 0x114   : > { %v1302_v20 = vmax.f32 %v1074_v16, 0.0 }
 0x115   : > { %v1362_v21 = vpack.c.bf16 %v1304_v18, %v1303_v17 }
 0x116   : > { %v1361_v22 = vpack.c.bf16 %v1302_v20, %v1301_v19  ;;  %v3909_v23 = vpop.f32.mrb[12].mxu0 }
 0x117   : > { %v1095_v24 = vadd.f32 %v3909_v23, %v4528_v44  ;;  %v1086_v25 = vpop.f32.mrb[13].mxu0 }
 0x118   : > { %v1087_v26 = vadd.f32 %v4528_v44, %v1086_v25  ;;  %v3910_v27 = vpop.f32.mrb[14].mxu0  ;;  %3983 = vmatprep.mubr.bf16.mxu1 %v1361_v22 }
 0x119   : > { %v1098_v28 = vadd.f32 %v3910_v27, %v4528_v44  ;;  %v1089_v29 = vpop.f32.mrb[15].mxu0  ;;  %3984 = vmatmul.mubr.bf16.gmra.mrb[8].mxu1 %v1362_v21  ;;  %v1307_v31 = vmax.f32 %v1095_v24, 0.0 }
 0x11a   : > { %v1090_v30 = vadd.f32 %v4528_v44, %v1089_v29  ;;  %v1305_v33 = vmax.f32 %v1087_v26, 0.0 }
 0x11b   : > { %v1308_v32 = vmax.f32 %v1098_v28, 0.0 }
 0x11c   : > { %v1306_v34 = vmax.f32 %v1090_v30, 0.0 }
 0x11d   : > { %v1364_v35 = vpack.c.bf16 %v1308_v32, %v1307_v31 }
 0x11e   : > { %v1363_v36 = vpack.c.bf16 %v1306_v34, %v1305_v33  ;;  %v3913_v37 = vpop.f32.mrb[16].mxu0 }
 0x11f   : > { %v1111_v38 = vadd.f32 %v3913_v37, %v4528_v44  ;;  %v1102_v39 = vpop.f32.mrb[17].mxu0 }
 0x120   : > { %v1103_v40 = vadd.f32 %v4528_v44, %v1102_v39  ;;  %v3914_v41 = vpop.f32.mrb[18].mxu0  ;;  %3987 = vmatprep.mubr.bf16.mxu1 %v1363_v36 }
 0x121   : > { %v1114_v42 = vadd.f32 %v3914_v41, %v4528_v44  ;;  %v1105_v43 = vpop.f32.mrb[19].mxu0  ;;  %3988 = vmatmul.mubr.bf16.gmra.mrb[12].mxu1 %v1364_v35  ;;  %v1311_v46 = vmax.f32 %v1111_v38, 0.0 }
 0x122   : > { %v1106_v45 = vadd.f32 %v4528_v44, %v1105_v43  ;;  %v1309_v48 = vmax.f32 %v1103_v40, 0.0 }
 0x123   : > { %v1312_v47 = vmax.f32 %v1114_v42, 0.0 }
 0x124   : > { %v1310_v49 = vmax.f32 %v1106_v45, 0.0 }
 0x125   : > { %v1366_v50 = vpack.c.bf16 %v1312_v47, %v1311_v46 }
 0x126   : > { %v1365_v51 = vpack.c.bf16 %v1310_v49, %v1309_v48  ;;  %v3917_v52 = vpop.f32.mrb[20].mxu0 }
 0x127   : > { %v1127_v53 = vadd.f32 %v3917_v52, %v4528_v44  ;;  %v1118_v54 = vpop.f32.mrb[21].mxu0 }
 0x128   : > { %v1119_v55 = vadd.f32 %v4528_v44, %v1118_v54  ;;  %v3918_v56 = vpop.f32.mrb[22].mxu0  ;;  %3991 = vmatprep.mubr.bf16.mxu1 %v1365_v51 }
 0x129   : > { %v1130_v57 = vadd.f32 %v3918_v56, %v4528_v44  ;;  %v1121_v58 = vpop.f32.mrb[23].mxu0  ;;  %3992 = vmatmul.mubr.bf16.gmra.mrb[16].mxu1 %v1366_v50  ;;  %v1315_v60 = vmax.f32 %v1127_v53, 0.0 }
 0x12a   : > { %v1122_v59 = vadd.f32 %v4528_v44, %v1121_v58  ;;  %v1313_v62 = vmax.f32 %v1119_v55, 0.0 }
 0x12b   : > { %v1316_v61 = vmax.f32 %v1130_v57, 0.0 }
 0x12c   : > { %v1314_v63 = vmax.f32 %v1122_v59, 0.0 }
 0x12d   : > { %v1368_v0 = vpack.c.bf16 %v1316_v61, %v1315_v60 }
 0x12e   : > { %v1367_v1 = vpack.c.bf16 %v1314_v63, %v1313_v62  ;;  %v3921_v2 = vpop.f32.mrb[24].mxu0 }
 0x12f   : > { %v1143_v3 = vadd.f32 %v3921_v2, %v4528_v44  ;;  %v1134_v4 = vpop.f32.mrb[25].mxu0 }
 0x130   : > { %v1135_v5 = vadd.f32 %v4528_v44, %v1134_v4  ;;  %v3922_v6 = vpop.f32.mrb[26].mxu0  ;;  %3995 = vmatprep.mubr.bf16.mxu1 %v1367_v1 }
 0x131   : > { %v1146_v7 = vadd.f32 %v3922_v6, %v4528_v44  ;;  %v1137_v8 = vpop.f32.mrb[27].mxu0  ;;  %3996 = vmatmul.mubr.bf16.gmra.mrb[20].mxu1 %v1368_v0  ;;  %v1319_v10 = vmax.f32 %v1143_v3, 0.0 }
 0x132   : > { %v1138_v9 = vadd.f32 %v4528_v44, %v1137_v8  ;;  %v1317_v12 = vmax.f32 %v1135_v5, 0.0 }
 0x133   : > { %v1320_v11 = vmax.f32 %v1146_v7, 0.0 }
 0x134   : > { %v1318_v13 = vmax.f32 %v1138_v9, 0.0 }
 0x135   : > { %v1370_v14 = vpack.c.bf16 %v1320_v11, %v1319_v10 }
 0x136   : > { %v1369_v15 = vpack.c.bf16 %v1318_v13, %v1317_v12  ;;  %v3925_v16 = vpop.f32.mrb[28].mxu0 }
 0x137   : > { %v1159_v17 = vadd.f32 %v3925_v16, %v4528_v44  ;;  %v1150_v18 = vpop.f32.mrb[29].mxu0 }
 0x138   : > { %v1151_v19 = vadd.f32 %v4528_v44, %v1150_v18  ;;  %v3926_v20 = vpop.f32.mrb[30].mxu0  ;;  %3999 = vmatprep.mubr.bf16.mxu1 %v1369_v15 }
 0x139   : > { %v1162_v21 = vadd.f32 %v3926_v20, %v4528_v44  ;;  %v1153_v22 = vpop.f32.mrb[31].mxu0  ;;  %4000 = vmatmul.mubr.bf16.gmra.mrb[24].mxu1 %v1370_v14  ;;  %v1323_v24 = vmax.f32 %v1159_v17, 0.0 }
 0x13a   : > { %v1154_v23 = vadd.f32 %v4528_v44, %v1153_v22  ;;  %v1321_v26 = vmax.f32 %v1151_v19, 0.0 }
 0x13b   : > { %v1324_v25 = vmax.f32 %v1162_v21, 0.0 }
 0x13c   : > { %v1322_v27 = vmax.f32 %v1154_v23, 0.0 }
 0x13d   : > { %v1372_v28 = vpack.c.bf16 %v1324_v25, %v1323_v24 }
 0x13e   : > { %v1371_v29 = vpack.c.bf16 %v1322_v27, %v1321_v26  ;;  %v3929_v30 = vpop.f32.mrb[32].mxu0 }
 0x13f   : > { %v1175_v31 = vadd.f32 %v3929_v30, %v4528_v44  ;;  %v1166_v32 = vpop.f32.mrb[33].mxu0 }
 0x140   : > { %v1167_v33 = vadd.f32 %v4528_v44, %v1166_v32  ;;  %v3930_v34 = vpop.f32.mrb[34].mxu0  ;;  %4003 = vmatprep.mubr.bf16.mxu1 %v1371_v29 }
 0x141   : > { %v1178_v35 = vadd.f32 %v3930_v34, %v4528_v44  ;;  %v1169_v36 = vpop.f32.mrb[35].mxu0  ;;  %4004 = vmatmul.mubr.bf16.gmra.mrb[28].mxu1 %v1372_v28  ;;  %v1327_v38 = vmax.f32 %v1175_v31, 0.0 }
 0x142   : > { %v1170_v37 = vadd.f32 %v4528_v44, %v1169_v36  ;;  %v1325_v40 = vmax.f32 %v1167_v33, 0.0 }
 0x143   : > { %v1328_v39 = vmax.f32 %v1178_v35, 0.0 }
 0x144   : > { %v1326_v41 = vmax.f32 %v1170_v37, 0.0 }
 0x145   : > { %v1374_v42 = vpack.c.bf16 %v1328_v39, %v1327_v38 }
 0x146   : > { %v1373_v43 = vpack.c.bf16 %v1326_v41, %v1325_v40  ;;  %v3933_v45 = vpop.f32.mrb[36].mxu0 }
 0x147   : > { %v1191_v46 = vadd.f32 %v3933_v45, %v4528_v44  ;;  %v1182_v47 = vpop.f32.mrb[37].mxu0 }
 0x148   : > { %v1183_v48 = vadd.f32 %v4528_v44, %v1182_v47  ;;  %v3934_v49 = vpop.f32.mrb[38].mxu0  ;;  %4007 = vmatprep.mubr.bf16.mxu1 %v1373_v43 }
 0x149   : > { %v1194_v50 = vadd.f32 %v3934_v49, %v4528_v44  ;;  %v1185_v51 = vpop.f32.mrb[39].mxu0  ;;  %4008 = vmatmul.mubr.bf16.gmra.mrb[32].mxu1 %v1374_v42  ;;  %v1331_v53 = vmax.f32 %v1191_v46, 0.0 }
 0x14a   : > { %v1186_v52 = vadd.f32 %v4528_v44, %v1185_v51  ;;  %v1329_v55 = vmax.f32 %v1183_v48, 0.0 }
 0x14b   : > { %v1332_v54 = vmax.f32 %v1194_v50, 0.0 }
 0x14c   : > { %v1330_v56 = vmax.f32 %v1186_v52, 0.0 }
 0x14d   : > { %v1376_v57 = vpack.c.bf16 %v1332_v54, %v1331_v53 }
 0x14e   : > { %v1375_v58 = vpack.c.bf16 %v1330_v56, %v1329_v55  ;;  %v3937_v59 = vpop.f32.mrb[40].mxu0 }
 0x14f   : > { %v1207_v60 = vadd.f32 %v3937_v59, %v4528_v44  ;;  %v1198_v61 = vpop.f32.mrb[41].mxu0 }
 0x150   : > { %v1199_v62 = vadd.f32 %v4528_v44, %v1198_v61  ;;  %v3938_v63 = vpop.f32.mrb[42].mxu0  ;;  %4011 = vmatprep.mubr.bf16.mxu1 %v1375_v58 }
 0x151   : > { %v1210_v0 = vadd.f32 %v3938_v63, %v4528_v44  ;;  %v1201_v1 = vpop.f32.mrb[43].mxu0  ;;  %4012 = vmatmul.mubr.bf16.gmra.mrb[36].mxu1 %v1376_v57  ;;  %v1335_v3 = vmax.f32 %v1207_v60, 0.0 }
 0x152   : > { %v1202_v2 = vadd.f32 %v4528_v44, %v1201_v1  ;;  %v1333_v5 = vmax.f32 %v1199_v62, 0.0 }
 0x153   : > { %v1336_v4 = vmax.f32 %v1210_v0, 0.0 }
 0x154   : > { %v1334_v6 = vmax.f32 %v1202_v2, 0.0 }
 0x155   : > { %v1378_v7 = vpack.c.bf16 %v1336_v4, %v1335_v3 }
 0x156   : > { %v1377_v8 = vpack.c.bf16 %v1334_v6, %v1333_v5  ;;  %v3941_v9 = vpop.f32.mrb[44].mxu0 }
 0x157   : > { %v1223_v10 = vadd.f32 %v3941_v9, %v4528_v44  ;;  %v1214_v11 = vpop.f32.mrb[45].mxu0 }
 0x158   : > { %v1215_v12 = vadd.f32 %v4528_v44, %v1214_v11  ;;  %v3942_v13 = vpop.f32.mrb[46].mxu0  ;;  %4015 = vmatprep.mubr.bf16.mxu1 %v1377_v8 }
 0x159   : > { %v1226_v14 = vadd.f32 %v3942_v13, %v4528_v44  ;;  %v1217_v15 = vpop.f32.mrb[47].mxu0  ;;  %4016 = vmatmul.mubr.bf16.gmra.mrb[40].mxu1 %v1378_v7  ;;  %v1339_v17 = vmax.f32 %v1223_v10, 0.0 }
 0x15a   : > { %v1218_v16 = vadd.f32 %v4528_v44, %v1217_v15  ;;  %v1337_v19 = vmax.f32 %v1215_v12, 0.0 }
 0x15b   : > { %v1340_v18 = vmax.f32 %v1226_v14, 0.0 }
 0x15c   : > { %v1338_v20 = vmax.f32 %v1218_v16, 0.0  ;;  %v2070_v16 = vlaneseq }
 0x15d   : > { %v1380_v21 = vpack.c.bf16 %v1340_v18, %v1339_v17 }
 0x15e   : > { %v1379_v22 = vpack.c.bf16 %v1338_v20, %v1337_v19  ;;  %v3945_v23 = vpop.f32.mrb[48].mxu0  ;;  %v4594_v17 = vshrl.u32 %v2070_v16, 7  ;;  %v2079_v19 = vld [vmem:[%s639_s30] sm:$0xf] }
 0x15f   : > { %v1239_v24 = vadd.f32 %v3945_v23, %v4528_v44  ;;  %v1230_v25 = vpop.f32.mrb[49].mxu0  ;;  %v4293_v23 = vmov 1.0|1.0  }
 0x160   : > { %v1231_v26 = vadd.f32 %v4528_v44, %v1230_v25  ;;  %v3946_v27 = vpop.f32.mrb[50].mxu0  ;;  %4019 = vmatprep.mubr.bf16.mxu1 %v1379_v22  ;;  %v2086_v18 = vsub.s32 1, %v4594_v17  ;;  %v4604_v20 = vadd.s32 8, %v4594_v17  ;;  %v4616_v25 = vadd.s32 16, %v4594_v17 }
 0x161   : > { %v1242_v28 = vadd.f32 %v3946_v27, %v4528_v44  ;;  %v1233_v29 = vpop.f32.mrb[51].mxu0  ;;  %4020 = vmatmul.mubr.bf16.gmra.mrb[44].mxu1 %v1380_v21  ;;  %v1343_v31 = vmax.f32 %v1239_v24, 0.0 }
 0x162   : > { %v1234_v30 = vadd.f32 %v4528_v44, %v1233_v29  ;;  %v1341_v33 = vmax.f32 %v1231_v26, 0.0  ;;  %v2087_v21 = vrot.slane %v2079_v19, %v2086_v18  ;;  %v4619_v26 = vadd.s32 24, %v4594_v17 }
 0x163   : > { %v1344_v32 = vmax.f32 %v1242_v28, 0.0  ;;  %v4634_v29 = vadd.s32 32, %v4594_v17 }
 0x164   : > { %v1342_v34 = vmax.f32 %v1234_v30, 0.0  ;;  %vm2097_vm2 = vcmp.eq.s32.totalorder %v4594_v17, %v2087_v21  ;;  %vm2101_vm3 = vcmp.eq.s32.totalorder %v4604_v20, %v2087_v21  ;;  %vm2105_vm8 = vcmp.eq.s32.totalorder %v4616_v25, %v2087_v21 }
 0x165   : > { %v1382_v35 = vpack.c.bf16 %v1344_v32, %v1343_v31  ;;  %vm3493_vm4 = vmpackc.low %vm2101_vm3, %vm2097_vm2  ;;  %vm2109_vm9 = vcmp.eq.s32.totalorder %v4619_v26, %v2087_v21  ;;  %v4637_v30 = vadd.s32 40, %v4594_v17  ;;  %vm2113_vm14 = vcmp.eq.s32.totalorder %v4634_v29, %v2087_v21 }
 0x166   : > { %v1381_v36 = vpack.c.bf16 %v1342_v34, %v1341_v33  ;;  %v3949_v37 = vpop.f32.mrb[52].mxu0  ;;  %3494 = vmatprep.mubr.msk.bf16.mxu0 %vm3493_vm4, %v4293_v23  ;;  %vm4623_vm10 = vmpackc.low %vm2109_vm9, %vm2105_vm8  ;;  %v4652_v33 = vadd.s32 48, %v4594_v17  ;;  %v4655_v34 = vadd.s32 56, %v4594_v17 }
 0x167   : > { %v1255_v38 = vadd.f32 %v3949_v37, %v4528_v44  ;;  %v1246_v39 = vpop.f32.mrb[53].mxu0  ;;  %vm2117_vm15 = vcmp.eq.s32.totalorder %v4637_v30, %v2087_v21  ;;  %v5389_v37 = vmov 0 }
 0x168   : > { %v1247_v40 = vadd.f32 %v4528_v44, %v1246_v39  ;;  %v3950_v41 = vpop.f32.mrb[54].mxu0  ;;  %4023 = vmatprep.mubr.bf16.mxu1 %v1381_v36  ;;  %vm4641_vm0 = vmpackc.low %vm2117_vm15, %vm2113_vm14  ;;  %vm2121_vm4 = vcmp.eq.s32.totalorder %v4652_v33, %v2087_v21  ;;  %v5387_v36 = vmov 0 }
 0x169   : > { %v1258_v42 = vadd.f32 %v3950_v41, %v4528_v44  ;;  %v1249_v43 = vpop.f32.mrb[55].mxu0  ;;  %4024 = vmatmul.mubr.bf16.gmra.mrb[48].mxu1 %v1382_v35  ;;  %v1347_v46 = vmax.f32 %v1255_v38, 0.0  ;;  %v4662_v35 = vld [vmem:[%s5349_s7] ss:$0 sm:$0xff]  ;;  %v2094_v41 = vsub.s32 3, %v4594_v17 }
 0x16a   : > { %v1250_v45 = vadd.f32 %v4528_v44, %v1249_v43  ;;  %v1345_v48 = vmax.f32 %v1247_v40, 0.0 }
 0x16b   : > { %v1348_v47 = vmax.f32 %v1258_v42, 0.0 }
 0x16c   : > { %v1346_v49 = vmax.f32 %v1250_v45, 0.0  ;;  %v2090_v45 = vsub.s32 2, %v4594_v17 }
 0x16d   : > { %v1384_v50 = vpack.c.bf16 %v1348_v47, %v1347_v46 }
 0x16e   : > { %v1383_v51 = vpack.c.bf16 %v1346_v49, %v1345_v48  ;;  %v3953_v52 = vpop.f32.mrb[56].mxu0  ;;  %v2095_v49 = vrot.slane %v2079_v19, %v2094_v41 }
 0x16f   : > { %v1271_v53 = vadd.f32 %v3953_v52, %v4528_v44  ;;  %v1262_v54 = vpop.f32.mrb[57].mxu0  ;;  %v2091_v52 = vrot.slane %v2079_v19, %v2090_v45 }
 0x170   : > { %v1263_v55 = vadd.f32 %v4528_v44, %v1262_v54  ;;  %v3954_v56 = vpop.f32.mrb[58].mxu0  ;;  %4027 = vmatprep.mubr.bf16.mxu1 %v1383_v51  ;;  %vm2099_vm14 = vcmp.eq.s32.totalorder %v4594_v17, %v2095_v49  ;;  %vm2103_vm15 = vcmp.eq.s32.totalorder %v4604_v20, %v2095_v49 }
 0x171   : > { %v1274_v57 = vadd.f32 %v3954_v56, %v4528_v44  ;;  %v1265_v58 = vpop.f32.mrb[59].mxu0  ;;  %4028 = vmatmul.mubr.bf16.gmra.mrb[52].mxu1 %v1384_v50  ;;  %v1351_v60 = vmax.f32 %v1271_v53, 0.0 }
 0x172   : > { %v1266_v59 = vadd.f32 %v4528_v44, %v1265_v58  ;;  %v1349_v62 = vmax.f32 %v1263_v55, 0.0 }
 0x173   : > { %v1352_v61 = vmax.f32 %v1274_v57, 0.0  ;;  %v5391_v57 = vmov 0 }
 0x174   : > { %v1350_v63 = vmax.f32 %v1266_v59, 0.0 }
 0x175   : > { %v1386_v0 = vpack.c.bf16 %v1352_v61, %v1351_v60 }
 0x176   : > { %v1385_v1 = vpack.c.bf16 %v1350_v63, %v1349_v62  ;;  %v3957_v2 = vpop.f32.mrb[60].mxu0 }
 0x177   : > { %v1287_v3 = vadd.f32 %v3957_v2, %v4528_v44  ;;  %v1278_v4 = vpop.f32.mrb[61].mxu0 }
 0x178   : > { %v1279_v5 = vadd.f32 %v4528_v44, %v1278_v4  ;;  %v3958_v6 = vpop.f32.mrb[62].mxu0  ;;  %4031 = vmatprep.mubr.bf16.mxu1 %v1385_v1 }
 0x179   : > { %v1290_v7 = vadd.f32 %v3958_v6, %v4528_v44  ;;  %v1281_v8 = vpop.f32.mrb[63].mxu0  ;;  %4032 = vmatmul.mubr.bf16.gmra.mrb[56].mxu1 %v1386_v0  ;;  %v1355_v10 = vmax.f32 %v1287_v3, 0.0 }
 0x17a   : > { %v1282_v9 = vadd.f32 %v4528_v44, %v1281_v8  ;;  %v1353_v12 = vmax.f32 %v1279_v5, 0.0  ;;  %v2082_v44 = vsub.s32 0, %v4594_v17 }
 0x17b   : > { %v1356_v11 = vmax.f32 %v1290_v7, 0.0 }
 0x17c   : > { %v1354_v13 = vmax.f32 %v1282_v9, 0.0  ;;  %v2083_v22 = vrot.slane %v2079_v19, %v2082_v44 }
 0x17d   : > { %v1388_v14 = vpack.c.bf16 %v1356_v11, %v1355_v10 }
 0x17e   : > { %v1387_v15 = vpack.c.bf16 %v1354_v13, %v1353_v12  ;;  %vm2096_vm5 = vcmp.eq.s32.totalorder %v4594_v17, %v2083_v22  ;;  %vm2100_vm6 = vcmp.eq.s32.totalorder %v4604_v20, %v2083_v22  ;;  %vm2104_vm11 = vcmp.eq.s32.totalorder %v4616_v25, %v2083_v22 }
 0x17f   : > { %vm4611_vm7 = vmpackc.low %vm2100_vm6, %vm2096_vm5  ;;  %vm2108_vm12 = vcmp.eq.s32.totalorder %v4619_v26, %v2083_v22  ;;  %vm2112_vm1 = vcmp.eq.s32.totalorder %v4634_v29, %v2083_v22  ;;  %vm2116_vm2 = vcmp.eq.s32.totalorder %v4637_v30, %v2083_v22  ;;  %vm2125_vm5 = vcmp.eq.s32.totalorder %v4655_v34, %v2087_v21 }
 0x180   : > { %4035 = vmatprep.mubr.bf16.mxu1 %v1387_v15  ;;  %vm4629_vm13 = vmpackc.low %vm2108_vm12, %vm2104_vm11  ;;  %vm2120_vm8 = vcmp.eq.s32.totalorder %v4652_v33, %v2083_v22  ;;  %vm2124_vm9 = vcmp.eq.s32.totalorder %v4655_v34, %v2083_v22  ;;  %vm2005_vm12 = vcmask 60416  }
 0x181   : > { %4036 = vmatmul.mubr.bf16.gmra.mrb[60].mxu1 %v1388_v14  ;;  %vm4647_vm3 = vmpackc.low %vm2116_vm2, %vm2112_vm1  ;;  %vm2098_vm2 = vcmp.eq.s32.totalorder %v4594_v17, %v2091_v52 }
 0x182   : > { %vm4664_vm6 = vmpackc.low %vm2125_vm5, %vm2121_vm4  ;;  %vm2102_vm4 = vcmp.eq.s32.totalorder %v4604_v20, %v2091_v52 }
 0x183   : > { %v5388_v36 = vsel %vm4664_vm6, 4294967295, %v5387_v36  ;;  %vm4670_vm11 = vmpackc.low %vm2124_vm9, %vm2120_vm8  ;;  %vm2107_vm8 = vcmp.eq.s32.totalorder %v4616_v25, %v2095_v49  ;;  %vm2111_vm9 = vcmp.eq.s32.totalorder %v4619_v26, %v2095_v49  ;;  %vm2119_vm6 = vcmp.eq.s32.totalorder %v4637_v30, %v2095_v49 }
 0x184   : > { %v5390_v37 = vsel %vm4670_vm11, 4294967295, %v5389_v37  ;;  %vm4706_vm1 = vmpackc.low %vm2103_vm15, %vm2099_vm14  ;;  %vm2106_vm11 = vcmp.eq.s32.totalorder %v4616_v25, %v2091_v52  ;;  %vm2110_vm14 = vcmp.eq.s32.totalorder %v4619_v26, %v2091_v52 }
 0x185   : > { %v5392_v57 = vsel %vm4706_vm1, 4294967295, %v5391_v57  ;;  %vm4714_vm5 = vmpackc.low %vm2102_vm4, %vm2098_vm2  ;;  %vm2115_vm1 = vcmp.eq.s32.totalorder %v4634_v29, %v2095_v49  ;;  %vm2114_vm4 = vcmp.eq.s32.totalorder %v4634_v29, %v2091_v52 }
 0x186   : > { %vm3513_vm15 = vmpackc.low %vm2111_vm9, %vm2107_vm8  ;;  %vm2118_vm8 = vcmp.eq.s32.totalorder %v4637_v30, %v2091_v52 }
 0x187   : > { %3514 = vmatprep.mubr.msk.bf16.mxu1 %vm3513_vm15, %v4293_v23  ;;  %vm4730_vm2 = vmpackc.low %vm2110_vm14, %vm2106_vm11  ;;  %vm2122_vm15 = vcmp.eq.s32.totalorder %v4652_v33, %v2091_v52 }
 0x188   : > { %vm4739_vm9 = vmpackc.low %vm2119_vm6, %vm2115_vm1  ;;  %vm2123_vm6 = vcmp.eq.s32.totalorder %v4652_v33, %v2095_v49  ;;  %vm2127_vm1 = vcmp.eq.s32.totalorder %v4655_v34, %v2095_v49 }
 0x189   : > { %vm4748_vm11 = vmpackc.low %vm2118_vm8, %vm2114_vm4  ;;  %vm2126_vm4 = vcmp.eq.s32.totalorder %v4655_v34, %v2091_v52 }
 0x18a   : > { %vm4778_vm14 = vmpackc.low %vm2127_vm1, %vm2123_vm6 }
 0x18b   : > { %vm4787_vm8 = vmpackc.low %vm2126_vm4, %vm2122_vm15 }
 0x1dc   : > { %v3977_v38 = vpop.f32.mrb[0].mxu1 }
 0x1dd   : > { %v4675_v39 = vadd.f32 %v3977_v38, %v4662_v35  ;;  %v1494_v40 = vpop.f32.mrb[1].mxu1 }
 0x1de   : > { %v4679_v42 = vadd.f32 %v4662_v35, %v1494_v40  ;;  %v3978_v43 = vpop.f32.mrb[2].mxu1 }
 0x1df   : > { %v3588_v46 = vpack.c.bf16 %v4675_v39, %v4675_v39  ;;  %v4685_v47 = vadd.f32 %v3978_v43, %v4662_v35  ;;  %v1497_v48 = vpop.f32.mrb[3].mxu1 }
 0x1e0   : > { %v3586_v50 = vpack.c.bf16 %v4679_v42, %v4679_v42  ;;  %v4690_v51 = vadd.f32 %v4662_v35, %v1497_v48 }
 0x1e1   : > { %2008 = vst.msk [vmem:[%s4428_s1 + $0x8] sm:$0xf] %vm2005_vm12, %v3588_v46  ;;  %v1750_v53 = vpack.c.bf16 %v4685_v47, %v4675_v39  ;;  %v3589_v54 = vpack.c.bf16 %v4685_v47, %v4685_v47 }
 0x1e2   : > { %2006 = vst.msk [vmem:[%s4428_s1] sm:$0xf] %vm2005_vm12, %v3586_v50  ;;  %v1749_v55 = vpack.c.bf16 %v4690_v51, %v4679_v42  ;;  %v3587_v56 = vpack.c.bf16 %v4690_v51, %v4690_v51 }
 0x1e3   : > { %2009 = vst.msk [vmem:[%s4428_s1 + $0xc] sm:$0xf] %vm2005_vm12, %v3589_v54 }
 0x1e4   : > { %2007 = vst.msk [vmem:[%s4428_s1 + $0x4] sm:$0xf] %vm2005_vm12, %v3587_v56  ;;  %v3981_v59 = vpop.f32.mrb[4].mxu1 }
 0x1e5   : > { %v4727_v60 = vadd.f32 %v3981_v59, %v4662_v35  ;;  %v1510_v61 = vpop.f32.mrb[5].mxu1 }
 0x1e6   : > { %v4737_v63 = vadd.f32 %v4662_v35, %v1510_v61  ;;  %v3982_v0 = vpop.f32.mrb[6].mxu1 }
 0x1e7   : > { %v3592_v2 = vpack.c.bf16 %v4727_v60, %v4727_v60  ;;  %v4746_v3 = vadd.f32 %v3982_v0, %v4662_v35  ;;  %v1513_v4 = vpop.f32.mrb[7].mxu1 }
 0x1e8   : > { %v3590_v6 = vpack.c.bf16 %v4737_v63, %v4737_v63  ;;  %v4755_v7 = vadd.f32 %v4662_v35, %v1513_v4 }
 0x1e9   : > { %2012 = vst.msk [vmem:[%s4428_s1 + $0x18] sm:$0xf] %vm2005_vm12, %v3592_v2  ;;  %v1752_v8 = vpack.c.bf16 %v4746_v3, %v4727_v60  ;;  %v3593_v9 = vpack.c.bf16 %v4746_v3, %v4746_v3 }
 0x1ea   : > { %2010 = vst.msk [vmem:[%s4428_s1 + $0x10] sm:$0xf] %vm2005_vm12, %v3590_v6  ;;  %v1751_v10 = vpack.c.bf16 %v4755_v7, %v4737_v63  ;;  %v3591_v11 = vpack.c.bf16 %v4755_v7, %v4755_v7 }
 0x1eb   : > { %2013 = vst.msk [vmem:[%s4428_s1 + $0x1c] sm:$0xf] %vm2005_vm12, %v3593_v9 }
 0x1ec   : > { %2011 = vst.msk [vmem:[%s4428_s1 + $0x14] sm:$0xf] %vm2005_vm12, %v3591_v11  ;;  %v3985_v12 = vpop.f32.mrb[8].mxu1 }
 0x1ed   : > { %v4776_v13 = vadd.f32 %v3985_v12, %v4662_v35  ;;  %v1526_v14 = vpop.f32.mrb[9].mxu1 }
 0x1ee   : > { %v4785_v16 = vadd.f32 %v4662_v35, %v1526_v14  ;;  %v3986_v17 = vpop.f32.mrb[10].mxu1 }
 0x1ef   : > { %v3596_v19 = vpack.c.bf16 %v4776_v13, %v4776_v13  ;;  %v4794_v44 = vadd.f32 %v3986_v17, %v4662_v35  ;;  %v1529_v20 = vpop.f32.mrb[11].mxu1 }
 0x1f0   : > { %v3594_v21 = vpack.c.bf16 %v4785_v16, %v4785_v16  ;;  %v4799_v22 = vadd.f32 %v4662_v35, %v1529_v20 }
 0x1f1   : > { %2016 = vst.msk [vmem:[%s4428_s1 + $0x28] sm:$0xf] %vm2005_vm12, %v3596_v19  ;;  %v1754_v25 = vpack.c.bf16 %v4794_v44, %v4776_v13  ;;  %v3597_v26 = vpack.c.bf16 %v4794_v44, %v4794_v44 }
 0x1f2   : > { %2014 = vst.msk [vmem:[%s4428_s1 + $0x20] sm:$0xf] %vm2005_vm12, %v3594_v21  ;;  %v1753_v29 = vpack.c.bf16 %v4799_v22, %v4785_v16  ;;  %v3595_v30 = vpack.c.bf16 %v4799_v22, %v4799_v22 }
 0x1f3   : > { %2017 = vst.msk [vmem:[%s4428_s1 + $0x2c] sm:$0xf] %vm2005_vm12, %v3597_v26 }
 0x1f4   : > { %2015 = vst.msk [vmem:[%s4428_s1 + $0x24] sm:$0xf] %vm2005_vm12, %v3595_v30  ;;  %v3989_v33 = vpop.f32.mrb[12].mxu1 }
 0x1f5   : > { %v4818_v34 = vadd.f32 %v3989_v33, %v4662_v35  ;;  %v1542_v38 = vpop.f32.mrb[13].mxu1 }
 0x1f6   : > { %v4821_v40 = vadd.f32 %v4662_v35, %v1542_v38  ;;  %v3990_v41 = vpop.f32.mrb[14].mxu1 }
 0x1f7   : > { %v3600_v43 = vpack.c.bf16 %v4818_v34, %v4818_v34  ;;  %v4826_v45 = vadd.f32 %v3990_v41, %v4662_v35  ;;  %v1545_v46 = vpop.f32.mrb[15].mxu1 }
 0x1f8   : > { %v3598_v48 = vpack.c.bf16 %v4821_v40, %v4821_v40  ;;  %v4831_v49 = vadd.f32 %v4662_v35, %v1545_v46 }
 0x1f9   : > { %2020 = vst.msk [vmem:[%s4428_s1 + $0x38] sm:$0xf] %vm2005_vm12, %v3600_v43  ;;  %v1756_v50 = vpack.c.bf16 %v4826_v45, %v4818_v34  ;;  %v3601_v52 = vpack.c.bf16 %v4826_v45, %v4826_v45 }
 0x1fa   : > { %2018 = vst.msk [vmem:[%s4428_s1 + $0x30] sm:$0xf] %vm2005_vm12, %v3598_v48  ;;  %v1755_v54 = vpack.c.bf16 %v4831_v49, %v4821_v40  ;;  %v3599_v56 = vpack.c.bf16 %v4831_v49, %v4831_v49 }
 0x1fb   : > { %2021 = vst.msk [vmem:[%s4428_s1 + $0x3c] sm:$0xf] %vm2005_vm12, %v3601_v52 }
 0x1fc   : > { %2019 = vst.msk [vmem:[%s4428_s1 + $0x34] sm:$0xf] %vm2005_vm12, %v3599_v56  ;;  %v3993_v59 = vpop.f32.mrb[16].mxu1 }
 0x1fd   : > { %v1567_v61 = vadd.f32 %v3993_v59, %v4662_v35  ;;  %v1558_v0 = vpop.f32.mrb[17].mxu1 }
 0x1fe   : > { %v1559_v2 = vadd.f32 %v4662_v35, %v1558_v0  ;;  %v3994_v4 = vpop.f32.mrb[18].mxu1 }
 0x1ff   : > { %v3604_v6 = vpack.c.bf16 %v1567_v61, %v1567_v61  ;;  %v1570_v9 = vadd.f32 %v3994_v4, %v4662_v35  ;;  %v1561_v11 = vpop.f32.mrb[19].mxu1 }
 0x200   : > { %v3602_v12 = vpack.c.bf16 %v1559_v2, %v1559_v2  ;;  %v1562_v14 = vadd.f32 %v4662_v35, %v1561_v11 }
 0x201   : > { %2024 = vst.msk [vmem:[%s4428_s1 + $0x48] sm:$0xf] %vm2005_vm12, %v3604_v6  ;;  %v1758_v17 = vpack.c.bf16 %v1570_v9, %v1567_v61  ;;  %v3605_v19 = vpack.c.bf16 %v1570_v9, %v1570_v9 }
 0x202   : > { %2022 = vst.msk [vmem:[%s4428_s1 + $0x40] sm:$0xf] %vm2005_vm12, %v3602_v12  ;;  %v1757_v20 = vpack.c.bf16 %v1562_v14, %v1559_v2  ;;  %v3603_v21 = vpack.c.bf16 %v1562_v14, %v1562_v14 }
 0x203   : > { %2025 = vst.msk [vmem:[%s4428_s1 + $0x4c] sm:$0xf] %vm2005_vm12, %v3605_v19 }
 0x204   : > { %2023 = vst.msk [vmem:[%s4428_s1 + $0x44] sm:$0xf] %vm2005_vm12, %v3603_v21  ;;  %v3997_v26 = vpop.f32.mrb[20].mxu1  ;;  %3755 = vmatprep.subr.bf16.mxu0 %v1757_v20 }
 0x205   : > { %v1583_v30 = vadd.f32 %v3997_v26, %v4662_v35  ;;  %v1574_v33 = vpop.f32.mrb[21].mxu1  ;;  %3756 = vmatpush3.bf16.msra.mxu0 %v1749_v55 }
 0x206   : > { %v1575_v38 = vadd.f32 %v4662_v35, %v1574_v33  ;;  %v3998_v41 = vpop.f32.mrb[22].mxu1  ;;  %3757 = vmatprep.subr.bf16.mxu0 %v1758_v17 }
 0x207   : > { %v3608_v43 = vpack.c.bf16 %v1583_v30, %v1583_v30  ;;  %v1586_v46 = vadd.f32 %v3998_v41, %v4662_v35  ;;  %v1577_v48 = vpop.f32.mrb[23].mxu1 }
 0x208   : > { %v3606_v52 = vpack.c.bf16 %v1575_v38, %v1575_v38  ;;  %v1578_v56 = vadd.f32 %v4662_v35, %v1577_v48 }
 0x209   : > { %2028 = vst.msk [vmem:[%s4428_s1 + $0x58] sm:$0xf] %vm2005_vm12, %v3608_v43  ;;  %v1760_v59 = vpack.c.bf16 %v1586_v46, %v1583_v30  ;;  %v3609_v61 = vpack.c.bf16 %v1586_v46, %v1586_v46  ;;  %3758 = vmatpush3.bf16.msra.mxu0 %v1750_v53 }
 0x20a   : > { %2026 = vst.msk [vmem:[%s4428_s1 + $0x50] sm:$0xf] %vm2005_vm12, %v3606_v52  ;;  %v1759_v42 = vpack.c.bf16 %v1578_v56, %v1575_v38  ;;  %v3607_v51 = vpack.c.bf16 %v1578_v56, %v1578_v56 }
 0x20b   : > { %2029 = vst.msk [vmem:[%s4428_s1 + $0x5c] sm:$0xf] %vm2005_vm12, %v3609_v61 }
 0x20c   : > { %2027 = vst.msk [vmem:[%s4428_s1 + $0x54] sm:$0xf] %vm2005_vm12, %v3607_v51  ;;  %v4001_v55 = vpop.f32.mrb[24].mxu1  ;;  %3759 = vmatprep.subr.bf16.mxu0 %v1759_v42 }
 0x20d   : > { %v1599_v0 = vadd.f32 %v4001_v55, %v4662_v35  ;;  %v1590_v2 = vpop.f32.mrb[25].mxu1  ;;  %3760 = vmatpush3.bf16.msra.mxu0 %v1751_v10 }
 0x20e   : > { %v1591_v39 = vadd.f32 %v4662_v35, %v1590_v2  ;;  %v4002_v47 = vpop.f32.mrb[26].mxu1  ;;  %3761 = vmatprep.subr.bf16.mxu0 %v1760_v59 }
 0x20f   : > { %v3612_v53 = vpack.c.bf16 %v1599_v0, %v1599_v0  ;;  %v1602_v4 = vadd.f32 %v4002_v47, %v4662_v35  ;;  %v1593_v6 = vpop.f32.mrb[27].mxu1 }
 0x210   : > { %v3610_v9 = vpack.c.bf16 %v1591_v39, %v1591_v39  ;;  %v1594_v11 = vadd.f32 %v4662_v35, %v1593_v6 }
 0x211   : > { %2032 = vst.msk [vmem:[%s4428_s1 + $0x68] sm:$0xf] %vm2005_vm12, %v3612_v53  ;;  %v1762_v12 = vpack.c.bf16 %v1602_v4, %v1599_v0  ;;  %v3613_v14 = vpack.c.bf16 %v1602_v4, %v1602_v4  ;;  %3762 = vmatpush3.bf16.msra.mxu0 %v1752_v8 }
 0x212   : > { %2030 = vst.msk [vmem:[%s4428_s1 + $0x60] sm:$0xf] %vm2005_vm12, %v3610_v9  ;;  %v1761_v63 = vpack.c.bf16 %v1594_v11, %v1591_v39  ;;  %v3611_v7 = vpack.c.bf16 %v1594_v11, %v1594_v11 }
 0x213   : > { %2033 = vst.msk [vmem:[%s4428_s1 + $0x6c] sm:$0xf] %vm2005_vm12, %v3613_v14 }
 0x214   : > { %2031 = vst.msk [vmem:[%s4428_s1 + $0x64] sm:$0xf] %vm2005_vm12, %v3611_v7  ;;  %v4005_v10 = vpop.f32.mrb[28].mxu1  ;;  %3763 = vmatprep.subr.bf16.mxu0 %v1761_v63 }
 0x215   : > { %v1615_v17 = vadd.f32 %v4005_v10, %v4662_v35  ;;  %v1606_v19 = vpop.f32.mrb[29].mxu1  ;;  %3764 = vmatpush3.bf16.msra.mxu0 %v1753_v29 }
 0x216   : > { %v1607_v60 = vadd.f32 %v4662_v35, %v1606_v19  ;;  %v4006_v3 = vpop.f32.mrb[30].mxu1  ;;  %3765 = vmatprep.subr.bf16.mxu0 %v1762_v12 }
 0x217   : > { %v3616_v8 = vpack.c.bf16 %v1615_v17, %v1615_v17  ;;  %v1618_v20 = vadd.f32 %v4006_v3, %v4662_v35  ;;  %v1609_v21 = vpop.f32.mrb[31].mxu1 }
 0x218   : > { %v3614_v26 = vpack.c.bf16 %v1607_v60, %v1607_v60  ;;  %v1610_v30 = vadd.f32 %v4662_v35, %v1609_v21 }
 0x219   : > { %2036 = vst.msk [vmem:[%s4428_s1 + $0x78] sm:$0xf] %vm2005_vm12, %v3616_v8  ;;  %v1764_v33 = vpack.c.bf16 %v1618_v20, %v1615_v17  ;;  %v3617_v38 = vpack.c.bf16 %v1618_v20, %v1618_v20  ;;  %3766 = vmatpush3.bf16.msra.mxu0 %v1754_v25 }
 0x21a   : > { %2034 = vst.msk [vmem:[%s4428_s1 + $0x70] sm:$0xf] %vm2005_vm12, %v3614_v26  ;;  %v1763_v16 = vpack.c.bf16 %v1610_v30, %v1607_v60  ;;  %v3615_v22 = vpack.c.bf16 %v1610_v30, %v1610_v30 }
 0x21b   : > { %2037 = vst.msk [vmem:[%s4428_s1 + $0x7c] sm:$0xf] %vm2005_vm12, %v3617_v38 }
 0x21c   : > { %2035 = vst.msk [vmem:[%s4428_s1 + $0x74] sm:$0xf] %vm2005_vm12, %v3615_v22  ;;  %v4009_v29 = vpop.f32.mrb[32].mxu1  ;;  %3767 = vmatprep.subr.bf16.mxu0 %v1763_v16 }
 0x21d   : > { %v1631_v41 = vadd.f32 %v4009_v29, %v4662_v35  ;;  %v1622_v43 = vpop.f32.mrb[33].mxu1  ;;  %3768 = vmatpush3.bf16.msra.mxu0 %v1755_v54 }
 0x21e   : > { %v1623_v13 = vadd.f32 %v4662_v35, %v1622_v43  ;;  %v4010_v44 = vpop.f32.mrb[34].mxu1  ;;  %3769 = vmatprep.subr.bf16.mxu0 %v1764_v33 }
 0x21f   : > { %v3620_v25 = vpack.c.bf16 %v1631_v41, %v1631_v41  ;;  %v1634_v46 = vadd.f32 %v4010_v44, %v4662_v35  ;;  %v1625_v48 = vpop.f32.mrb[35].mxu1 }
 0x220   : > { %v3618_v52 = vpack.c.bf16 %v1623_v13, %v1623_v13  ;;  %v1626_v56 = vadd.f32 %v4662_v35, %v1625_v48 }
 0x221   : > { %2040 = vst.msk [vmem:[%s4428_s1 + $0x88] sm:$0xf] %vm2005_vm12, %v3620_v25  ;;  %v4924_v59 = vpack.c.bf16 %v1634_v46, %v1631_v41  ;;  %v3621_v61 = vpack.c.bf16 %v1634_v46, %v1634_v46  ;;  %3770 = vmatpush3.bf16.msra.mxu0 %v1756_v50 }
 0x222   : > { %2038 = vst.msk [vmem:[%s4428_s1 + $0x80] sm:$0xf] %vm2005_vm12, %v3618_v52  ;;  %v4931_v40 = vpack.c.bf16 %v1626_v56, %v1623_v13  ;;  %v3619_v49 = vpack.c.bf16 %v1626_v56, %v1626_v56 }
 0x223   : > { %2041 = vst.msk [vmem:[%s4428_s1 + $0x8c] sm:$0xf] %vm2005_vm12, %v3621_v61 }
 0x224   : > { %2039 = vst.msk [vmem:[%s4428_s1 + $0x84] sm:$0xf] %vm2005_vm12, %v3619_v49  ;;  %v4013_v54 = vpop.f32.mrb[36].mxu1  ;;  %3496 = vmatmul.mubr.msk.bf16.vlgmr.msra.gmra.mrb[64].mxu0 %vm4611_vm7, %v4293_v23  ;;  %vm5405_vm7 = vnez %v5388_v36 }
 0x225   : > { %v1647_v42 = vadd.f32 %v4013_v54, %v4662_v35  ;;  %v1638_v34 = vpop.f32.mrb[37].mxu1  ;;  %3498 = vmatprep.mubr.msk.bf16.mxu0 %vm4623_vm10, %v4293_v23  ;;  %vm5406_vm10 = vnez %v5390_v37 }
 0x226   : > { %v1639_v45 = vadd.f32 %v4662_v35, %v1638_v34  ;;  %v4014_v50 = vpop.f32.mrb[38].mxu1 }
 0x227   : > { %v3624_v51 = vpack.c.bf16 %v1647_v42, %v1647_v42  ;;  %v1650_v55 = vadd.f32 %v4014_v50, %v4662_v35  ;;  %v1641_v0 = vpop.f32.mrb[39].mxu1 }
 0x228   : > { %v3622_v2 = vpack.c.bf16 %v1639_v45, %v1639_v45  ;;  %v1642_v24 = vadd.f32 %v4662_v35, %v1641_v0 }
 0x229   : > { %2044 = vst.msk [vmem:[%s4428_s1 + $0x98] sm:$0xf] %vm2005_vm12, %v3624_v51  ;;  %v4949_v39 = vpack.c.bf16 %v1650_v55, %v1647_v42  ;;  %v3625_v47 = vpack.c.bf16 %v1650_v55, %v1650_v55 }
 0x22a   : > { %2042 = vst.msk [vmem:[%s4428_s1 + $0x90] sm:$0xf] %vm2005_vm12, %v3622_v2  ;;  %v4953_v27 = vpack.c.bf16 %v1642_v24, %v1639_v45  ;;  %v3623_v53 = vpack.c.bf16 %v1642_v24, %v1642_v24 }
 0x22b   : > { %2045 = vst.msk [vmem:[%s4428_s1 + $0x9c] sm:$0xf] %vm2005_vm12, %v3625_v47 }
 0x22c   : > { %2043 = vst.msk [vmem:[%s4428_s1 + $0x94] sm:$0xf] %vm2005_vm12, %v3623_v53  ;;  %v4017_v4 = vpop.f32.mrb[40].mxu1  ;;  %3500 = vmatmul.mubr.msk.bf16.gmra.mrb[68].mxu0 %vm4629_vm13, %v4293_v23  ;;  %vm5407_vm13 = vnez %v5392_v57 }
 0x22d   : > { %v1663_v6 = vadd.f32 %v4017_v4, %v4662_v35  ;;  %v1654_v9 = vpop.f32.mrb[41].mxu1  ;;  %3502 = vmatprep.mubr.msk.bf16.mxu0 %vm4641_vm0, %v4293_v23  ;;  %vm2605_vm0 = vcmask (!%p3525_p6), 1043456  }
 0x22e   : > { %v1655_v11 = vadd.f32 %v4662_v35, %v1654_v9  ;;  %v4018_v12 = vpop.f32.mrb[42].mxu1 }
 0x22f   : > { %v3628_v14 = vpack.c.bf16 %v1663_v6, %v1663_v6  ;;  %v1666_v63 = vadd.f32 %v4018_v12, %v4662_v35  ;;  %v1657_v7 = vpop.f32.mrb[43].mxu1 }
 0x230   : > { %v3626_v10 = vpack.c.bf16 %v1655_v11, %v1655_v11  ;;  %v1658_v28 = vadd.f32 %v4662_v35, %v1657_v7 }
 0x231   : > { %2048 = vst.msk [vmem:[%s4428_s1 + $0xa8] sm:$0xf] %vm2005_vm12, %v3628_v14  ;;  %v4971_v17 = vpack.c.bf16 %v1666_v63, %v1663_v6  ;;  %v3629_v19 = vpack.c.bf16 %v1666_v63, %v1666_v63 }
 0x232   : > { %2046 = vst.msk [vmem:[%s4428_s1 + $0xa0] sm:$0xf] %vm2005_vm12, %v3626_v10  ;;  %v4975_v31 = vpack.c.bf16 %v1658_v28, %v1655_v11  ;;  %v3627_v60 = vpack.c.bf16 %v1658_v28, %v1658_v28 }
 0x233   : > { %2049 = vst.msk [vmem:[%s4428_s1 + $0xac] sm:$0xf] %vm2005_vm12, %v3629_v19 }
 0x234   : > { %2047 = vst.msk [vmem:[%s4428_s1 + $0xa4] sm:$0xf] %vm2005_vm12, %v3627_v60  ;;  %v4021_v3 = vpop.f32.mrb[44].mxu1  ;;  %3504 = vmatmul.mubr.msk.bf16.gmra.mrb[72].mxu0 %vm4647_vm3, %v4293_v23  ;;  %vm2592_vm3 = vcmask (!%p3525_p6), 64512  }
 0x235   : > { %v1679_v8 = vadd.f32 %v4021_v3, %v4662_v35  ;;  %v1670_v20 = vpop.f32.mrb[45].mxu1  ;;  %3506 = vmatprep.mubr.msk.bf16.mxu0 %vm5405_vm7, %v4293_v23 }
 0x236   : > { %v1671_v21 = vadd.f32 %v4662_v35, %v1670_v20  ;;  %v4022_v26 = vpop.f32.mrb[46].mxu1 }
 0x237   : > { %v3632_v30 = vpack.c.bf16 %v1679_v8, %v1679_v8  ;;  %v1682_v33 = vadd.f32 %v4022_v26, %v4662_v35  ;;  %v1673_v38 = vpop.f32.mrb[47].mxu1 }
 0x238   : > { %v3630_v16 = vpack.c.bf16 %v1671_v21, %v1671_v21  ;;  %v1674_v32 = vadd.f32 %v4662_v35, %v1673_v38 }
 0x239   : > { %2052 = vst.msk [vmem:[%s4428_s1 + $0xb8] sm:$0xf] %vm2005_vm12, %v3632_v30  ;;  %v4993_v22 = vpack.c.bf16 %v1682_v33, %v1679_v8  ;;  %v3633_v29 = vpack.c.bf16 %v1682_v33, %v1682_v33 }
 0x23a   : > { %2050 = vst.msk [vmem:[%s4428_s1 + $0xb0] sm:$0xf] %vm2005_vm12, %v3630_v16  ;;  %v4997_v36 = vpack.c.bf16 %v1674_v32, %v1671_v21  ;;  %v3631_v41 = vpack.c.bf16 %v1674_v32, %v1674_v32 }
 0x23b   : > { %2053 = vst.msk [vmem:[%s4428_s1 + $0xbc] sm:$0xf] %vm2005_vm12, %v3633_v29 }
 0x23c   : > { %2051 = vst.msk [vmem:[%s4428_s1 + $0xb4] sm:$0xf] %vm2005_vm12, %v3631_v41  ;;  %v4025_v43 = vpop.f32.mrb[48].mxu1  ;;  %3508 = vmatmul.mubr.msk.bf16.gmra.mrb[76].mxu0 %vm5406_vm10, %v4293_v23 }
 0x23d   : > { %v1695_v13 = vadd.f32 %v4025_v43, %v4662_v35  ;;  %v1686_v44 = vpop.f32.mrb[49].mxu1  ;;  %3510 = vmatprep.mubr.msk.bf16.mxu0 %vm5407_vm13, %v4293_v23 }
 0x23e   : > { %v1687_v25 = vadd.f32 %v4662_v35, %v1686_v44  ;;  %v4026_v46 = vpop.f32.mrb[50].mxu1 }
 0x23f   : > { %v3636_v48 = vpack.c.bf16 %v1695_v13, %v1695_v13  ;;  %v1698_v52 = vadd.f32 %v4026_v46, %v4662_v35  ;;  %v1689_v56 = vpop.f32.mrb[51].mxu1 }
 0x240   : > { %v3634_v61 = vpack.c.bf16 %v1687_v25, %v1687_v25  ;;  %v1690_v37 = vadd.f32 %v4662_v35, %v1689_v56 }
 0x241   : > { %2056 = vst.msk [vmem:[%s4428_s1 + $0xc8] sm:$0xf] %vm2005_vm12, %v3636_v48  ;;  %v1774_v49 = vpack.c.bf16 %v1698_v52, %v1695_v13  ;;  %v3637_v54 = vpack.c.bf16 %v1698_v52, %v1698_v52 }
 0x242   : > { %2054 = vst.msk [vmem:[%s4428_s1 + $0xc0] sm:$0xf] %vm2005_vm12, %v3634_v61  ;;  %v1773_v42 = vpack.c.bf16 %v1690_v37, %v1687_v25  ;;  %v3635_v57 = vpack.c.bf16 %v1690_v37, %v1690_v37 }
 0x243   : > { %2057 = vst.msk [vmem:[%s4428_s1 + $0xcc] sm:$0xf] %vm2005_vm12, %v3637_v54 }
 0x244   : > { %2055 = vst.msk [vmem:[%s4428_s1 + $0xc4] sm:$0xf] %vm2005_vm12, %v3635_v57  ;;  %v4029_v34 = vpop.f32.mrb[52].mxu1  ;;  %3795 = vmatprep.subr.bf16.mxu0 %v1773_v42  ;;  %4157 = vmatprep.subr.bf16.mxu1 %v1773_v42 }
 0x245   : > { %v1711_v45 = vadd.f32 %v4029_v34, %v4662_v35  ;;  %v1702_v50 = vpop.f32.mrb[53].mxu1  ;;  %3796 = vmatpush3.bf16.msra.mxu0 %v4931_v40  ;;  %4165 = vmatpush3.bf16.msra.mxu1 %v4931_v40 }
 0x246   : > { %v1703_v51 = vadd.f32 %v4662_v35, %v1702_v50  ;;  %v4030_v55 = vpop.f32.mrb[54].mxu1  ;;  %3797 = vmatprep.subr.bf16.mxu0 %v1774_v49  ;;  %4158 = vmatprep.subr.bf16.mxu1 %v1774_v49 }
 0x247   : > { %v3640_v0 = vpack.c.bf16 %v1711_v45, %v1711_v45  ;;  %v1714_v2 = vadd.f32 %v4030_v55, %v4662_v35  ;;  %v1705_v24 = vpop.f32.mrb[55].mxu1 }
 0x248   : > { %v3638_v47 = vpack.c.bf16 %v1703_v51, %v1703_v51  ;;  %v1706_v53 = vadd.f32 %v4662_v35, %v1705_v24 }
 0x249   : > { %2060 = vst.msk [vmem:[%s4428_s1 + $0xd8] sm:$0xf] %vm2005_vm12, %v3640_v0  ;;  %v1776_v4 = vpack.c.bf16 %v1714_v2, %v1711_v45  ;;  %v3641_v6 = vpack.c.bf16 %v1714_v2, %v1714_v2  ;;  %3798 = vmatpush3.bf16.msra.mxu0 %v4924_v59  ;;  %4166 = vmatpush3.bf16.msra.mxu1 %v4924_v59 }
 0x24a   : > { %2058 = vst.msk [vmem:[%s4428_s1 + $0xd0] sm:$0xf] %vm2005_vm12, %v3638_v47  ;;  %v1775_v40 = vpack.c.bf16 %v1706_v53, %v1703_v51  ;;  %v3639_v9 = vpack.c.bf16 %v1706_v53, %v1706_v53 }
 0x24b   : > { %2061 = vst.msk [vmem:[%s4428_s1 + $0xdc] sm:$0xf] %vm2005_vm12, %v3641_v6 }
 0x24c   : > { %2059 = vst.msk [vmem:[%s4428_s1 + $0xd4] sm:$0xf] %vm2005_vm12, %v3639_v9  ;;  %v4033_v11 = vpop.f32.mrb[56].mxu1  ;;  %3799 = vmatprep.subr.bf16.mxu0 %v1775_v40  ;;  %4159 = vmatprep.subr.bf16.mxu1 %v1775_v40  ;;  %v2210_v40 = vld [vmem:[#allocation2 + $0x10] sm:$0xff] }
 0x24d   : > { %v1727_v12 = vadd.f32 %v4033_v11, %v4662_v35  ;;  %v1718_v14 = vpop.f32.mrb[57].mxu1  ;;  %3800 = vmatpush3.bf16.msra.mxu0 %v4953_v27  ;;  %4167 = vmatpush3.bf16.msra.mxu1 %v4953_v27 }
 0x24e   : > { %v1719_v59 = vadd.f32 %v4662_v35, %v1718_v14  ;;  %v4034_v63 = vpop.f32.mrb[58].mxu1  ;;  %3801 = vmatprep.subr.bf16.mxu0 %v1776_v4  ;;  %4160 = vmatprep.subr.bf16.mxu1 %v1776_v4  ;;  %v2208_v4 = vld [vmem:[#allocation2] sm:$0xff] }
 0x24f   : > { %v3644_v7 = vpack.c.bf16 %v1727_v12, %v1727_v12  ;;  %v1730_v10 = vadd.f32 %v4034_v63, %v4662_v35  ;;  %v1721_v28 = vpop.f32.mrb[59].mxu1  ;;  %v2209_v63 = vld [vmem:[#allocation2 + $0x8] sm:$0xff] }
 0x250   : > { %v3642_v19 = vpack.c.bf16 %v1719_v59, %v1719_v59  ;;  %v1722_v60 = vadd.f32 %v4662_v35, %v1721_v28 }
 0x251   : > { %2064 = vst.msk [vmem:[%s4428_s1 + $0xe8] sm:$0xf] %vm2005_vm12, %v3644_v7  ;;  %v1778_v3 = vpack.c.bf16 %v1730_v10, %v1727_v12  ;;  %v3645_v8 = vpack.c.bf16 %v1730_v10, %v1730_v10  ;;  %3802 = vmatpush3.bf16.msra.mxu0 %v4949_v39  ;;  %4168 = vmatpush3.bf16.msra.mxu1 %v4949_v39  ;;  %v2211_v7 = vld [vmem:[#allocation2 + $0x18] sm:$0xff] }
 0x252   : > { %2062 = vst.msk [vmem:[%s4428_s1 + $0xe0] sm:$0xf] %vm2005_vm12, %v3642_v19  ;;  %v1777_v27 = vpack.c.bf16 %v1722_v60, %v1719_v59  ;;  %v3643_v20 = vpack.c.bf16 %v1722_v60, %v1722_v60 }
 0x253   : > { %2065 = vst.msk [vmem:[%s4428_s1 + $0xec] sm:$0xf] %vm2005_vm12, %v3645_v8 }
 0x254   : > { %2063 = vst.msk [vmem:[%s4428_s1 + $0xe4] sm:$0xf] %vm2005_vm12, %v3643_v20  ;;  %v4037_v21 = vpop.f32.mrb[60].mxu1  ;;  %3803 = vmatprep.subr.bf16.mxu0 %v1777_v27  ;;  %4161 = vmatprep.subr.bf16.mxu1 %v1777_v27 }
 0x255   : > { %v1743_v26 = vadd.f32 %v4037_v21, %v4662_v35  ;;  %v1734_v30 = vpop.f32.mrb[61].mxu1  ;;  %3804 = vmatpush3.bf16.msra.mxu0 %v4975_v31  ;;  %4169 = vmatpush3.bf16.msra.mxu1 %v4975_v31 }
 0x256   : > { %v1735_v39 = vadd.f32 %v4662_v35, %v1734_v30  ;;  %v4038_v33 = vpop.f32.mrb[62].mxu1  ;;  %3805 = vmatprep.subr.bf16.mxu0 %v1778_v3  ;;  %4162 = vmatprep.subr.bf16.mxu1 %v1778_v3  ;;  %v2212_v30 = vld [vmem:[#allocation2 + $0x20] sm:$0xff] }
 0x257   : > { %v3648_v38 = vpack.c.bf16 %v1743_v26, %v1743_v26  ;;  %v1746_v16 = vadd.f32 %v4038_v33, %v4662_v35  ;;  %v1737_v32 = vpop.f32.mrb[63].mxu1 }
 0x258   : > { %v3646_v29 = vpack.c.bf16 %v1735_v39, %v1735_v39  ;;  %v1738_v41 = vadd.f32 %v4662_v35, %v1737_v32 }
 0x259   : > { %2068 = vst.msk [vmem:[%s4428_s1 + $0xf8] sm:$0xf] %vm2005_vm12, %v3648_v38  ;;  %v1780_v43 = vpack.c.bf16 %v1746_v16, %v1743_v26  ;;  %v3649_v13 = vpack.c.bf16 %v1746_v16, %v1746_v16  ;;  %3806 = vmatpush3.bf16.msra.mxu0 %v4971_v17  ;;  %4170 = vmatpush3.bf16.msra.mxu1 %v4971_v17  ;;  %v2213_v16 = vld [vmem:[#allocation2 + $0x28] sm:$0xff] }
 0x25a   : > { %2066 = vst.msk [vmem:[%s4428_s1 + $0xf0] sm:$0xf] %vm2005_vm12, %v3646_v29  ;;  %v1779_v31 = vpack.c.bf16 %v1738_v41, %v1735_v39  ;;  %v3647_v44 = vpack.c.bf16 %v1738_v41, %v1738_v41 }
 0x25b   : > { %2069 = vst.msk [vmem:[%s4428_s1 + $0xfc] sm:$0xf] %vm2005_vm12, %v3649_v13 }
 0x25c   : > { %2067 = vst.msk [vmem:[%s4428_s1 + $0xf4] sm:$0xf] %vm2005_vm12, %v3647_v44  ;;  %3807 = vmatprep.subr.bf16.mxu0 %v1779_v31  ;;  %4163 = vmatprep.subr.bf16.mxu1 %v1779_v31  ;;  %vm4296_vm12 = vmmov (!%p3525_p6), 0  }
 0x25d   : > { %3808 = vmatpush3.bf16.msra.mxu0 %v4997_v36  ;;  %4171 = vmatpush3.bf16.msra.mxu1 %v4997_v36 }
 0x25e   : > { %3809 = vmatprep.subr.bf16.mxu0 %v1780_v43  ;;  %4164 = vmatprep.subr.bf16.mxu1 %v1780_v43 }
 0x261   : > { %3810 = vmatpush3.bf16.msra.mxu0 %v4993_v22  ;;  %4172 = vmatpush3.bf16.msra.mxu1 %v4993_v22 }
 0x264   : > { %3512 = vmatmul.mubr.msk.bf16.vlgmr.msra.gmra.mrb[80].mxu0 %vm4714_vm5, %v4293_v23  ;;  %3516 = vmatmul.mubr.msk.bf16.vlgmr.msra.gmra.mrb[64].mxu1 %vm4730_vm2, %v4293_v23 }
 0x265   : > { %3518 = vmatprep.mubr.msk.bf16.mxu1 %vm4739_vm9, %v4293_v23 }
 0x26c   : > { %3520 = vmatmul.mubr.msk.bf16.gmra.mrb[68].mxu1 %vm4748_vm11, %v4293_v23 }
 0x26d   : > { %3522 = vmatprep.mubr.msk.bf16.mxu1 %vm4778_vm14, %v4293_v23 }
 0x274   : > { %3524 = vmatmul.mubr.msk.bf16.gmra.mrb[72].mxu1 %vm4787_vm8, %v4293_v23 }
 0x2f7   : > { %v3771_v35 = vpop.f32.mrb[64].mxu0 }
 0x2f8   : > { %v3772_v58 = vpop.f32.mrb[65].mxu0 }
 0x2f9   : > { %v3773_v62 = vadd.f32 %v3772_v58, %v3771_v35  ;;  %v3774_v17 = vpop.f32.mrb[66].mxu0  ;;  %v2214_v35 = vld [vmem:[#allocation2 + $0x30] sm:$0xff] }
 0x2fa   : > { %v3775_v22 = vpop.f32.mrb[67].mxu0 }
 0x2fb   : > { %v3776_v36 = vadd.f32 %v3775_v22, %v3774_v17  ;;  %v2215_v22 = vld [vmem:[#allocation2 + $0x38] sm:$0xff] }
 0x2ff   : > { %v3777_v1 = vpop.f32.mrb[68].mxu0 }
 0x300   : > { %v3778_v25 = vpop.f32.mrb[69].mxu0 }
 0x301   : > { %v3779_v46 = vadd.f32 %v3778_v25, %v3777_v1  ;;  %v3780_v48 = vpop.f32.mrb[70].mxu0 }
 0x302   : > { %v3781_v5 = vpop.f32.mrb[71].mxu0 }
 0x303   : > { %v3782_v52 = vadd.f32 %v3781_v5, %v3780_v48  ;;  %v2374_v48 = vld [vmem:[%s5408_s0] sm:$0xff] (!%p3525_p6)  ;;  %v4294_v5 = vmov (!%p3525_p6), 0  }
 0x304   : > { %4239 = vset.pattern.permute.xlu1 (!%p3525_p6), %v4294_v5  ;;  %4238 = vset.pattern.permute.xlu0 (!%p3525_p6), %v4294_v5 }
 0x305   : > { %2384 = vperm.xlu0 (!%p3525_p6), %4238, %v2374_v48  }
 0x307   : > { %v3783_v56 = vpop.f32.mrb[72].mxu0 }
 0x308   : > { %v3784_v61 = vpop.f32.mrb[73].mxu0 }
 0x309   : > { %v3785_v15 = vadd.f32 %v3784_v61, %v3783_v56  ;;  %v3786_v37 = vpop.f32.mrb[74].mxu0  ;;  %v2375_v56 = vld [vmem:[%s5408_s0 + $0x8] sm:$0xff] (!%p3525_p6)  ;;  %v4240_v61 = vld [vmem:[%s5351_s9] sm:$0xff] (!%p3525_p6)  }
 0x30a   : > { %v3787_v49 = vpop.f32.mrb[75].mxu0  ;;  %4039 = vmatprep.subr.bf16.mxu0 (!%p3525_p6), %v4240_v61  ;;  %2389 = vperm.xlu0 (!%p3525_p6), %4238, %v2375_v56  }
 0x30b   : > { %v3788_v54 = vadd.f32 %v3787_v49, %v3786_v37  ;;  %v2379_v37 = vld [vmem:[%s5408_s0 + $0x28] sm:$0xff] (!%p3525_p6)  ;;  %v2378_v49 = vld [vmem:[%s5408_s0 + $0x20] sm:$0xff] (!%p3525_p6)  ;;  %4040 = vmatpush3.bf16.msra.mxu0 (!%p3525_p6), %v4240_v61 }
 0x30e   : > { %2404 = vperm.xlu0 (!%p3525_p6), %4238, %v2378_v49  }
 0x30f   : > { %v3789_v18 = vpop.f32.mrb[76].mxu0 }
 0x310   : > { %v3790_v23 = vpop.f32.mrb[77].mxu0 }
 0x311   : > { %v3791_v42 = vadd.f32 %v3790_v23, %v3789_v18  ;;  %v3792_v57 = vpop.f32.mrb[78].mxu0  ;;  %v2381_v18 = vld [vmem:[%s5408_s0 + $0x38] sm:$0xff] (!%p3525_p6)  ;;  %v2380_v23 = vld [vmem:[%s5408_s0 + $0x30] sm:$0xff] (!%p3525_p6) }
 0x312   : > { %v3793_v34 = vpop.f32.mrb[79].mxu0  ;;  %2414 = vperm.xlu0 (!%p3525_p6), %4238, %v2380_v23  }
 0x313   : > { %v3794_v45 = vadd.f32 %v3793_v34, %v3792_v57  ;;  %v2442_v57 = vld [vmem:[%s5350_s8] sm:$0xf] (!%p3525_p6) }
 0x314   : > { %v2607_v34 = vsel (!%p3525_p6), %vm2605_vm0, %v2442_v57, 0 }
 0x337   : > { %v3811_v50 = vpop.f32.mrb[80].mxu0  ;;  %v3817_v51 = vpop.f32.mrb[64].mxu1 }
 0x338   : > { %v3812_v55 = vpop.f32.mrb[81].mxu0  ;;  %v3818_v0 = vpop.f32.mrb[65].mxu1 }
 0x339   : > { %v3813_v2 = vadd.f32 %v3812_v55, %v3811_v50  ;;  %v3814_v24 = vpop.f32.mrb[82].mxu0  ;;  %v3819_v47 = vadd.f32 %v3818_v0, %v3817_v51  ;;  %v3820_v53 = vpop.f32.mrb[66].mxu1  ;;  %v4245_v50 = vld [vmem:[%s5351_s9 + $0x28] sm:$0xff] (!%p3525_p6)   ;;  %v4246_v51 = vld [vmem:[%s5351_s9 + $0x30] sm:$0xff] (!%p3525_p6)   ;;  %v4247_v55 = vld [vmem:[%s5351_s9 + $0x38] sm:$0xff] (!%p3525_p6)  }
 0x33a   : > { %v3815_v6 = vpop.f32.mrb[83].mxu0  ;;  %v3821_v9 = vpop.f32.mrb[67].mxu1  ;;  %v4252_v0 = vld [vmem:[%s5353_s11] sm:$0xff] (!%p3525_p6)  }
 0x33b   : > { %v2316_v11 = vadd.f32 %v3813_v2, %v3773_v62  ;;  %v3816_v12 = vadd.f32 %v3815_v6, %v3814_v24  ;;  %v2324_v14 = vadd.f32 %v3819_v47, %v3779_v46  ;;  %v3822_v59 = vadd.f32 %v3821_v9, %v3820_v53  ;;  %v2376_v46 = vld [vmem:[%s5408_s0 + $0x10] sm:$0xff] (!%p3525_p6)  ;;  %v4253_v2 = vld [vmem:[%s5353_s11 + $0x8] sm:$0xff] (!%p3525_p6)   ;;  %4073 = vmatprep.subr.bf16.mxu1 (!%p3525_p6), %v4252_v0  ;;  %v4255_v47 = vld [vmem:[%s5353_s11 + $0x18] sm:$0xff] (!%p3525_p6)  }
 0x33c   : > { %2394 = vperm.xlu1 (!%p3525_p6), %4239, %v2376_v46   ;;  %v4254_v24 = vld [vmem:[%s5353_s11 + $0x10] sm:$0xff] (!%p3525_p6)   ;;  %4074 = vmatpush3.bf16.msra.mxu1 (!%p3525_p6), %v4252_v0  ;;  %v4256_v53 = vld [vmem:[%s5353_s11 + $0x20] sm:$0xff] (!%p3525_p6)  }
 0x33d   : > { %v2346_v10 = vadd.f32 %v2316_v11, %v2208_v4  ;;  %v2319_v28 = vadd.f32 %v3816_v12, %v3776_v36  ;;  %v2348_v19 = vadd.f32 %v2324_v14, %v2210_v40  ;;  %v2327_v60 = vadd.f32 %v3822_v59, %v3782_v52  ;;  %v2377_v52 = vld [vmem:[%s5408_s0 + $0x18] sm:$0xff] (!%p3525_p6)  ;;  %4075 = vmatprep.subr.bf16.mxu1 (!%p3525_p6), %v4253_v2  ;;  %v4257_v4 = vld [vmem:[%s5353_s11 + $0x28] sm:$0xff] (!%p3525_p6)  }
 0x33f   : > { %2354 = vst [vmem:[#allocation2] sm:$0xff] %v2346_v10  ;;  %v2347_v3 = vadd.f32 %v2319_v28, %v2209_v63  ;;  %2356 = vst [vmem:[#allocation2 + $0x10] sm:$0xff] %v2348_v19  ;;  %v2349_v8 = vadd.f32 %v2327_v60, %v2211_v7  ;;  %v3823_v27 = vpop.f32.mrb[68].mxu1 }
 0x340   : > { %v3824_v20 = vpop.f32.mrb[69].mxu1  ;;  %2399 = vperm.xlu1 (!%p3525_p6), %4239, %v2377_v52   ;;  %4076 = vmatpush3.bf16.msra.mxu1 (!%p3525_p6), %v4253_v2 }
 0x341   : > { %2355 = vst [vmem:[#allocation2 + $0x8] sm:$0xff] %v2347_v3  ;;  %2357 = vst [vmem:[#allocation2 + $0x18] sm:$0xff] %v2349_v8  ;;  %v3825_v21 = vadd.f32 %v3824_v20, %v3823_v27  ;;  %v3826_v26 = vpop.f32.mrb[70].mxu1  ;;  %4077 = vmatprep.subr.bf16.mxu1 (!%p3525_p6), %v4254_v24 }
 0x342   : > { %v3827_v39 = vpop.f32.mrb[71].mxu1 }
 0x343   : > { %v2332_v33 = vadd.f32 %v3825_v21, %v3785_v15  ;;  %v3828_v38 = vadd.f32 %v3827_v39, %v3826_v26  ;;  %v4241_v15 = vld [vmem:[%s5351_s9 + $0x8] sm:$0xff] (!%p3525_p6)  }
 0x344   : > { %4041 = vmatprep.subr.bf16.mxu0 (!%p3525_p6), %v4241_v15  ;;  %2409 = vperm.xlu1 (!%p3525_p6), %4239, %v2379_v37  }
 0x345   : > { %v2350_v32 = vadd.f32 %v2332_v33, %v2212_v30  ;;  %v2335_v29 = vadd.f32 %v3828_v38, %v3788_v54  ;;  %v4242_v54 = vld [vmem:[%s5351_s9 + $0x10] sm:$0xff] (!%p3525_p6)   ;;  %4042 = vmatpush3.bf16.msra.mxu0 (!%p3525_p6), %v4241_v15  ;;  %4078 = vmatpush3.bf16.msra.mxu1 (!%p3525_p6), %v4254_v24 }
 0x346   : > { %4043 = vmatprep.subr.bf16.mxu0 (!%p3525_p6), %v4242_v54  ;;  %4079 = vmatprep.subr.bf16.mxu1 (!%p3525_p6), %v4255_v47  ;;  %v5163_v9 = vld [vmem:[#allocation2 + $0x10] sm:$0xff] (!%p3525_p6)  ;;  %v5165_v11 = vld [vmem:[#allocation2] sm:$0xff] (!%p3525_p6) }
 0x347   : > { %2358 = vst [vmem:[#allocation2 + $0x20] sm:$0xff] %v2350_v32  ;;  %v2351_v41 = vadd.f32 %v2335_v29, %v2213_v16  ;;  %v3829_v43 = vpop.f32.mrb[72].mxu1 }
 0x348   : > { %v3830_v13 = vpop.f32.mrb[73].mxu1  ;;  %2419 = vperm.xlu1 (!%p3525_p6), %4239, %v2381_v18   ;;  %v5167_v12 = vld [vmem:[#allocation2 + $0x18] sm:$0xff] (!%p3525_p6)  ;;  %v5169_v14 = vld [vmem:[#allocation2 + $0x8] sm:$0xff] (!%p3525_p6) }
 0x349   : > { %2359 = vst [vmem:[#allocation2 + $0x28] sm:$0xff] %v2351_v41  ;;  %v3831_v31 = vadd.f32 %v3830_v13, %v3829_v43  ;;  %v3832_v44 = vpop.f32.mrb[74].mxu1  ;;  %4044 = vmatpush3.bf16.msra.mxu0 (!%p3525_p6), %v4242_v54  ;;  %4080 = vmatpush3.bf16.msra.mxu1 (!%p3525_p6), %v4255_v47  ;;  %v4248_v13 = vld [vmem:[%s5409_s28] sm:$0xff] (!%p3525_p6)  }
 0x34a   : > { %v3833_v58 = vpop.f32.mrb[75].mxu1  ;;  %4081 = vmatprep.subr.bf16.mxu1 (!%p3525_p6), %v4256_v53 }
 0x34b   : > { %v2340_v62 = vadd.f32 %v3831_v31, %v3791_v42  ;;  %v3834_v17 = vadd.f32 %v3833_v58, %v3832_v44  ;;  %2365 = sbr.rel (%p3525_p6) target bundleno = 1884 (0x75c), region = 100  ;;  %v4243_v42 = vld [vmem:[%s5351_s9 + $0x18] sm:$0xff] (!%p3525_p6)   ;;  %v4249_v31 = vld [vmem:[%s5409_s28 + $0x8] sm:$0xff] (!%p3525_p6)   ;;  %v4250_v44 = vld [vmem:[%s5409_s28 + $0x10] sm:$0xff] (!%p3525_p6)  }
 0x34c   : > { %4045 = vmatprep.subr.bf16.mxu0 (!%p3525_p6), %v4243_v42  ;;  %v4258_v58 = vld [vmem:[%s5353_s11 + $0x30] sm:$0xff] (!%p3525_p6)  }
 0x34d   : > { %v2352_v36 = vadd.f32 %v2340_v62, %v2214_v35  ;;  %v2343_v1 = vadd.f32 %v3834_v17, %v3794_v45  ;;  %v4244_v45 = vld [vmem:[%s5351_s9 + $0x20] sm:$0xff] (!%p3525_p6)   ;;  %4046 = vmatpush3.bf16.msra.mxu0 (!%p3525_p6), %v4243_v42  ;;  %4082 = vmatpush3.bf16.msra.mxu1 (!%p3525_p6), %v4256_v53  ;;  %v4251_v35 = vld [vmem:[%s5409_s28 + $0x18] sm:$0xff] (!%p3525_p6)  }
 0x34e   : > { %4047 = vmatprep.subr.bf16.mxu0 (!%p3525_p6), %v4244_v45  ;;  %4083 = vmatprep.subr.bf16.mxu1 (!%p3525_p6), %v4257_v4  ;;  %v5177_v3 = vld [vmem:[#allocation2 + $0x20] sm:$0xff] (!%p3525_p6)  ;;  %v4259_v62 = vld [vmem:[%s5353_s11 + $0x38] sm:$0xff] (!%p3525_p6)  }
 0x34f   : > { %2360 = vst [vmem:[#allocation2 + $0x30] sm:$0xff] %v2352_v36  ;;  %v2353_v25 = vadd.f32 %v2343_v1, %v2215_v22  ;;  %v3542_v17 = vld [vmem:[%s5352_s10] ss:$0 sm:$0xff] (!%p3525_p6) }
 0x350   : > { %v5175_v60 = vld [vmem:[#allocation2 + $0x28] sm:$0xff] (!%p3525_p6) }
 0x351   : > { %2361 = vst [vmem:[#allocation2 + $0x38] sm:$0xff] %v2353_v25  ;;  %4048 = vmatpush3.bf16.msra.mxu0 (!%p3525_p6), %v4244_v45  ;;  %4084 = vmatpush3.bf16.msra.mxu1 (!%p3525_p6), %v4257_v4  ;;  %v4260_v4 = vld [vmem:[%s5356_s14] sm:$0xff] (!%p3525_p6)  }
 0x352   : > { %4049 = vmatprep.subr.bf16.mxu0 %v4245_v50  ;;  %4085 = vmatprep.subr.bf16.mxu1 %v4258_v58 }
 0x355   : > { %4050 = vmatpush3.bf16.msra.mxu0 %v4245_v50  ;;  %4086 = vmatpush3.bf16.msra.mxu1 %v4258_v58  ;;  %v4277_v58 = vld [vmem:[%s5358_s16 + $0x8] sm:$0xff]  }
 0x356   : > { %4051 = vmatprep.subr.bf16.mxu0 %v4246_v51  ;;  %v5183_v33 = vld [vmem:[#allocation2 + $0x30] sm:$0xff]  ;;  %4087 = vmatprep.subr.bf16.mxu1 %v4259_v62 }
 0x358   : > { %v5181_v39 = vld [vmem:[#allocation2 + $0x38] sm:$0xff] }
 0x359   : > { %4052 = vmatpush3.bf16.msra.mxu0 %v4246_v51  ;;  %4088 = vmatpush3.bf16.msra.mxu1 %v4259_v62  ;;  %v4278_v62 = vld [vmem:[%s5358_s16 + $0x10] sm:$0xff]  }
 0x35a   : > { %4053 = vmatprep.subr.bf16.mxu0 %v4247_v55 }
 0x35d   : > { %4054 = vmatpush3.bf16.msra.mxu0 %v4247_v55 }
 0x35e   : > { %4182 = vmatprep.subr.msk.bf16.mxu0 %vm2605_vm0, %v2442_v57 }
 0x384   : > { %v2385_v40 = vpop.permute.xlu0 %2384 }
 0x385   : > { %v2422_v10 = vmul.f32 %v2385_v40, %v5165_v11  ;;  %v4261_v40 = vld [vmem:[%s5355_s13] sm:$0xff]  }
 0x389   : > { %v2390_v63 = vpop.permute.xlu0 %2389 }
 0x38a   : > { %v2423_v19 = vmul.f32 %v2390_v63, %v5169_v14  ;;  %v4262_v63 = vld [vmem:[%s5356_s14 + $0x8] sm:$0xff]  }
 0x38c   : > { %v2430_v27 = vpack.c.bf16 %v2423_v19, %v2422_v10  ;;  %v4263_v10 = vld [vmem:[%s5355_s13 + $0x8] sm:$0xff]  }
 0x38d   : > { %v2405_v21 = vpop.permute.xlu0 %2404 }
 0x38e   : > { %v2426_v30 = vmul.f32 %v2405_v21, %v5177_v3  ;;  %4055 = vmatprep.mubr.bf16.mxu0 %v2430_v27  ;;  %v4269_v21 = vld [vmem:[%s5355_s13 + $0x20] sm:$0xff]  }
 0x391   : > { %v2415_v32 = vpop.permute.xlu0 %2414 }
 0x392   : > { %v2428_v41 = vmul.f32 %v2415_v32, %v5183_v33 }
 0x3bb   : > { %v2395_v6 = vpop.permute.xlu1 %2394 }
 0x3bc   : > { %v2424_v7 = vmul.f32 %v2395_v6, %v5163_v9  ;;  %v4295_v6 = vmov 0.0  }
 0x3bd   : > { %4097 = vmatprep.subr.bf16.mxu1 %v4295_v6 }
 0x3bf   : > { %v2400_v59 = vpop.permute.xlu1 %2399 }
 0x3c0   : > { %v2425_v28 = vmul.f32 %v2400_v59, %v5167_v12  ;;  %v2885_v59 = vadd.f32 %v5169_v14, %v5165_v11  ;;  %v4264_v11 = vld [vmem:[%s5356_s14 + $0x10] sm:$0xff]  }
 0x3c2   : > { %v2431_v8 = vpack.c.bf16 %v2425_v28, %v2424_v7  ;;  %v2886_v7 = vadd.f32 %v2885_v59, %v5163_v9  ;;  %v4265_v9 = vld [vmem:[%s5355_s13 + $0x10] sm:$0xff]  }
 0x3c3   : > { %v2410_v20 = vpop.permute.xlu1 %2409 }
 0x3c4   : > { %v2427_v26 = vmul.f32 %v2410_v20, %v5175_v60  ;;  %4056 = vmatmul.mubr.bf16.vlgmr.msra.gmra.mrb[0].mxu0 %v2431_v8  ;;  %v2887_v28 = vadd.f32 %v2886_v7, %v5167_v12  ;;  %v4266_v12 = vld [vmem:[%s5356_s14 + $0x18] sm:$0xff]  }
 0x3c5   : > { %4064 = vmatpush3.bf16.msra.mxu0 %v2607_v34 }
 0x3c6   : > { %v2432_v38 = vpack.c.bf16 %v2427_v26, %v2426_v30  ;;  %4117 = vmatprep.subr.bf16.mxu0 %v4295_v6  ;;  %v2888_v14 = vadd.f32 %v2887_v28, %v5177_v3  ;;  %v4267_v3 = vld [vmem:[%s5355_s13 + $0x18] sm:$0xff]   ;;  %v4270_v30 = vld [vmem:[%s5356_s14 + $0x28] sm:$0xff]  }
 0x3c7   : > { %v2420_v16 = vpop.permute.xlu1 %2419 }
 0x3c8   : > { %v2429_v29 = vmul.f32 %v2420_v16, %v5181_v39  ;;  %4059 = vmatprep.mubr.bf16.mxu0 %v2432_v38  ;;  %v2889_v19 = vadd.f32 %v2888_v14, %v5175_v60  ;;  %v4268_v60 = vld [vmem:[%s5356_s14 + $0x20] sm:$0xff]   ;;  %v4272_v16 = vld [vmem:[%s5356_s14 + $0x30] sm:$0xff]  }
 0x3ca   : > { %v2433_v43 = vpack.c.bf16 %v2429_v29, %v2428_v41  ;;  %v2890_v8 = vadd.f32 %v2889_v19, %v5183_v33  ;;  %v4271_v33 = vld [vmem:[%s5355_s13 + $0x28] sm:$0xff]   ;;  %v4273_v29 = vld [vmem:[%s5355_s13 + $0x30] sm:$0xff]  }
 0x3cc   : > { %4060 = vmatmul.mubr.bf16.gmra.mrb[4].mxu0 %v2433_v43  ;;  %v2891_v27 = vadd.f32 %v2890_v8, %v5181_v39  ;;  %v4274_v43 = vld [vmem:[%s5356_s14 + $0x38] sm:$0xff]  }
 0x3cd   : > { %4065 = vmatprep.mubr.msk.bf16.mxu0 %vm2592_vm3, %v4248_v13 }
 0x3ce   : > { %v2892_v20 = vrot.slane %v2891_v27, 4 }
 0x3d0   : > { %v2893_v26 = vadd.f32 %v2892_v20, %v2891_v27  ;;  %v4282_v27 = vld [vmem:[%s5358_s16 + $0x30] sm:$0xff]  }
 0x3d2   : > { %v2894_v39 = vrot.slane %v2893_v26, 2 }
 0x3d4   : > { %4066 = vmatmul.mubr.msk.bf16.vlgmr.msra.gmra.mrb[0].mxu0 %vm2592_vm3, %v4249_v31  ;;  %v2895_v38 = vadd.f32 %v2894_v39, %v2893_v26  ;;  %v4275_v31 = vld [vmem:[%s5355_s13 + $0x38] sm:$0xff]  }
 0x3d5   : > { %4069 = vmatprep.mubr.msk.bf16.mxu0 %vm2592_vm3, %v4250_v44  ;;  %4118 = vmatpush3.bf16.msra.mxu0 %v4261_v40 }
 0x3d6   : > { %4119 = vmatprep.subr.bf16.mxu0 %v4295_v6  ;;  %v2896_v32 = vrot.slane %v2895_v38, 1 }
 0x3d8   : > { %v2897_v41 = vadd.f32 %v2896_v32, %v2895_v38 }
 0x3d9   : > { %4120 = vmatpush3.bf16.msra.mxu0 %v4263_v10 }
 0x3da   : > { %4121 = vmatprep.subr.bf16.mxu0 %v4295_v6  ;;  %v2913_v13 = vmul.f32 0.00083333335, %v2897_v41 }
 0x3dc   : > { %4070 = vmatmul.mubr.msk.bf16.gmra.mrb[4].mxu0 %vm2592_vm3, %v4251_v35  ;;  %v2914_v44 = vpack.c.bf16 %v2913_v13, %v2913_v13  ;;  %v4276_v35 = vld [vmem:[%s5358_s16] sm:$0xff]  }
 0x3dd   : > { %4122 = vmatpush3.bf16.msra.mxu0 %v4265_v9  ;;  %4133 = vmatprep.mubr.msk.bf16.mxu0 %vm4296_vm12, %v4295_v6 }
 0x3de   : > { %4123 = vmatprep.subr.bf16.mxu0 %v4295_v6 }
 0x3e1   : > { %4124 = vmatpush3.bf16.msra.mxu0 %v4267_v3 }
 0x3e2   : > { %4125 = vmatprep.subr.bf16.mxu0 %v4295_v6 }
 0x3e5   : > { %4126 = vmatpush3.bf16.msra.mxu0 %v4269_v21  ;;  %v3123_v21 = vld [vmem:[%s5357_s15] sm:$0x1] }
 0x3e6   : > { %4127 = vmatprep.subr.bf16.mxu0 %v4295_v6 }
 0x3e9   : > { %4128 = vmatpush3.bf16.msra.mxu0 %v4271_v33 }
 0x3ea   : > { %4129 = vmatprep.subr.bf16.mxu0 %v4295_v6 }
 0x3ed   : > { %4130 = vmatpush3.bf16.msra.mxu0 %v4273_v29 }
 0x3ee   : > { %4131 = vmatprep.subr.bf16.mxu0 %v4295_v6 }
 0x3f1   : > { %4132 = vmatpush3.bf16.msra.mxu0 %v4275_v31 }
 0x4a7   : > { %v4067_v22 = vpop.f32.mrb[0].mxu0 }
 0x4a8   : > { %v2683_v36 = vadd.f32 %v4067_v22, %v3542_v17  ;;  %v2643_v1 = vpop.f32.mrb[1].mxu0  ;;  %v4280_v22 = vld [vmem:[%s5358_s16 + $0x20] sm:$0xff]  }
 0x4a9   : > { %v2681_v25 = vadd.f32 %v3542_v17, %v2643_v1  ;;  %v4068_v46 = vpop.f32.mrb[2].mxu0 }
 0x4aa   : > { %v2684_v48 = vadd.f32 %v4068_v46, %v3542_v17  ;;  %v2646_v5 = vpop.f32.mrb[3].mxu0  ;;  %v2691_v56 = vmax.f32 %v2683_v36, 0.0  ;;  %v4281_v36 = vld [vmem:[%s5358_s16 + $0x28] sm:$0xff]  }
 0x4ab   : > { %v2682_v52 = vadd.f32 %v3542_v17, %v2646_v5  ;;  %v2689_v15 = vmax.f32 %v2681_v25, 0.0  ;;  %v3543_v25 = vld [vmem:[%s5354_s12] ss:$0 sm:$0xff] }
 0x4ac   : > { %v2692_v61 = vmax.f32 %v2684_v48, 0.0 }
 0x4ad   : > { %v2690_v37 = vmax.f32 %v2682_v52, 0.0 }
 0x4ae   : > { %v2698_v49 = vpack.c.bf16 %v2692_v61, %v2691_v56 }
 0x4af   : > { %v4071_v54 = vpop.f32.mrb[4].mxu0  ;;  %v2697_v18 = vpack.c.bf16 %v2690_v37, %v2689_v15 }
 0x4b0   : > { %v2687_v23 = vadd.f32 %v4071_v54, %v3542_v17  ;;  %v2659_v42 = vpop.f32.mrb[5].mxu0 }
 0x4b1   : > { %v2685_v57 = vadd.f32 %v3542_v17, %v2659_v42  ;;  %v4072_v34 = vpop.f32.mrb[6].mxu0  ;;  %4089 = vmatprep.mubr.bf16.mxu1 %v2697_v18 }
 0x4b2   : > { %v2688_v45 = vadd.f32 %v4072_v34, %v3542_v17  ;;  %v2662_v50 = vpop.f32.mrb[7].mxu0  ;;  %4090 = vmatmul.mubr.bf16.vlgmr.msra.gmra.mrb[0].mxu1 %v2698_v49  ;;  %v2695_v55 = vmax.f32 %v2687_v23, 0.0 }
 0x4b3   : > { %v2686_v51 = vadd.f32 %v3542_v17, %v2662_v50  ;;  %v2693_v2 = vmax.f32 %v2685_v57, 0.0  ;;  %4098 = vmatpush3.bf16.msra.mxu1 %v4260_v4  ;;  %v4279_v17 = vld [vmem:[%s5358_s16 + $0x18] sm:$0xff]  }
 0x4b4   : > { %v2696_v0 = vmax.f32 %v2688_v45, 0.0  ;;  %4099 = vmatprep.subr.bf16.mxu1 %v4295_v6 }
 0x4b5   : > { %v2694_v24 = vmax.f32 %v2686_v51, 0.0 }
 0x4b6   : > { %v2700_v47 = vpack.c.bf16 %v2696_v0, %v2695_v55 }
 0x4b7   : > { %v2699_v53 = vpack.c.bf16 %v2694_v24, %v2693_v2  ;;  %4100 = vmatpush3.bf16.msra.mxu1 %v4262_v63 }
 0x4b8   : > { %4101 = vmatprep.subr.bf16.mxu1 %v4295_v6 }
 0x4b9   : > { %4093 = vmatprep.mubr.bf16.mxu1 %v2699_v53 }
 0x4ba   : > { %4094 = vmatmul.mubr.bf16.gmra.mrb[4].mxu1 %v2700_v47 }
 0x4bb   : > { %4102 = vmatpush3.bf16.msra.mxu1 %v4264_v11  ;;  %4113 = vmatprep.mubr.msk.bf16.mxu1 %vm4296_vm12, %v4295_v6 }
 0x4bc   : > { %4103 = vmatprep.subr.bf16.mxu1 %v4295_v6 }
 0x4bf   : > { %4104 = vmatpush3.bf16.msra.mxu1 %v4266_v12 }
 0x4c0   : > { %4105 = vmatprep.subr.bf16.mxu1 %v4295_v6 }
 0x4c3   : > { %4106 = vmatpush3.bf16.msra.mxu1 %v4268_v60  ;;  %v4283_v60 = vld [vmem:[%s5358_s16 + $0x38] sm:$0xff]  }
 0x4c4   : > { %4107 = vmatprep.subr.bf16.mxu1 %v4295_v6 }
 0x4c7   : > { %4108 = vmatpush3.bf16.msra.mxu1 %v4270_v30 }
 0x4c8   : > { %4109 = vmatprep.subr.bf16.mxu1 %v4295_v6 }
 0x4cb   : > { %4110 = vmatpush3.bf16.msra.mxu1 %v4272_v16 }
 0x4cc   : > { %4111 = vmatprep.subr.bf16.mxu1 %v4295_v6 }
 0x4cf   : > { %4112 = vmatpush3.bf16.msra.mxu1 %v4274_v43 }
 0x4d0   : > { %4137 = vmatprep.subr.bf16.mxu1 %v4295_v6 }
 0x4d2   : > { %4114 = vmatmul.mubr.bf16.vlgmr.msra.gmra.mrb[8].mxu1 %v2914_v44 }
 0x4d3   : > { %4153 = vmatprep.mubr.msk.bf16.mxu1 %vm4296_vm12, %v4295_v6  ;;  %4138 = vmatpush3.bf16.msra.mxu1 %v4276_v35 }
 0x4d4   : > { %4139 = vmatprep.subr.bf16.mxu1 %v4295_v6 }
 0x4d7   : > { %4140 = vmatpush3.bf16.msra.mxu1 %v4277_v58 }
 0x4d8   : > { %4141 = vmatprep.subr.bf16.mxu1 %v4295_v6 }
 0x4db   : > { %4142 = vmatpush3.bf16.msra.mxu1 %v4278_v62 }
 0x4dc   : > { %4143 = vmatprep.subr.bf16.mxu1 %v4295_v6 }
 0x4df   : > { %4144 = vmatpush3.bf16.msra.mxu1 %v4279_v17 }
 0x4e0   : > { %4145 = vmatprep.subr.bf16.mxu1 %v4295_v6 }
 0x4e3   : > { %4146 = vmatpush3.bf16.msra.mxu1 %v4280_v22 }
 0x4e4   : > { %4147 = vmatprep.subr.bf16.mxu1 %v4295_v6 }
 0x4e7   : > { %4148 = vmatpush3.bf16.msra.mxu1 %v4281_v36 }
 0x4e8   : > { %4149 = vmatprep.subr.bf16.mxu1 %v4295_v6 }
 0x4eb   : > { %4150 = vmatpush3.bf16.msra.mxu1 %v4282_v27 }
 0x4ec   : > { %4151 = vmatprep.subr.bf16.mxu1 %v4295_v6  ;;  %v3143_v6 = vld [vmem:[%s5359_s17] sm:$0x1] }
 0x4ef   : > { %4152 = vmatpush3.bf16.msra.mxu1 %v4283_v60 }
 0x585   : > { %v4091_v1 = vpop.f32.mrb[0].mxu1 }
 0x586   : > { %v2806_v46 = vpop.f32.mrb[1].mxu1  ;;  %v2815_v5 = vadd.f32 %v4091_v1, %v3543_v25 }
 0x587   : > { %v4092_v48 = vpop.f32.mrb[2].mxu1  ;;  %v2807_v61 = vadd.f32 %v3543_v25, %v2806_v46 }
 0x588   : > { %v2818_v52 = vadd.f32 %v4092_v48, %v3543_v25  ;;  %v2809_v56 = vpop.f32.mrb[3].mxu1 }
 0x589   : > { %v2810_v15 = vadd.f32 %v3543_v25, %v2809_v56 }
 0x58a   : > { %v3666_v37 = vpack.c.bf16 %v2818_v52, %v2815_v5 }
 0x58b   : > { %v3661_v49 = vpack.c.bf16 %v2810_v15, %v2807_v61  ;;  %v2898_v54 = vadd.f32 %v2810_v15, %v2807_v61 }
 0x58c   : > { %3678 = vst [vmem:[%s5361_s19 + $0x8] sm:$0xff] %v3666_v37  }
 0x58d   : > { %3662 = vst [vmem:[%s5361_s19] sm:$0xff] %v3661_v49   ;;  %v2899_v18 = vadd.f32 %v2898_v54, %v2815_v5  ;;  %v4095_v23 = vpop.f32.mrb[4].mxu1 }
 0x58e   : > { %v2822_v42 = vpop.f32.mrb[5].mxu1  ;;  %v2831_v50 = vadd.f32 %v4095_v23, %v3543_v25 }
 0x58f   : > { %v2823_v57 = vadd.f32 %v3543_v25, %v2822_v42  ;;  %v2900_v34 = vadd.f32 %v2899_v18, %v2818_v52  ;;  %v4096_v45 = vpop.f32.mrb[6].mxu1 }
 0x590   : > { %v2834_v51 = vadd.f32 %v4096_v45, %v3543_v25  ;;  %v2825_v55 = vpop.f32.mrb[7].mxu1 }
 0x591   : > { %v2901_v0 = vadd.f32 %v2900_v34, %v2823_v57  ;;  %v2826_v2 = vadd.f32 %v3543_v25, %v2825_v55 }
 0x592   : > { %v3676_v24 = vpack.c.bf16 %v2834_v51, %v2831_v50 }
 0x593   : > { %v3671_v47 = vpack.c.bf16 %v2826_v2, %v2823_v57  ;;  %v2902_v53 = vadd.f32 %v2901_v0, %v2826_v2 }
 0x594   : > { %3680 = vst [vmem:[%s5361_s19 + $0x18] sm:$0xff] %v3676_v24  }
 0x595   : > { %3679 = vst [vmem:[%s5361_s19 + $0x10] sm:$0xff] %v3671_v47   ;;  %v2903_v4 = vadd.f32 %v2902_v53, %v2831_v50 }
 0x597   : > { %v2904_v40 = vadd.f32 %v2903_v4, %v2834_v51 }
 0x599   : > { %v2905_v59 = vrot.slane %v2904_v40, 4 }
 0x59b   : > { %v2906_v63 = vadd.f32 %v2905_v59, %v2904_v40 }
 0x59d   : > { %v2907_v7 = vrot.slane %v2906_v63, 2 }
 0x59f   : > { %v2908_v10 = vadd.f32 %v2907_v7, %v2906_v63 }
 0x5a1   : > { %v2909_v28 = vrot.slane %v2908_v10, 1 }
 0x5a3   : > { %v2910_v11 = vadd.f32 %v2909_v28, %v2908_v10 }
 0x5a5   : > { %v2911_v14 = vmul.f32 0.015625, %v2910_v11  ;;  %v3029_v19 = vpop.f32.mrb[8].mxu1 }
 0x5a6   : > { %v4115_v12 = vpop.f32.mrb[9].mxu1 }
 0x5a7   : > { %v2912_v9 = vpack.c.bf16 %v2911_v14, %v2911_v14  ;;  %v3032_v8 = vpop.f32.mrb[10].mxu1 }
 0x5a8   : > { %v4116_v3 = vpop.f32.mrb[11].mxu1 }
 0x5a9   : > { %4134 = vmatmul.mubr.bf16.vlgmr.msra.gmra.mrb[8].mxu0 %v2912_v9 }
 0x67c   : > { %v3117_v20 = vpop.f32.mrb[8].mxu0 }
 0x67d   : > { %v3118_v26 = vadd.f32 %v3117_v20, %v3029_v19  ;;  %v4135_v30 = vpop.f32.mrb[9].mxu0 }
 0x67e   : > { %v3120_v39 = vpop.f32.mrb[10].mxu0 }
 0x67f   : > { %v3124_v33 = vadd.f32 %v3123_v21, %v3118_v26  ;;  %v4136_v38 = vpop.f32.mrb[11].mxu0 }
 0x681   : > { %v3125_v16 = vmax.f32 %v3124_v33, 0.0 }
 0x683   : > { %v3126_v32 = vpack.c.bf16 %v3125_v16, %v3125_v16 }
 0x685   : > { %4154 = vmatmul.mubr.bf16.vlgmr.msra.gmra.mrb[12].mxu1 %v3126_v32 }
 0x758   : > { %v3226_v29 = vpop.f32.mrb[12].mxu1 }
 0x759   : > { %v3227_v41 = vadd.f32 %v3226_v29, %v3143_v6  ;;  %v4155_v43 = vpop.f32.mrb[13].mxu1 }
 0x75a   : > { %v3229_v13 = vpop.f32.mrb[14].mxu1 }
 0x75b   : > { %3232 = vst [vmem:[%s5362_s20] sm:$0x1] %v3227_v41  ;;  %v4156_v31 = vpop.f32.mrb[15].mxu1 }
 0x75c PF: > { %s5410_s29 = sld [smem:[#allocation3_spill]] }
 0x762   : > { %s31_s1 = sadd.s32 1, %s5410_s29  }
 0x763   : > { %p28_p7 = scmp.ge.s32.totalorder %s31_s1, 5  }
 0x765   :  { %30 = sbr.rel (!%p28_p7) target bundleno = 6 (0x6), region = 149 }

// kernel: mp_block_forward.3
= control target key start
LH: loop header
LB: loop body
LE: loop exit
PB: predicated region body
PF: predicated region fallthrough
CT: control target
= control target key end

     0   :  { %s5422_s0 = inlined_call_operand.vmem [shape: bf16[1536,24], index: 0, kind: input, shape index: {}]   ;;  %s5423_s1 = inlined_call_operand.vmem [shape: s32[1,1536], index: 1, kind: input, shape index: {}]   ;;  %s5424_s2 = inlined_call_operand.vmem [shape: bf16[64,8], index: 2, kind: input, shape index: {}]   ;;  %s5425_s3 = inlined_call_operand.vmem [shape: f32[64,1], index: 3, kind: input, shape index: {}]   ;;  %s5426_s4 = inlined_call_operand.vmem [shape: bf16[24,128], index: 4, kind: input, shape index: {}]   ;;  %s5427_s5 = inlined_call_operand.vmem [shape: f32[1,128], index: 5, kind: input, shape index: {}]   ;;  %s5428_s6 = inlined_call_operand.vmem [shape: bf16[128,128], index: 6, kind: input, shape index: {}]   ;;  %s5429_s7 = inlined_call_operand.vmem [shape: f32[1,128], index: 7, kind: input, shape index: {}]   ;;  %s5430_s8 = inlined_call_operand.vmem [shape: bf16[8,128], index: 8, kind: input, shape index: {}]   ;;  %s5431_s9 = inlined_call_operand.vmem [shape: bf16[128,128], index: 9, kind: input, shape index: {}]   ;;  %s5432_s10 = inlined_call_operand.vmem [shape: f32[1,128], index: 10, kind: input, shape index: {}]   ;;  %s5433_s11 = inlined_call_operand.vmem [shape: bf16[128,128], index: 11, kind: input, shape index: {}]   ;;  %s5434_s12 = inlined_call_operand.vmem [shape: f32[1,128], index: 12, kind: input, shape index: {}]   ;;  %s5435_s13 = inlined_call_operand.vmem [shape: bf16[128,128], index: 13, kind: input, shape index: {}]   ;;  %s5436_s14 = inlined_call_operand.vmem [shape: bf16[128,128], index: 14, kind: input, shape index: {}]   ;;  %s5437_s15 = inlined_call_operand.vmem [shape: f32[1,128], index: 15, kind: input, shape index: {}]   ;;  %s5438_s16 = inlined_call_operand.vmem [shape: bf16[128,128], index: 16, kind: input, shape index: {}]   ;;  %s5439_s17 = inlined_call_operand.vmem [shape: f32[1,128], index: 17, kind: input, shape index: {}]   ;;  %s5440_s18 = inlined_call_operand.vmem [shape: bf16[1536,1], index: 18, kind: output, shape index: {0}]   ;;  %s5441_s19 = inlined_call_operand.vmem [shape: bf16[64,128], index: 19, kind: output, shape index: {1}]   ;;  %s5442_s20 = inlined_call_operand.hbm [shape: f32[1,128], index: 20, kind: output, shape index: {2}]  }
   0x1   :  { %5448 = sst [smem:[#allocation7_spill]] %s5422_s0 }
   0x2   :  { %5449 = sst [smem:[#allocation8_spill]] %s5423_s1 }
   0x3   :  { %5450 = sst [smem:[#allocation9_spill]] %s5424_s2 }
   0x4   :  { %5451 = sst [smem:[#allocation10_spill]] %s5425_s3 }
   0x5   :  { %5452 = sst [smem:[#allocation11_spill]] %s5426_s4 }
   0x6   :  { %26 = vsyncpa [#allocation4], 0  ;;  %s4460_s1 = smov 0  }
   0x7 LB: > { %5453 = sst [smem:[#allocation6_spill]] %s4347_s1  ;;  %s4466_s22 = sadd.s32 4294967295, %s4347_s1   ;;  %s4347_s1 = sphi %s4460_s1, %s32_s1  }
   0x8   : > { %p3332_p0 = scmp.ge.s32.totalorder %s4347_s1, 1  ;;  %p569_p1 = scmp.lt.s32.totalorder %s4347_s1, 4 }
   0xa   : > { %p570_p2 = pnand %p3332_p0, %p569_p1 }
   0xb   : > { %s3333_s23 = sshll.u32 (!%p570_p2), %s4466_s22, 6  ;;  %s3335_s24 = sshll.u32 (!%p570_p2), %s4466_s22, 2 }
   0xc   : > { %573 = sbr.rel (%p570_p2) target bundleno = 1910 (0x776), region = 92  ;;  %p632_p3 = scmp.lt.s32.totalorder (!%p570_p2), %s3333_s23, 191 }
   0xd   : > { %p638_p4 = scmp.lt.s32.totalorder (!%p570_p2), %s3335_s24, 11  ;;  %s5454_s26 = sld [smem:[#allocation7_spill]] (!%p570_p2) }
   0xe   : > { %s5455_s29 = sld [smem:[#allocation8_spill]] (!%p570_p2)  ;;  %p3338_p5 = scmp.ne.s32.totalorder (!%p570_p2), %s4466_s22, 0 }
  0x13   : > { %s5496_s23 = smov (!%p632_p3, %s3333_s23), 191  ;;  %s5498_s24 = smov (!%p638_p4, %s3335_s24), 11 }
  0x14   : > { %s3334_s2 = sshll.u32 %s5496_s23, 2  ;;  %s640_s30 = scalar_lea.vmem %s5455_s29, %s5498_s24  ;;  %v4349_v0 = vmov (!%p3338_p5), 0.0  }
  0x15   : > { %s4477_s27 = scalar_lea.vmem %s5454_s26, %s3334_s2  ;;  %s4486_s1 = scalar_lea.vmem %s5440_s18, %s3334_s2  ;;  %653 = vst [vmem:[#allocation2] sm:$0xff] (!%p3338_p5), %v4349_v0  ;;  %654 = vst [vmem:[#allocation2 + $0x8] sm:$0xff] (!%p3338_p5), %v4349_v0 }
  0x16   : > { %652 = sbr.rel (%p3338_p5) target bundleno = 29 (0x1d), region = 96  ;;  %655 = vst [vmem:[#allocation2 + $0x10] sm:$0xff] (!%p3338_p5), %v4349_v0  ;;  %656 = vst [vmem:[#allocation2 + $0x18] sm:$0xff] (!%p3338_p5), %v4349_v0 }
  0x17   : > { %657 = vst [vmem:[#allocation2 + $0x20] sm:$0xff] (!%p3338_p5), %v4349_v0  ;;  %658 = vst [vmem:[#allocation2 + $0x28] sm:$0xff] (!%p3338_p5), %v4349_v0 }
  0x18   : > { %659 = vst [vmem:[#allocation2 + $0x30] sm:$0xff] (!%p3338_p5), %v4349_v0  ;;  %660 = vst [vmem:[#allocation2 + $0x38] sm:$0xff] (!%p3338_p5), %v4349_v0 }
  0x1d PF: > { %s5456_s3 = sld [smem:[#allocation11_spill]]  ;;  %vm5447_vm0 = vcmask 1043456   ;;  %v4225_v3 = vld [vmem:[%s4477_s27] sm:$0xff]   ;;  %vm904_vm1 = vcmask 195584   ;;  %v4226_v5 = vld [vmem:[%s4477_s27 + $0x8] sm:$0xff]   ;;  %v4227_v6 = vld [vmem:[%s4477_s27 + $0x10] sm:$0xff]  }
  0x1e   : > { %3915 = vmatprep.mubr.msk.bf16.mxu0 %vm904_vm1, %v4225_v3  ;;  %v4228_v7 = vld [vmem:[%s4477_s27 + $0x18] sm:$0xff]   ;;  %v4229_v8 = vld [vmem:[%s4477_s27 + $0x20] sm:$0xff]   ;;  %v4230_v9 = vld [vmem:[%s4477_s27 + $0x28] sm:$0xff]   ;;  %p3543_p6 = scmp.ne.s32.totalorder %s4466_s22, 2 }
  0x1f   : > { %v4231_v10 = vld [vmem:[%s4477_s27 + $0x30] sm:$0xff]   ;;  %v4232_v11 = vld [vmem:[%s4477_s27 + $0x38] sm:$0xff]   ;;  %v4233_v12 = vld [vmem:[%s4477_s27 + $0x40] sm:$0xff]   ;;  %s5489_s0 = sld [smem:[#allocation10_spill]] (!%p3543_p6) }
  0x20   : > { %v4257_v13 = vld [vmem:[%s5428_s6] sm:$0xff]   ;;  %v4258_v14 = vld [vmem:[%s5428_s6 + $0x8] sm:$0xff]   ;;  %v4259_v16 = vld [vmem:[%s5428_s6 + $0x10] sm:$0xff]  }
  0x21   : > { %3979 = vmatprep.subr.bf16.mxu1 %v4257_v13  ;;  %v4234_v15 = vld [vmem:[%s4477_s27 + $0x48] sm:$0xff]   ;;  %v4235_v17 = vld [vmem:[%s4477_s27 + $0x50] sm:$0xff]   ;;  %v4260_v18 = vld [vmem:[%s5428_s6 + $0x18] sm:$0xff]  }
  0x22   : > { %3980 = vmatpush3.bf16.msra.mxu1 %v4257_v13  ;;  %v4236_v19 = vld [vmem:[%s4477_s27 + $0x58] sm:$0xff]   ;;  %v4261_v20 = vld [vmem:[%s5428_s6 + $0x20] sm:$0xff]   ;;  %v4262_v22 = vld [vmem:[%s5428_s6 + $0x28] sm:$0xff]  }
  0x23   : > { %v4223_v1 = vld [vmem:[%s5456_s3] sm:$0xff]   ;;  %v4224_v2 = vld [vmem:[%s5456_s3 + $0x8] ss:$0 sps:$4 sm:$0xff]   ;;  %3981 = vmatprep.subr.bf16.mxu1 %v4258_v14  ;;  %v4239_v24 = vld [vmem:[%s4477_s27 + $0x70] sm:$0xff]  }
  0x24   : > { %3911 = vmatprep.subr.bf16.mxu0 %v4223_v1  ;;  %v1003_v4 = vsel %vm5447_vm0, %v4224_v2, 0  ;;  %v4237_v21 = vld [vmem:[%s4477_s27 + $0x60] sm:$0xff]   ;;  %v4238_v23 = vld [vmem:[%s4477_s27 + $0x68] sm:$0xff]   ;;  %v4240_v25 = vld [vmem:[%s4477_s27 + $0x78] sm:$0xff]  }
  0x25   : > { %3912 = vmatpush3.bf16.msra.mxu0 %v4223_v1  ;;  %v4241_v26 = vld [vmem:[%s4477_s27 + $0x80] sm:$0xff]   ;;  %v4242_v27 = vld [vmem:[%s4477_s27 + $0x88] sm:$0xff]   ;;  %v4243_v28 = vld [vmem:[%s4477_s27 + $0x90] sm:$0xff]  }
  0x26   : > { %4201 = vmatprep.subr.msk.bf16.mxu0 %vm5447_vm0, %v4224_v2  ;;  %3982 = vmatpush3.bf16.msra.mxu1 %v4258_v14  ;;  %v4244_v29 = vld [vmem:[%s4477_s27 + $0x98] sm:$0xff]   ;;  %v4245_v30 = vld [vmem:[%s4477_s27 + $0xa0] sm:$0xff]   ;;  %v4246_v31 = vld [vmem:[%s4477_s27 + $0xa8] sm:$0xff]  }
  0x27   : > { %3983 = vmatprep.subr.bf16.mxu1 %v4259_v16  ;;  %v4247_v32 = vld [vmem:[%s4477_s27 + $0xb0] sm:$0xff]   ;;  %v4248_v33 = vld [vmem:[%s4477_s27 + $0xb8] sm:$0xff]   ;;  %v4249_v35 = vld [vmem:[%s4477_s27 + $0xc0] sm:$0xff]  }
  0x28   : > { %v4263_v34 = vld [vmem:[%s5428_s6 + $0x30] sm:$0xff]   ;;  %v4264_v36 = vld [vmem:[%s5428_s6 + $0x38] sm:$0xff]   ;;  %v4250_v37 = vld [vmem:[%s4477_s27 + $0xc8] sm:$0xff]  }
  0x29   : > { %3914 = vmatpush3.bf16.msra.mxu0 %v1003_v4  ;;  %v4251_v38 = vld [vmem:[%s4477_s27 + $0xd0] sm:$0xff]   ;;  %v4252_v39 = vld [vmem:[%s4477_s27 + $0xd8] sm:$0xff]   ;;  %v4253_v40 = vld [vmem:[%s4477_s27 + $0xe0] sm:$0xff]  }
  0x2a   : > { %3984 = vmatpush3.bf16.msra.mxu1 %v4259_v16  ;;  %v4254_v41 = vld [vmem:[%s4477_s27 + $0xe8] sm:$0xff]   ;;  %v4255_v42 = vld [vmem:[%s4477_s27 + $0xf0] sm:$0xff]   ;;  %v4256_v43 = vld [vmem:[%s4477_s27 + $0xf8] sm:$0xff]  }
  0x2b   : > { %3985 = vmatprep.subr.bf16.mxu1 %v4260_v18  ;;  %v4588_v44 = vld [vmem:[%s5427_s5] ss:$0 sm:$0xff] }
  0x2c   : > { %3916 = vmatmul.mubr.msk.bf16.vlgmr.msra.gmra.mrb[0].mxu0 %vm904_vm1, %v4226_v5 }
  0x2d   : > { %3919 = vmatprep.mubr.msk.bf16.mxu0 %vm904_vm1, %v4227_v6 }
  0x2e   : > { %3986 = vmatpush3.bf16.msra.mxu1 %v4260_v18 }
  0x2f   : > { %3987 = vmatprep.subr.bf16.mxu1 %v4261_v20 }
  0x32   : > { %3988 = vmatpush3.bf16.msra.mxu1 %v4261_v20 }
  0x33   : > { %3989 = vmatprep.subr.bf16.mxu1 %v4262_v22 }
  0x34   : > { %3920 = vmatmul.mubr.msk.bf16.gmra.mrb[4].mxu0 %vm904_vm1, %v4228_v7 }
  0x35   : > { %3923 = vmatprep.mubr.msk.bf16.mxu0 %vm904_vm1, %v4229_v8 }
  0x36   : > { %3990 = vmatpush3.bf16.msra.mxu1 %v4262_v22 }
  0x37   : > { %3991 = vmatprep.subr.bf16.mxu1 %v4263_v34 }
  0x3a   : > { %3992 = vmatpush3.bf16.msra.mxu1 %v4263_v34 }
  0x3b   : > { %3993 = vmatprep.subr.bf16.mxu1 %v4264_v36 }
  0x3c   : > { %3924 = vmatmul.mubr.msk.bf16.gmra.mrb[8].mxu0 %vm904_vm1, %v4230_v9 }
  0x3d   : > { %3927 = vmatprep.mubr.msk.bf16.mxu0 %vm904_vm1, %v4231_v10 }
  0x3e   : > { %3994 = vmatpush3.bf16.msra.mxu1 %v4264_v36 }
  0x44   : > { %3928 = vmatmul.mubr.msk.bf16.gmra.mrb[12].mxu0 %vm904_vm1, %v4232_v11 }
  0x45   : > { %3931 = vmatprep.mubr.msk.bf16.mxu0 %vm904_vm1, %v4233_v12 }
  0x4c   : > { %3932 = vmatmul.mubr.msk.bf16.gmra.mrb[16].mxu0 %vm904_vm1, %v4234_v15 }
  0x4d   : > { %3935 = vmatprep.mubr.msk.bf16.mxu0 %vm904_vm1, %v4235_v17 }
  0x54   : > { %3936 = vmatmul.mubr.msk.bf16.gmra.mrb[20].mxu0 %vm904_vm1, %v4236_v19 }
  0x55   : > { %3939 = vmatprep.mubr.msk.bf16.mxu0 %vm904_vm1, %v4237_v21 }
  0x5c   : > { %3940 = vmatmul.mubr.msk.bf16.gmra.mrb[24].mxu0 %vm904_vm1, %v4238_v23 }
  0x5d   : > { %3943 = vmatprep.mubr.msk.bf16.mxu0 %vm904_vm1, %v4239_v24 }
  0x64   : > { %3944 = vmatmul.mubr.msk.bf16.gmra.mrb[28].mxu0 %vm904_vm1, %v4240_v25 }
  0x65   : > { %3947 = vmatprep.mubr.msk.bf16.mxu0 %vm904_vm1, %v4241_v26 }
  0x6c   : > { %3948 = vmatmul.mubr.msk.bf16.gmra.mrb[32].mxu0 %vm904_vm1, %v4242_v27 }
  0x6d   : > { %3951 = vmatprep.mubr.msk.bf16.mxu0 %vm904_vm1, %v4243_v28 }
  0x74   : > { %3952 = vmatmul.mubr.msk.bf16.gmra.mrb[36].mxu0 %vm904_vm1, %v4244_v29 }
  0x75   : > { %3955 = vmatprep.mubr.msk.bf16.mxu0 %vm904_vm1, %v4245_v30 }
  0x7c   : > { %3956 = vmatmul.mubr.msk.bf16.gmra.mrb[40].mxu0 %vm904_vm1, %v4246_v31 }
  0x7d   : > { %3959 = vmatprep.mubr.msk.bf16.mxu0 %vm904_vm1, %v4247_v32 }
  0x84   : > { %3960 = vmatmul.mubr.msk.bf16.gmra.mrb[44].mxu0 %vm904_vm1, %v4248_v33 }
  0x85   : > { %3963 = vmatprep.mubr.msk.bf16.mxu0 %vm904_vm1, %v4249_v35 }
  0x8c   : > { %3964 = vmatmul.mubr.msk.bf16.gmra.mrb[48].mxu0 %vm904_vm1, %v4250_v37 }
  0x8d   : > { %3967 = vmatprep.mubr.msk.bf16.mxu0 %vm904_vm1, %v4251_v38 }
  0x94   : > { %3968 = vmatmul.mubr.msk.bf16.gmra.mrb[52].mxu0 %vm904_vm1, %v4252_v39 }
  0x95   : > { %3971 = vmatprep.mubr.msk.bf16.mxu0 %vm904_vm1, %v4253_v40 }
  0x9c   : > { %3972 = vmatmul.mubr.msk.bf16.gmra.mrb[56].mxu0 %vm904_vm1, %v4254_v41 }
  0x9d   : > { %3975 = vmatprep.mubr.msk.bf16.mxu0 %vm904_vm1, %v4255_v42 }
  0xa4   : > { %3976 = vmatmul.mubr.msk.bf16.gmra.mrb[60].mxu0 %vm904_vm1, %v4256_v43 }
  0xff   : > { %v3917_v45 = vpop.f32.mrb[0].mxu0 }
 0x100   : > { %v1048_v46 = vadd.f32 %v3917_v45, %v4588_v44  ;;  %v1039_v47 = vpop.f32.mrb[1].mxu0 }
 0x101   : > { %v1040_v48 = vadd.f32 %v4588_v44, %v1039_v47  ;;  %v3918_v49 = vpop.f32.mrb[2].mxu0 }
 0x102   : > { %v1051_v50 = vadd.f32 %v3918_v49, %v4588_v44  ;;  %v1042_v51 = vpop.f32.mrb[3].mxu0  ;;  %v1296_v53 = vmax.f32 %v1048_v46, 0.0 }
 0x103   : > { %v1043_v52 = vadd.f32 %v4588_v44, %v1042_v51  ;;  %v1294_v55 = vmax.f32 %v1040_v48, 0.0 }
 0x104   : > { %v1297_v54 = vmax.f32 %v1051_v50, 0.0 }
 0x105   : > { %v1295_v56 = vmax.f32 %v1043_v52, 0.0 }
 0x106   : > { %v1359_v57 = vpack.c.bf16 %v1297_v54, %v1296_v53 }
 0x107   : > { %v3921_v58 = vpop.f32.mrb[4].mxu0  ;;  %v1358_v59 = vpack.c.bf16 %v1295_v56, %v1294_v55 }
 0x108   : > { %v1064_v60 = vadd.f32 %v3921_v58, %v4588_v44  ;;  %v1055_v61 = vpop.f32.mrb[5].mxu0 }
 0x109   : > { %v1056_v62 = vadd.f32 %v4588_v44, %v1055_v61  ;;  %v3922_v63 = vpop.f32.mrb[6].mxu0  ;;  %3995 = vmatprep.mubr.bf16.mxu1 %v1358_v59 }
 0x10a   : > { %v1067_v0 = vadd.f32 %v3922_v63, %v4588_v44  ;;  %v1058_v1 = vpop.f32.mrb[7].mxu0  ;;  %3996 = vmatmul.mubr.bf16.vlgmr.msra.gmra.mrb[0].mxu1 %v1359_v57  ;;  %v1300_v3 = vmax.f32 %v1064_v60, 0.0 }
 0x10b   : > { %v1059_v2 = vadd.f32 %v4588_v44, %v1058_v1  ;;  %v1298_v5 = vmax.f32 %v1056_v62, 0.0 }
 0x10c   : > { %v1301_v4 = vmax.f32 %v1067_v0, 0.0 }
 0x10d   : > { %v1299_v6 = vmax.f32 %v1059_v2, 0.0 }
 0x10e   : > { %v1361_v7 = vpack.c.bf16 %v1301_v4, %v1300_v3 }
 0x10f   : > { %v1360_v8 = vpack.c.bf16 %v1299_v6, %v1298_v5  ;;  %v3925_v9 = vpop.f32.mrb[8].mxu0 }
 0x110   : > { %v1080_v10 = vadd.f32 %v3925_v9, %v4588_v44  ;;  %v1071_v11 = vpop.f32.mrb[9].mxu0 }
 0x111   : > { %v1072_v12 = vadd.f32 %v4588_v44, %v1071_v11  ;;  %v3926_v13 = vpop.f32.mrb[10].mxu0  ;;  %3999 = vmatprep.mubr.bf16.mxu1 %v1360_v8 }
 0x112   : > { %v1083_v14 = vadd.f32 %v3926_v13, %v4588_v44  ;;  %v1074_v15 = vpop.f32.mrb[11].mxu0  ;;  %4000 = vmatmul.mubr.bf16.gmra.mrb[4].mxu1 %v1361_v7  ;;  %v1304_v17 = vmax.f32 %v1080_v10, 0.0 }
 0x113   : > { %v1075_v16 = vadd.f32 %v4588_v44, %v1074_v15  ;;  %v1302_v19 = vmax.f32 %v1072_v12, 0.0 }
 0x114   : > { %v1305_v18 = vmax.f32 %v1083_v14, 0.0 }
 0x115   : > { %v1303_v20 = vmax.f32 %v1075_v16, 0.0 }
 0x116   : > { %v1363_v21 = vpack.c.bf16 %v1305_v18, %v1304_v17 }
 0x117   : > { %v1362_v22 = vpack.c.bf16 %v1303_v20, %v1302_v19  ;;  %v3929_v23 = vpop.f32.mrb[12].mxu0 }
 0x118   : > { %v1096_v24 = vadd.f32 %v3929_v23, %v4588_v44  ;;  %v1087_v25 = vpop.f32.mrb[13].mxu0 }
 0x119   : > { %v1088_v26 = vadd.f32 %v4588_v44, %v1087_v25  ;;  %v3930_v27 = vpop.f32.mrb[14].mxu0  ;;  %4003 = vmatprep.mubr.bf16.mxu1 %v1362_v22 }
 0x11a   : > { %v1099_v28 = vadd.f32 %v3930_v27, %v4588_v44  ;;  %v1090_v29 = vpop.f32.mrb[15].mxu0  ;;  %4004 = vmatmul.mubr.bf16.gmra.mrb[8].mxu1 %v1363_v21  ;;  %v1308_v31 = vmax.f32 %v1096_v24, 0.0 }
 0x11b   : > { %v1091_v30 = vadd.f32 %v4588_v44, %v1090_v29  ;;  %v1306_v33 = vmax.f32 %v1088_v26, 0.0 }
 0x11c   : > { %v1309_v32 = vmax.f32 %v1099_v28, 0.0 }
 0x11d   : > { %v1307_v34 = vmax.f32 %v1091_v30, 0.0 }
 0x11e   : > { %v1365_v35 = vpack.c.bf16 %v1309_v32, %v1308_v31 }
 0x11f   : > { %v1364_v36 = vpack.c.bf16 %v1307_v34, %v1306_v33  ;;  %v3933_v37 = vpop.f32.mrb[16].mxu0 }
 0x120   : > { %v1112_v38 = vadd.f32 %v3933_v37, %v4588_v44  ;;  %v1103_v39 = vpop.f32.mrb[17].mxu0 }
 0x121   : > { %v1104_v40 = vadd.f32 %v4588_v44, %v1103_v39  ;;  %v3934_v41 = vpop.f32.mrb[18].mxu0  ;;  %4007 = vmatprep.mubr.bf16.mxu1 %v1364_v36 }
 0x122   : > { %v1115_v42 = vadd.f32 %v3934_v41, %v4588_v44  ;;  %v1106_v43 = vpop.f32.mrb[19].mxu0  ;;  %4008 = vmatmul.mubr.bf16.gmra.mrb[12].mxu1 %v1365_v35  ;;  %v1312_v46 = vmax.f32 %v1112_v38, 0.0 }
 0x123   : > { %v1107_v45 = vadd.f32 %v4588_v44, %v1106_v43  ;;  %v1310_v48 = vmax.f32 %v1104_v40, 0.0 }
 0x124   : > { %v1313_v47 = vmax.f32 %v1115_v42, 0.0 }
 0x125   : > { %v1311_v49 = vmax.f32 %v1107_v45, 0.0 }
 0x126   : > { %v1367_v50 = vpack.c.bf16 %v1313_v47, %v1312_v46 }
 0x127   : > { %v1366_v51 = vpack.c.bf16 %v1311_v49, %v1310_v48  ;;  %v3937_v52 = vpop.f32.mrb[20].mxu0 }
 0x128   : > { %v1128_v53 = vadd.f32 %v3937_v52, %v4588_v44  ;;  %v1119_v54 = vpop.f32.mrb[21].mxu0 }
 0x129   : > { %v1120_v55 = vadd.f32 %v4588_v44, %v1119_v54  ;;  %v3938_v56 = vpop.f32.mrb[22].mxu0  ;;  %4011 = vmatprep.mubr.bf16.mxu1 %v1366_v51 }
 0x12a   : > { %v1131_v57 = vadd.f32 %v3938_v56, %v4588_v44  ;;  %v1122_v58 = vpop.f32.mrb[23].mxu0  ;;  %4012 = vmatmul.mubr.bf16.gmra.mrb[16].mxu1 %v1367_v50  ;;  %v1316_v60 = vmax.f32 %v1128_v53, 0.0 }
 0x12b   : > { %v1123_v59 = vadd.f32 %v4588_v44, %v1122_v58  ;;  %v1314_v62 = vmax.f32 %v1120_v55, 0.0 }
 0x12c   : > { %v1317_v61 = vmax.f32 %v1131_v57, 0.0 }
 0x12d   : > { %v1315_v63 = vmax.f32 %v1123_v59, 0.0 }
 0x12e   : > { %v1369_v0 = vpack.c.bf16 %v1317_v61, %v1316_v60 }
 0x12f   : > { %v1368_v1 = vpack.c.bf16 %v1315_v63, %v1314_v62  ;;  %v3941_v2 = vpop.f32.mrb[24].mxu0 }
 0x130   : > { %v1144_v3 = vadd.f32 %v3941_v2, %v4588_v44  ;;  %v1135_v4 = vpop.f32.mrb[25].mxu0 }
 0x131   : > { %v1136_v5 = vadd.f32 %v4588_v44, %v1135_v4  ;;  %v3942_v6 = vpop.f32.mrb[26].mxu0  ;;  %4015 = vmatprep.mubr.bf16.mxu1 %v1368_v1 }
 0x132   : > { %v1147_v7 = vadd.f32 %v3942_v6, %v4588_v44  ;;  %v1138_v8 = vpop.f32.mrb[27].mxu0  ;;  %4016 = vmatmul.mubr.bf16.gmra.mrb[20].mxu1 %v1369_v0  ;;  %v1320_v10 = vmax.f32 %v1144_v3, 0.0 }
 0x133   : > { %v1139_v9 = vadd.f32 %v4588_v44, %v1138_v8  ;;  %v1318_v12 = vmax.f32 %v1136_v5, 0.0 }
 0x134   : > { %v1321_v11 = vmax.f32 %v1147_v7, 0.0 }
 0x135   : > { %v1319_v13 = vmax.f32 %v1139_v9, 0.0 }
 0x136   : > { %v1371_v14 = vpack.c.bf16 %v1321_v11, %v1320_v10 }
 0x137   : > { %v1370_v15 = vpack.c.bf16 %v1319_v13, %v1318_v12  ;;  %v3945_v16 = vpop.f32.mrb[28].mxu0 }
 0x138   : > { %v1160_v17 = vadd.f32 %v3945_v16, %v4588_v44  ;;  %v1151_v18 = vpop.f32.mrb[29].mxu0 }
 0x139   : > { %v1152_v19 = vadd.f32 %v4588_v44, %v1151_v18  ;;  %v3946_v20 = vpop.f32.mrb[30].mxu0  ;;  %4019 = vmatprep.mubr.bf16.mxu1 %v1370_v15 }
 0x13a   : > { %v1163_v21 = vadd.f32 %v3946_v20, %v4588_v44  ;;  %v1154_v22 = vpop.f32.mrb[31].mxu0  ;;  %4020 = vmatmul.mubr.bf16.gmra.mrb[24].mxu1 %v1371_v14  ;;  %v1324_v24 = vmax.f32 %v1160_v17, 0.0 }
 0x13b   : > { %v1155_v23 = vadd.f32 %v4588_v44, %v1154_v22  ;;  %v1322_v26 = vmax.f32 %v1152_v19, 0.0 }
 0x13c   : > { %v1325_v25 = vmax.f32 %v1163_v21, 0.0 }
 0x13d   : > { %v1323_v27 = vmax.f32 %v1155_v23, 0.0 }
 0x13e   : > { %v1373_v28 = vpack.c.bf16 %v1325_v25, %v1324_v24 }
 0x13f   : > { %v1372_v29 = vpack.c.bf16 %v1323_v27, %v1322_v26  ;;  %v3949_v30 = vpop.f32.mrb[32].mxu0 }
 0x140   : > { %v1176_v31 = vadd.f32 %v3949_v30, %v4588_v44  ;;  %v1167_v32 = vpop.f32.mrb[33].mxu0 }
 0x141   : > { %v1168_v33 = vadd.f32 %v4588_v44, %v1167_v32  ;;  %v3950_v34 = vpop.f32.mrb[34].mxu0  ;;  %4023 = vmatprep.mubr.bf16.mxu1 %v1372_v29 }
 0x142   : > { %v1179_v35 = vadd.f32 %v3950_v34, %v4588_v44  ;;  %v1170_v36 = vpop.f32.mrb[35].mxu0  ;;  %4024 = vmatmul.mubr.bf16.gmra.mrb[28].mxu1 %v1373_v28  ;;  %v1328_v38 = vmax.f32 %v1176_v31, 0.0 }
 0x143   : > { %v1171_v37 = vadd.f32 %v4588_v44, %v1170_v36  ;;  %v1326_v40 = vmax.f32 %v1168_v33, 0.0 }
 0x144   : > { %v1329_v39 = vmax.f32 %v1179_v35, 0.0 }
 0x145   : > { %v1327_v41 = vmax.f32 %v1171_v37, 0.0 }
 0x146   : > { %v1375_v42 = vpack.c.bf16 %v1329_v39, %v1328_v38 }
 0x147   : > { %v1374_v43 = vpack.c.bf16 %v1327_v41, %v1326_v40  ;;  %v3953_v45 = vpop.f32.mrb[36].mxu0 }
 0x148   : > { %v1192_v46 = vadd.f32 %v3953_v45, %v4588_v44  ;;  %v1183_v47 = vpop.f32.mrb[37].mxu0 }
 0x149   : > { %v1184_v48 = vadd.f32 %v4588_v44, %v1183_v47  ;;  %v3954_v49 = vpop.f32.mrb[38].mxu0  ;;  %4027 = vmatprep.mubr.bf16.mxu1 %v1374_v43 }
 0x14a   : > { %v1195_v50 = vadd.f32 %v3954_v49, %v4588_v44  ;;  %v1186_v51 = vpop.f32.mrb[39].mxu0  ;;  %4028 = vmatmul.mubr.bf16.gmra.mrb[32].mxu1 %v1375_v42  ;;  %v1332_v53 = vmax.f32 %v1192_v46, 0.0 }
 0x14b   : > { %v1187_v52 = vadd.f32 %v4588_v44, %v1186_v51  ;;  %v1330_v55 = vmax.f32 %v1184_v48, 0.0 }
 0x14c   : > { %v1333_v54 = vmax.f32 %v1195_v50, 0.0 }
 0x14d   : > { %v1331_v56 = vmax.f32 %v1187_v52, 0.0 }
 0x14e   : > { %v1377_v57 = vpack.c.bf16 %v1333_v54, %v1332_v53 }
 0x14f   : > { %v1376_v58 = vpack.c.bf16 %v1331_v56, %v1330_v55  ;;  %v3957_v59 = vpop.f32.mrb[40].mxu0 }
 0x150   : > { %v1208_v60 = vadd.f32 %v3957_v59, %v4588_v44  ;;  %v1199_v61 = vpop.f32.mrb[41].mxu0 }
 0x151   : > { %v1200_v62 = vadd.f32 %v4588_v44, %v1199_v61  ;;  %v3958_v63 = vpop.f32.mrb[42].mxu0  ;;  %4031 = vmatprep.mubr.bf16.mxu1 %v1376_v58 }
 0x152   : > { %v1211_v0 = vadd.f32 %v3958_v63, %v4588_v44  ;;  %v1202_v1 = vpop.f32.mrb[43].mxu0  ;;  %4032 = vmatmul.mubr.bf16.gmra.mrb[36].mxu1 %v1377_v57  ;;  %v1336_v3 = vmax.f32 %v1208_v60, 0.0 }
 0x153   : > { %v1203_v2 = vadd.f32 %v4588_v44, %v1202_v1  ;;  %v1334_v5 = vmax.f32 %v1200_v62, 0.0 }
 0x154   : > { %v1337_v4 = vmax.f32 %v1211_v0, 0.0 }
 0x155   : > { %v1335_v6 = vmax.f32 %v1203_v2, 0.0 }
 0x156   : > { %v1379_v7 = vpack.c.bf16 %v1337_v4, %v1336_v3 }
 0x157   : > { %v1378_v8 = vpack.c.bf16 %v1335_v6, %v1334_v5  ;;  %v3961_v9 = vpop.f32.mrb[44].mxu0 }
 0x158   : > { %v1224_v10 = vadd.f32 %v3961_v9, %v4588_v44  ;;  %v1215_v11 = vpop.f32.mrb[45].mxu0 }
 0x159   : > { %v1216_v12 = vadd.f32 %v4588_v44, %v1215_v11  ;;  %v3962_v13 = vpop.f32.mrb[46].mxu0  ;;  %4035 = vmatprep.mubr.bf16.mxu1 %v1378_v8 }
 0x15a   : > { %v1227_v14 = vadd.f32 %v3962_v13, %v4588_v44  ;;  %v1218_v15 = vpop.f32.mrb[47].mxu0  ;;  %4036 = vmatmul.mubr.bf16.gmra.mrb[40].mxu1 %v1379_v7  ;;  %v1340_v17 = vmax.f32 %v1224_v10, 0.0 }
 0x15b   : > { %v1219_v16 = vadd.f32 %v4588_v44, %v1218_v15  ;;  %v1338_v19 = vmax.f32 %v1216_v12, 0.0 }
 0x15c   : > { %v1341_v18 = vmax.f32 %v1227_v14, 0.0 }
 0x15d   : > { %v1339_v20 = vmax.f32 %v1219_v16, 0.0  ;;  %v2071_v16 = vlaneseq }
 0x15e   : > { %v1381_v21 = vpack.c.bf16 %v1341_v18, %v1340_v17 }
 0x15f   : > { %v1380_v22 = vpack.c.bf16 %v1339_v20, %v1338_v19  ;;  %v3965_v23 = vpop.f32.mrb[48].mxu0  ;;  %v4654_v17 = vshrl.u32 %v2071_v16, 7  ;;  %v2080_v19 = vld [vmem:[%s640_s30] sm:$0xf] }
 0x160   : > { %v1240_v24 = vadd.f32 %v3965_v23, %v4588_v44  ;;  %v1231_v25 = vpop.f32.mrb[49].mxu0  ;;  %v4350_v23 = vmov 1.0|1.0  }
 0x161   : > { %v1232_v26 = vadd.f32 %v4588_v44, %v1231_v25  ;;  %v3966_v27 = vpop.f32.mrb[50].mxu0  ;;  %4039 = vmatprep.mubr.bf16.mxu1 %v1380_v22  ;;  %v2087_v18 = vsub.s32 1, %v4654_v17  ;;  %v4664_v20 = vadd.s32 8, %v4654_v17  ;;  %v4676_v25 = vadd.s32 16, %v4654_v17 }
 0x162   : > { %v1243_v28 = vadd.f32 %v3966_v27, %v4588_v44  ;;  %v1234_v29 = vpop.f32.mrb[51].mxu0  ;;  %4040 = vmatmul.mubr.bf16.gmra.mrb[44].mxu1 %v1381_v21  ;;  %v1344_v31 = vmax.f32 %v1240_v24, 0.0 }
 0x163   : > { %v1235_v30 = vadd.f32 %v4588_v44, %v1234_v29  ;;  %v1342_v33 = vmax.f32 %v1232_v26, 0.0  ;;  %v2088_v21 = vrot.slane %v2080_v19, %v2087_v18  ;;  %v4679_v26 = vadd.s32 24, %v4654_v17 }
 0x164   : > { %v1345_v32 = vmax.f32 %v1243_v28, 0.0  ;;  %v4694_v29 = vadd.s32 32, %v4654_v17 }
 0x165   : > { %v1343_v34 = vmax.f32 %v1235_v30, 0.0  ;;  %vm2098_vm2 = vcmp.eq.s32.totalorder %v4654_v17, %v2088_v21  ;;  %vm2102_vm3 = vcmp.eq.s32.totalorder %v4664_v20, %v2088_v21  ;;  %vm2106_vm8 = vcmp.eq.s32.totalorder %v4676_v25, %v2088_v21 }
 0x166   : > { %v1383_v35 = vpack.c.bf16 %v1345_v32, %v1344_v31  ;;  %vm3511_vm4 = vmpackc.low %vm2102_vm3, %vm2098_vm2  ;;  %vm2110_vm9 = vcmp.eq.s32.totalorder %v4679_v26, %v2088_v21  ;;  %v4697_v30 = vadd.s32 40, %v4654_v17  ;;  %vm2114_vm14 = vcmp.eq.s32.totalorder %v4694_v29, %v2088_v21 }
 0x167   : > { %v1382_v36 = vpack.c.bf16 %v1343_v34, %v1342_v33  ;;  %v3969_v37 = vpop.f32.mrb[52].mxu0  ;;  %3512 = vmatprep.mubr.msk.bf16.mxu0 %vm3511_vm4, %v4350_v23  ;;  %vm4683_vm10 = vmpackc.low %vm2110_vm9, %vm2106_vm8  ;;  %v4712_v33 = vadd.s32 48, %v4654_v17  ;;  %v4715_v34 = vadd.s32 56, %v4654_v17 }
 0x168   : > { %v1256_v38 = vadd.f32 %v3969_v37, %v4588_v44  ;;  %v1247_v39 = vpop.f32.mrb[53].mxu0  ;;  %vm2118_vm15 = vcmp.eq.s32.totalorder %v4697_v30, %v2088_v21  ;;  %v5470_v37 = vmov 0 }
 0x169   : > { %v1248_v40 = vadd.f32 %v4588_v44, %v1247_v39  ;;  %v3970_v41 = vpop.f32.mrb[54].mxu0  ;;  %4043 = vmatprep.mubr.bf16.mxu1 %v1382_v36  ;;  %vm4701_vm1 = vmpackc.low %vm2118_vm15, %vm2114_vm14  ;;  %v5468_v36 = vmov 0  ;;  %vm2006_vm14 = vcmask 3072  }
 0x16a   : > { %v1259_v42 = vadd.f32 %v3970_v41, %v4588_v44  ;;  %v1250_v43 = vpop.f32.mrb[55].mxu0  ;;  %4044 = vmatmul.mubr.bf16.gmra.mrb[48].mxu1 %v1383_v35  ;;  %v1348_v46 = vmax.f32 %v1256_v38, 0.0  ;;  %v4722_v35 = vld [vmem:[%s5429_s7] ss:$0 sm:$0xff]  ;;  %v2095_v41 = vsub.s32 3, %v4654_v17 }
 0x16b   : > { %v1251_v45 = vadd.f32 %v4588_v44, %v1250_v43  ;;  %v1346_v48 = vmax.f32 %v1248_v40, 0.0 }
 0x16c   : > { %v1349_v47 = vmax.f32 %v1259_v42, 0.0 }
 0x16d   : > { %v1347_v49 = vmax.f32 %v1251_v45, 0.0  ;;  %v2091_v45 = vsub.s32 2, %v4654_v17 }
 0x16e   : > { %v1385_v50 = vpack.c.bf16 %v1349_v47, %v1348_v46 }
 0x16f   : > { %v1384_v51 = vpack.c.bf16 %v1347_v49, %v1346_v48  ;;  %v3973_v52 = vpop.f32.mrb[56].mxu0  ;;  %v2096_v49 = vrot.slane %v2080_v19, %v2095_v41 }
 0x170   : > { %v1272_v53 = vadd.f32 %v3973_v52, %v4588_v44  ;;  %v1263_v54 = vpop.f32.mrb[57].mxu0  ;;  %v2092_v52 = vrot.slane %v2080_v19, %v2091_v45 }
 0x171   : > { %v1264_v55 = vadd.f32 %v4588_v44, %v1263_v54  ;;  %v3974_v56 = vpop.f32.mrb[58].mxu0  ;;  %4047 = vmatprep.mubr.bf16.mxu1 %v1384_v51  ;;  %vm2100_vm15 = vcmp.eq.s32.totalorder %v4654_v17, %v2096_v49  ;;  %vm2112_vm0 = vcmp.eq.s32.totalorder %v4679_v26, %v2096_v49 }
 0x172   : > { %v1275_v57 = vadd.f32 %v3974_v56, %v4588_v44  ;;  %v1266_v58 = vpop.f32.mrb[59].mxu0  ;;  %4048 = vmatmul.mubr.bf16.gmra.mrb[52].mxu1 %v1385_v50  ;;  %v1352_v60 = vmax.f32 %v1272_v53, 0.0 }
 0x173   : > { %v1267_v59 = vadd.f32 %v4588_v44, %v1266_v58  ;;  %v1350_v62 = vmax.f32 %v1264_v55, 0.0 }
 0x174   : > { %v1353_v61 = vmax.f32 %v1275_v57, 0.0  ;;  %v5472_v57 = vmov 0 }
 0x175   : > { %v1351_v63 = vmax.f32 %v1267_v59, 0.0 }
 0x176   : > { %v1387_v0 = vpack.c.bf16 %v1353_v61, %v1352_v60 }
 0x177   : > { %v1386_v1 = vpack.c.bf16 %v1351_v63, %v1350_v62  ;;  %v3977_v2 = vpop.f32.mrb[60].mxu0 }
 0x178   : > { %v1288_v3 = vadd.f32 %v3977_v2, %v4588_v44  ;;  %v1279_v4 = vpop.f32.mrb[61].mxu0 }
 0x179   : > { %v1280_v5 = vadd.f32 %v4588_v44, %v1279_v4  ;;  %v3978_v6 = vpop.f32.mrb[62].mxu0  ;;  %4051 = vmatprep.mubr.bf16.mxu1 %v1386_v1 }
 0x17a   : > { %v1291_v7 = vadd.f32 %v3978_v6, %v4588_v44  ;;  %v1282_v8 = vpop.f32.mrb[63].mxu0  ;;  %4052 = vmatmul.mubr.bf16.gmra.mrb[56].mxu1 %v1387_v0  ;;  %v1356_v10 = vmax.f32 %v1288_v3, 0.0 }
 0x17b   : > { %v1283_v9 = vadd.f32 %v4588_v44, %v1282_v8  ;;  %v1354_v12 = vmax.f32 %v1280_v5, 0.0  ;;  %v2083_v44 = vsub.s32 0, %v4654_v17 }
 0x17c   : > { %v1357_v11 = vmax.f32 %v1291_v7, 0.0 }
 0x17d   : > { %v1355_v13 = vmax.f32 %v1283_v9, 0.0  ;;  %v2084_v22 = vrot.slane %v2080_v19, %v2083_v44 }
 0x17e   : > { %v1389_v14 = vpack.c.bf16 %v1357_v11, %v1356_v10 }
 0x17f   : > { %v1388_v15 = vpack.c.bf16 %v1355_v13, %v1354_v12  ;;  %vm2097_vm5 = vcmp.eq.s32.totalorder %v4654_v17, %v2084_v22  ;;  %vm2101_vm6 = vcmp.eq.s32.totalorder %v4664_v20, %v2084_v22  ;;  %vm2105_vm11 = vcmp.eq.s32.totalorder %v4676_v25, %v2084_v22 }
 0x180   : > { %vm4671_vm7 = vmpackc.low %vm2101_vm6, %vm2097_vm5  ;;  %vm2109_vm12 = vcmp.eq.s32.totalorder %v4679_v26, %v2084_v22  ;;  %vm2113_vm2 = vcmp.eq.s32.totalorder %v4694_v29, %v2084_v22  ;;  %vm2117_vm3 = vcmp.eq.s32.totalorder %v4697_v30, %v2084_v22  ;;  %vm2122_vm5 = vcmp.eq.s32.totalorder %v4712_v33, %v2088_v21 }
 0x181   : > { %4055 = vmatprep.mubr.bf16.mxu1 %v1388_v15  ;;  %vm4689_vm13 = vmpackc.low %vm2109_vm12, %vm2105_vm11  ;;  %vm2126_vm6 = vcmp.eq.s32.totalorder %v4715_v34, %v2088_v21  ;;  %vm2121_vm9 = vcmp.eq.s32.totalorder %v4712_v33, %v2084_v22  ;;  %vm2125_vm11 = vcmp.eq.s32.totalorder %v4715_v34, %v2084_v22 }
 0x182   : > { %4056 = vmatmul.mubr.bf16.gmra.mrb[60].mxu1 %v1389_v14  ;;  %vm4707_vm4 = vmpackc.low %vm2117_vm3, %vm2113_vm2  ;;  %vm2104_vm2 = vcmp.eq.s32.totalorder %v4664_v20, %v2096_v49 }
 0x183   : > { %vm4724_vm8 = vmpackc.low %vm2126_vm6, %vm2122_vm5  ;;  %vm2099_vm5 = vcmp.eq.s32.totalorder %v4654_v17, %v2092_v52  ;;  %vm2103_vm6 = vcmp.eq.s32.totalorder %v4664_v20, %v2092_v52 }
 0x184   : > { %v5469_v36 = vsel %vm4724_vm8, 4294967295, %v5468_v36  ;;  %vm4730_vm12 = vmpackc.low %vm2125_vm11, %vm2121_vm9  ;;  %vm2108_vm11 = vcmp.eq.s32.totalorder %v4676_v25, %v2096_v49  ;;  %vm2120_vm8 = vcmp.eq.s32.totalorder %v4697_v30, %v2096_v49 }
 0x185   : > { %v5471_v37 = vsel %vm4730_vm12, 4294967295, %v5470_v37  ;;  %vm4766_vm3 = vmpackc.low %vm2104_vm2, %vm2100_vm15  ;;  %vm2107_vm12 = vcmp.eq.s32.totalorder %v4676_v25, %v2092_v52  ;;  %vm2111_vm15 = vcmp.eq.s32.totalorder %v4679_v26, %v2092_v52 }
 0x186   : > { %v5473_v57 = vsel %vm4766_vm3, 4294967295, %v5472_v57  ;;  %vm4774_vm9 = vmpackc.low %vm2103_vm6, %vm2099_vm5  ;;  %vm2116_vm3 = vcmp.eq.s32.totalorder %v4694_v29, %v2096_v49  ;;  %vm2115_vm6 = vcmp.eq.s32.totalorder %v4694_v29, %v2092_v52 }
 0x187   : > { %vm3531_vm2 = vmpackc.low %vm2112_vm0, %vm2108_vm11  ;;  %vm2119_vm0 = vcmp.eq.s32.totalorder %v4697_v30, %v2092_v52 }
 0x188   : > { %3532 = vmatprep.mubr.msk.bf16.mxu1 %vm3531_vm2, %v4350_v23  ;;  %vm4790_vm5 = vmpackc.low %vm2111_vm15, %vm2107_vm12  ;;  %vm2123_vm2 = vcmp.eq.s32.totalorder %v4712_v33, %v2092_v52 }
 0x189   : > { %vm4799_vm11 = vmpackc.low %vm2120_vm8, %vm2116_vm3  ;;  %vm2124_vm8 = vcmp.eq.s32.totalorder %v4712_v33, %v2096_v49  ;;  %vm2128_vm3 = vcmp.eq.s32.totalorder %v4715_v34, %v2096_v49 }
 0x18a   : > { %vm4808_vm12 = vmpackc.low %vm2119_vm0, %vm2115_vm6  ;;  %vm2127_vm6 = vcmp.eq.s32.totalorder %v4715_v34, %v2092_v52 }
 0x18b   : > { %vm4838_vm15 = vmpackc.low %vm2128_vm3, %vm2124_vm8 }
 0x18c   : > { %vm4847_vm0 = vmpackc.low %vm2127_vm6, %vm2123_vm2 }
 0x1dd   : > { %v3997_v38 = vpop.f32.mrb[0].mxu1 }
 0x1de   : > { %v4735_v39 = vadd.f32 %v3997_v38, %v4722_v35  ;;  %v1495_v40 = vpop.f32.mrb[1].mxu1 }
 0x1df   : > { %v4739_v42 = vadd.f32 %v4722_v35, %v1495_v40  ;;  %v3998_v43 = vpop.f32.mrb[2].mxu1 }
 0x1e0   : > { %v3608_v46 = vpack.c.bf16 %v4735_v39, %v4735_v39  ;;  %v4745_v47 = vadd.f32 %v3998_v43, %v4722_v35  ;;  %v1498_v48 = vpop.f32.mrb[3].mxu1 }
 0x1e1   : > { %v3606_v50 = vpack.c.bf16 %v4739_v42, %v4739_v42  ;;  %v4750_v51 = vadd.f32 %v4722_v35, %v1498_v48 }
 0x1e2   : > { %2009 = vst.msk [vmem:[%s4486_s1 + $0x8] sm:$0xf] %vm2006_vm14, %v3608_v46  ;;  %v1751_v53 = vpack.c.bf16 %v4745_v47, %v4735_v39  ;;  %v3609_v54 = vpack.c.bf16 %v4745_v47, %v4745_v47 }
 0x1e3   : > { %2007 = vst.msk [vmem:[%s4486_s1] sm:$0xf] %vm2006_vm14, %v3606_v50  ;;  %v1750_v55 = vpack.c.bf16 %v4750_v51, %v4739_v42  ;;  %v3607_v56 = vpack.c.bf16 %v4750_v51, %v4750_v51 }
 0x1e4   : > { %2010 = vst.msk [vmem:[%s4486_s1 + $0xc] sm:$0xf] %vm2006_vm14, %v3609_v54 }
 0x1e5   : > { %2008 = vst.msk [vmem:[%s4486_s1 + $0x4] sm:$0xf] %vm2006_vm14, %v3607_v56  ;;  %v4001_v59 = vpop.f32.mrb[4].mxu1 }
 0x1e6   : > { %v4787_v60 = vadd.f32 %v4001_v59, %v4722_v35  ;;  %v1511_v61 = vpop.f32.mrb[5].mxu1 }
 0x1e7   : > { %v4797_v63 = vadd.f32 %v4722_v35, %v1511_v61  ;;  %v4002_v0 = vpop.f32.mrb[6].mxu1 }
 0x1e8   : > { %v3612_v2 = vpack.c.bf16 %v4787_v60, %v4787_v60  ;;  %v4806_v3 = vadd.f32 %v4002_v0, %v4722_v35  ;;  %v1514_v4 = vpop.f32.mrb[7].mxu1 }
 0x1e9   : > { %v3610_v6 = vpack.c.bf16 %v4797_v63, %v4797_v63  ;;  %v4815_v7 = vadd.f32 %v4722_v35, %v1514_v4 }
 0x1ea   : > { %2013 = vst.msk [vmem:[%s4486_s1 + $0x18] sm:$0xf] %vm2006_vm14, %v3612_v2  ;;  %v1753_v8 = vpack.c.bf16 %v4806_v3, %v4787_v60  ;;  %v3613_v9 = vpack.c.bf16 %v4806_v3, %v4806_v3 }
 0x1eb   : > { %2011 = vst.msk [vmem:[%s4486_s1 + $0x10] sm:$0xf] %vm2006_vm14, %v3610_v6  ;;  %v1752_v10 = vpack.c.bf16 %v4815_v7, %v4797_v63  ;;  %v3611_v11 = vpack.c.bf16 %v4815_v7, %v4815_v7 }
 0x1ec   : > { %2014 = vst.msk [vmem:[%s4486_s1 + $0x1c] sm:$0xf] %vm2006_vm14, %v3613_v9 }
 0x1ed   : > { %2012 = vst.msk [vmem:[%s4486_s1 + $0x14] sm:$0xf] %vm2006_vm14, %v3611_v11  ;;  %v4005_v12 = vpop.f32.mrb[8].mxu1 }
 0x1ee   : > { %v4836_v13 = vadd.f32 %v4005_v12, %v4722_v35  ;;  %v1527_v14 = vpop.f32.mrb[9].mxu1 }
 0x1ef   : > { %v4845_v16 = vadd.f32 %v4722_v35, %v1527_v14  ;;  %v4006_v17 = vpop.f32.mrb[10].mxu1 }
 0x1f0   : > { %v3616_v19 = vpack.c.bf16 %v4836_v13, %v4836_v13  ;;  %v4854_v44 = vadd.f32 %v4006_v17, %v4722_v35  ;;  %v1530_v20 = vpop.f32.mrb[11].mxu1 }
 0x1f1   : > { %v3614_v21 = vpack.c.bf16 %v4845_v16, %v4845_v16  ;;  %v4859_v22 = vadd.f32 %v4722_v35, %v1530_v20 }
 0x1f2   : > { %2017 = vst.msk [vmem:[%s4486_s1 + $0x28] sm:$0xf] %vm2006_vm14, %v3616_v19  ;;  %v1755_v25 = vpack.c.bf16 %v4854_v44, %v4836_v13  ;;  %v3617_v26 = vpack.c.bf16 %v4854_v44, %v4854_v44 }
 0x1f3   : > { %2015 = vst.msk [vmem:[%s4486_s1 + $0x20] sm:$0xf] %vm2006_vm14, %v3614_v21  ;;  %v1754_v29 = vpack.c.bf16 %v4859_v22, %v4845_v16  ;;  %v3615_v30 = vpack.c.bf16 %v4859_v22, %v4859_v22 }
 0x1f4   : > { %2018 = vst.msk [vmem:[%s4486_s1 + $0x2c] sm:$0xf] %vm2006_vm14, %v3617_v26 }
 0x1f5   : > { %2016 = vst.msk [vmem:[%s4486_s1 + $0x24] sm:$0xf] %vm2006_vm14, %v3615_v30  ;;  %v4009_v33 = vpop.f32.mrb[12].mxu1 }
 0x1f6   : > { %v4878_v34 = vadd.f32 %v4009_v33, %v4722_v35  ;;  %v1543_v38 = vpop.f32.mrb[13].mxu1 }
 0x1f7   : > { %v4881_v40 = vadd.f32 %v4722_v35, %v1543_v38  ;;  %v4010_v41 = vpop.f32.mrb[14].mxu1 }
 0x1f8   : > { %v3620_v43 = vpack.c.bf16 %v4878_v34, %v4878_v34  ;;  %v4886_v45 = vadd.f32 %v4010_v41, %v4722_v35  ;;  %v1546_v46 = vpop.f32.mrb[15].mxu1 }
 0x1f9   : > { %v3618_v48 = vpack.c.bf16 %v4881_v40, %v4881_v40  ;;  %v4891_v49 = vadd.f32 %v4722_v35, %v1546_v46 }
 0x1fa   : > { %2021 = vst.msk [vmem:[%s4486_s1 + $0x38] sm:$0xf] %vm2006_vm14, %v3620_v43  ;;  %v1757_v50 = vpack.c.bf16 %v4886_v45, %v4878_v34  ;;  %v3621_v52 = vpack.c.bf16 %v4886_v45, %v4886_v45 }
 0x1fb   : > { %2019 = vst.msk [vmem:[%s4486_s1 + $0x30] sm:$0xf] %vm2006_vm14, %v3618_v48  ;;  %v1756_v54 = vpack.c.bf16 %v4891_v49, %v4881_v40  ;;  %v3619_v56 = vpack.c.bf16 %v4891_v49, %v4891_v49 }
 0x1fc   : > { %2022 = vst.msk [vmem:[%s4486_s1 + $0x3c] sm:$0xf] %vm2006_vm14, %v3621_v52 }
 0x1fd   : > { %2020 = vst.msk [vmem:[%s4486_s1 + $0x34] sm:$0xf] %vm2006_vm14, %v3619_v56  ;;  %v4013_v59 = vpop.f32.mrb[16].mxu1 }
 0x1fe   : > { %v1568_v61 = vadd.f32 %v4013_v59, %v4722_v35  ;;  %v1559_v0 = vpop.f32.mrb[17].mxu1 }
 0x1ff   : > { %v1560_v2 = vadd.f32 %v4722_v35, %v1559_v0  ;;  %v4014_v4 = vpop.f32.mrb[18].mxu1 }
 0x200   : > { %v3624_v6 = vpack.c.bf16 %v1568_v61, %v1568_v61  ;;  %v1571_v9 = vadd.f32 %v4014_v4, %v4722_v35  ;;  %v1562_v11 = vpop.f32.mrb[19].mxu1 }
 0x201   : > { %v3622_v12 = vpack.c.bf16 %v1560_v2, %v1560_v2  ;;  %v1563_v14 = vadd.f32 %v4722_v35, %v1562_v11 }
 0x202   : > { %2025 = vst.msk [vmem:[%s4486_s1 + $0x48] sm:$0xf] %vm2006_vm14, %v3624_v6  ;;  %v1759_v17 = vpack.c.bf16 %v1571_v9, %v1568_v61  ;;  %v3625_v19 = vpack.c.bf16 %v1571_v9, %v1571_v9 }
 0x203   : > { %2023 = vst.msk [vmem:[%s4486_s1 + $0x40] sm:$0xf] %vm2006_vm14, %v3622_v12  ;;  %v1758_v20 = vpack.c.bf16 %v1563_v14, %v1560_v2  ;;  %v3623_v21 = vpack.c.bf16 %v1563_v14, %v1563_v14 }
 0x204   : > { %2026 = vst.msk [vmem:[%s4486_s1 + $0x4c] sm:$0xf] %vm2006_vm14, %v3625_v19 }
 0x205   : > { %2024 = vst.msk [vmem:[%s4486_s1 + $0x44] sm:$0xf] %vm2006_vm14, %v3623_v21  ;;  %v4017_v26 = vpop.f32.mrb[20].mxu1  ;;  %3775 = vmatprep.subr.bf16.mxu0 %v1758_v20 }
 0x206   : > { %v1584_v30 = vadd.f32 %v4017_v26, %v4722_v35  ;;  %v1575_v33 = vpop.f32.mrb[21].mxu1  ;;  %3776 = vmatpush3.bf16.msra.mxu0 %v1750_v55 }
 0x207   : > { %v1576_v38 = vadd.f32 %v4722_v35, %v1575_v33  ;;  %v4018_v41 = vpop.f32.mrb[22].mxu1  ;;  %3777 = vmatprep.subr.bf16.mxu0 %v1759_v17 }
 0x208   : > { %v3628_v43 = vpack.c.bf16 %v1584_v30, %v1584_v30  ;;  %v1587_v46 = vadd.f32 %v4018_v41, %v4722_v35  ;;  %v1578_v48 = vpop.f32.mrb[23].mxu1 }
 0x209   : > { %v3626_v52 = vpack.c.bf16 %v1576_v38, %v1576_v38  ;;  %v1579_v56 = vadd.f32 %v4722_v35, %v1578_v48 }
 0x20a   : > { %2029 = vst.msk [vmem:[%s4486_s1 + $0x58] sm:$0xf] %vm2006_vm14, %v3628_v43  ;;  %v1761_v59 = vpack.c.bf16 %v1587_v46, %v1584_v30  ;;  %v3629_v61 = vpack.c.bf16 %v1587_v46, %v1587_v46  ;;  %3778 = vmatpush3.bf16.msra.mxu0 %v1751_v53 }
 0x20b   : > { %2027 = vst.msk [vmem:[%s4486_s1 + $0x50] sm:$0xf] %vm2006_vm14, %v3626_v52  ;;  %v1760_v42 = vpack.c.bf16 %v1579_v56, %v1576_v38  ;;  %v3627_v51 = vpack.c.bf16 %v1579_v56, %v1579_v56 }
 0x20c   : > { %2030 = vst.msk [vmem:[%s4486_s1 + $0x5c] sm:$0xf] %vm2006_vm14, %v3629_v61 }
 0x20d   : > { %2028 = vst.msk [vmem:[%s4486_s1 + $0x54] sm:$0xf] %vm2006_vm14, %v3627_v51  ;;  %v4021_v55 = vpop.f32.mrb[24].mxu1  ;;  %3779 = vmatprep.subr.bf16.mxu0 %v1760_v42 }
 0x20e   : > { %v1600_v0 = vadd.f32 %v4021_v55, %v4722_v35  ;;  %v1591_v2 = vpop.f32.mrb[25].mxu1  ;;  %3780 = vmatpush3.bf16.msra.mxu0 %v1752_v10 }
 0x20f   : > { %v1592_v39 = vadd.f32 %v4722_v35, %v1591_v2  ;;  %v4022_v47 = vpop.f32.mrb[26].mxu1  ;;  %3781 = vmatprep.subr.bf16.mxu0 %v1761_v59 }
 0x210   : > { %v3632_v53 = vpack.c.bf16 %v1600_v0, %v1600_v0  ;;  %v1603_v4 = vadd.f32 %v4022_v47, %v4722_v35  ;;  %v1594_v6 = vpop.f32.mrb[27].mxu1 }
 0x211   : > { %v3630_v9 = vpack.c.bf16 %v1592_v39, %v1592_v39  ;;  %v1595_v11 = vadd.f32 %v4722_v35, %v1594_v6 }
 0x212   : > { %2033 = vst.msk [vmem:[%s4486_s1 + $0x68] sm:$0xf] %vm2006_vm14, %v3632_v53  ;;  %v1763_v12 = vpack.c.bf16 %v1603_v4, %v1600_v0  ;;  %v3633_v14 = vpack.c.bf16 %v1603_v4, %v1603_v4  ;;  %3782 = vmatpush3.bf16.msra.mxu0 %v1753_v8 }
 0x213   : > { %2031 = vst.msk [vmem:[%s4486_s1 + $0x60] sm:$0xf] %vm2006_vm14, %v3630_v9  ;;  %v1762_v63 = vpack.c.bf16 %v1595_v11, %v1592_v39  ;;  %v3631_v7 = vpack.c.bf16 %v1595_v11, %v1595_v11 }
 0x214   : > { %2034 = vst.msk [vmem:[%s4486_s1 + $0x6c] sm:$0xf] %vm2006_vm14, %v3633_v14 }
 0x215   : > { %2032 = vst.msk [vmem:[%s4486_s1 + $0x64] sm:$0xf] %vm2006_vm14, %v3631_v7  ;;  %v4025_v10 = vpop.f32.mrb[28].mxu1  ;;  %3783 = vmatprep.subr.bf16.mxu0 %v1762_v63 }
 0x216   : > { %v1616_v17 = vadd.f32 %v4025_v10, %v4722_v35  ;;  %v1607_v19 = vpop.f32.mrb[29].mxu1  ;;  %3784 = vmatpush3.bf16.msra.mxu0 %v1754_v29 }
 0x217   : > { %v1608_v60 = vadd.f32 %v4722_v35, %v1607_v19  ;;  %v4026_v3 = vpop.f32.mrb[30].mxu1  ;;  %3785 = vmatprep.subr.bf16.mxu0 %v1763_v12 }
 0x218   : > { %v3636_v8 = vpack.c.bf16 %v1616_v17, %v1616_v17  ;;  %v1619_v20 = vadd.f32 %v4026_v3, %v4722_v35  ;;  %v1610_v21 = vpop.f32.mrb[31].mxu1 }
 0x219   : > { %v3634_v26 = vpack.c.bf16 %v1608_v60, %v1608_v60  ;;  %v1611_v30 = vadd.f32 %v4722_v35, %v1610_v21 }
 0x21a   : > { %2037 = vst.msk [vmem:[%s4486_s1 + $0x78] sm:$0xf] %vm2006_vm14, %v3636_v8  ;;  %v1765_v33 = vpack.c.bf16 %v1619_v20, %v1616_v17  ;;  %v3637_v38 = vpack.c.bf16 %v1619_v20, %v1619_v20  ;;  %3786 = vmatpush3.bf16.msra.mxu0 %v1755_v25 }
 0x21b   : > { %2035 = vst.msk [vmem:[%s4486_s1 + $0x70] sm:$0xf] %vm2006_vm14, %v3634_v26  ;;  %v1764_v16 = vpack.c.bf16 %v1611_v30, %v1608_v60  ;;  %v3635_v22 = vpack.c.bf16 %v1611_v30, %v1611_v30 }
 0x21c   : > { %2038 = vst.msk [vmem:[%s4486_s1 + $0x7c] sm:$0xf] %vm2006_vm14, %v3637_v38 }
 0x21d   : > { %2036 = vst.msk [vmem:[%s4486_s1 + $0x74] sm:$0xf] %vm2006_vm14, %v3635_v22  ;;  %v4029_v29 = vpop.f32.mrb[32].mxu1  ;;  %3787 = vmatprep.subr.bf16.mxu0 %v1764_v16 }
 0x21e   : > { %v1632_v41 = vadd.f32 %v4029_v29, %v4722_v35  ;;  %v1623_v43 = vpop.f32.mrb[33].mxu1  ;;  %3788 = vmatpush3.bf16.msra.mxu0 %v1756_v54 }
 0x21f   : > { %v1624_v13 = vadd.f32 %v4722_v35, %v1623_v43  ;;  %v4030_v44 = vpop.f32.mrb[34].mxu1  ;;  %3789 = vmatprep.subr.bf16.mxu0 %v1765_v33 }
 0x220   : > { %v3640_v25 = vpack.c.bf16 %v1632_v41, %v1632_v41  ;;  %v1635_v46 = vadd.f32 %v4030_v44, %v4722_v35  ;;  %v1626_v48 = vpop.f32.mrb[35].mxu1 }
 0x221   : > { %v3638_v52 = vpack.c.bf16 %v1624_v13, %v1624_v13  ;;  %v1627_v56 = vadd.f32 %v4722_v35, %v1626_v48 }
 0x222   : > { %2041 = vst.msk [vmem:[%s4486_s1 + $0x88] sm:$0xf] %vm2006_vm14, %v3640_v25  ;;  %v4984_v59 = vpack.c.bf16 %v1635_v46, %v1632_v41  ;;  %v3641_v61 = vpack.c.bf16 %v1635_v46, %v1635_v46  ;;  %3790 = vmatpush3.bf16.msra.mxu0 %v1757_v50 }
 0x223   : > { %2039 = vst.msk [vmem:[%s4486_s1 + $0x80] sm:$0xf] %vm2006_vm14, %v3638_v52  ;;  %v4991_v40 = vpack.c.bf16 %v1627_v56, %v1624_v13  ;;  %v3639_v49 = vpack.c.bf16 %v1627_v56, %v1627_v56 }
 0x224   : > { %2042 = vst.msk [vmem:[%s4486_s1 + $0x8c] sm:$0xf] %vm2006_vm14, %v3641_v61 }
 0x225   : > { %2040 = vst.msk [vmem:[%s4486_s1 + $0x84] sm:$0xf] %vm2006_vm14, %v3639_v49  ;;  %v4033_v54 = vpop.f32.mrb[36].mxu1  ;;  %3514 = vmatmul.mubr.msk.bf16.vlgmr.msra.gmra.mrb[64].mxu0 %vm4671_vm7, %v4350_v23  ;;  %vm5486_vm7 = vnez %v5469_v36 }
 0x226   : > { %v1648_v42 = vadd.f32 %v4033_v54, %v4722_v35  ;;  %v1639_v34 = vpop.f32.mrb[37].mxu1  ;;  %3516 = vmatprep.mubr.msk.bf16.mxu0 %vm4683_vm10, %v4350_v23  ;;  %vm5487_vm10 = vnez %v5471_v37 }
 0x227   : > { %v1640_v45 = vadd.f32 %v4722_v35, %v1639_v34  ;;  %v4034_v50 = vpop.f32.mrb[38].mxu1 }
 0x228   : > { %v3644_v51 = vpack.c.bf16 %v1648_v42, %v1648_v42  ;;  %v1651_v55 = vadd.f32 %v4034_v50, %v4722_v35  ;;  %v1642_v0 = vpop.f32.mrb[39].mxu1 }
 0x229   : > { %v3642_v2 = vpack.c.bf16 %v1640_v45, %v1640_v45  ;;  %v1643_v24 = vadd.f32 %v4722_v35, %v1642_v0 }
 0x22a   : > { %2045 = vst.msk [vmem:[%s4486_s1 + $0x98] sm:$0xf] %vm2006_vm14, %v3644_v51  ;;  %v5009_v39 = vpack.c.bf16 %v1651_v55, %v1648_v42  ;;  %v3645_v47 = vpack.c.bf16 %v1651_v55, %v1651_v55 }
 0x22b   : > { %2043 = vst.msk [vmem:[%s4486_s1 + $0x90] sm:$0xf] %vm2006_vm14, %v3642_v2  ;;  %v5013_v27 = vpack.c.bf16 %v1643_v24, %v1640_v45  ;;  %v3643_v53 = vpack.c.bf16 %v1643_v24, %v1643_v24 }
 0x22c   : > { %2046 = vst.msk [vmem:[%s4486_s1 + $0x9c] sm:$0xf] %vm2006_vm14, %v3645_v47 }
 0x22d   : > { %2044 = vst.msk [vmem:[%s4486_s1 + $0x94] sm:$0xf] %vm2006_vm14, %v3643_v53  ;;  %v4037_v4 = vpop.f32.mrb[40].mxu1  ;;  %3518 = vmatmul.mubr.msk.bf16.gmra.mrb[68].mxu0 %vm4689_vm13, %v4350_v23  ;;  %vm5488_vm13 = vnez %v5473_v57 }
 0x22e   : > { %v1664_v6 = vadd.f32 %v4037_v4, %v4722_v35  ;;  %v1655_v9 = vpop.f32.mrb[41].mxu1  ;;  %3520 = vmatprep.mubr.msk.bf16.mxu0 %vm4701_vm1, %v4350_v23  ;;  %vm5490_vm1 = vcmask (!%p3543_p6), 1043456  }
 0x22f   : > { %v1656_v11 = vadd.f32 %v4722_v35, %v1655_v9  ;;  %v4038_v12 = vpop.f32.mrb[42].mxu1 }
 0x230   : > { %v3648_v14 = vpack.c.bf16 %v1664_v6, %v1664_v6  ;;  %v1667_v63 = vadd.f32 %v4038_v12, %v4722_v35  ;;  %v1658_v7 = vpop.f32.mrb[43].mxu1 }
 0x231   : > { %v3646_v10 = vpack.c.bf16 %v1656_v11, %v1656_v11  ;;  %v1659_v28 = vadd.f32 %v4722_v35, %v1658_v7 }
 0x232   : > { %2049 = vst.msk [vmem:[%s4486_s1 + $0xa8] sm:$0xf] %vm2006_vm14, %v3648_v14  ;;  %v5031_v17 = vpack.c.bf16 %v1667_v63, %v1664_v6  ;;  %v3649_v19 = vpack.c.bf16 %v1667_v63, %v1667_v63 }
 0x233   : > { %2047 = vst.msk [vmem:[%s4486_s1 + $0xa0] sm:$0xf] %vm2006_vm14, %v3646_v10  ;;  %v5035_v31 = vpack.c.bf16 %v1659_v28, %v1656_v11  ;;  %v3647_v60 = vpack.c.bf16 %v1659_v28, %v1659_v28 }
 0x234   : > { %2050 = vst.msk [vmem:[%s4486_s1 + $0xac] sm:$0xf] %vm2006_vm14, %v3649_v19 }
 0x235   : > { %2048 = vst.msk [vmem:[%s4486_s1 + $0xa4] sm:$0xf] %vm2006_vm14, %v3647_v60  ;;  %v4041_v3 = vpop.f32.mrb[44].mxu1  ;;  %3522 = vmatmul.mubr.msk.bf16.gmra.mrb[72].mxu0 %vm4707_vm4, %v4350_v23  ;;  %vm5491_vm4 = vmmov (!%p3543_p6), %vm5490_vm1 }
 0x236   : > { %v1680_v8 = vadd.f32 %v4041_v3, %v4722_v35  ;;  %v1671_v20 = vpop.f32.mrb[45].mxu1  ;;  %3524 = vmatprep.mubr.msk.bf16.mxu0 %vm5486_vm7, %v4350_v23 }
 0x237   : > { %v1672_v21 = vadd.f32 %v4722_v35, %v1671_v20  ;;  %v4042_v26 = vpop.f32.mrb[46].mxu1 }
 0x238   : > { %v3652_v30 = vpack.c.bf16 %v1680_v8, %v1680_v8  ;;  %v1683_v33 = vadd.f32 %v4042_v26, %v4722_v35  ;;  %v1674_v38 = vpop.f32.mrb[47].mxu1 }
 0x239   : > { %v3650_v16 = vpack.c.bf16 %v1672_v21, %v1672_v21  ;;  %v1675_v32 = vadd.f32 %v4722_v35, %v1674_v38 }
 0x23a   : > { %2053 = vst.msk [vmem:[%s4486_s1 + $0xb8] sm:$0xf] %vm2006_vm14, %v3652_v30  ;;  %v5053_v22 = vpack.c.bf16 %v1683_v33, %v1680_v8  ;;  %v3653_v29 = vpack.c.bf16 %v1683_v33, %v1683_v33 }
 0x23b   : > { %2051 = vst.msk [vmem:[%s4486_s1 + $0xb0] sm:$0xf] %vm2006_vm14, %v3650_v16  ;;  %v5057_v36 = vpack.c.bf16 %v1675_v32, %v1672_v21  ;;  %v3651_v41 = vpack.c.bf16 %v1675_v32, %v1675_v32 }
 0x23c   : > { %2054 = vst.msk [vmem:[%s4486_s1 + $0xbc] sm:$0xf] %vm2006_vm14, %v3653_v29 }
 0x23d   : > { %2052 = vst.msk [vmem:[%s4486_s1 + $0xb4] sm:$0xf] %vm2006_vm14, %v3651_v41  ;;  %v4045_v43 = vpop.f32.mrb[48].mxu1  ;;  %3526 = vmatmul.mubr.msk.bf16.gmra.mrb[76].mxu0 %vm5487_vm10, %v4350_v23 }
 0x23e   : > { %v1696_v13 = vadd.f32 %v4045_v43, %v4722_v35  ;;  %v1687_v44 = vpop.f32.mrb[49].mxu1  ;;  %3528 = vmatprep.mubr.msk.bf16.mxu0 %vm5488_vm13, %v4350_v23 }
 0x23f   : > { %v1688_v25 = vadd.f32 %v4722_v35, %v1687_v44  ;;  %v4046_v46 = vpop.f32.mrb[50].mxu1 }
 0x240   : > { %v3656_v48 = vpack.c.bf16 %v1696_v13, %v1696_v13  ;;  %v1699_v52 = vadd.f32 %v4046_v46, %v4722_v35  ;;  %v1690_v56 = vpop.f32.mrb[51].mxu1 }
 0x241   : > { %v3654_v61 = vpack.c.bf16 %v1688_v25, %v1688_v25  ;;  %v1691_v37 = vadd.f32 %v4722_v35, %v1690_v56 }
 0x242   : > { %2057 = vst.msk [vmem:[%s4486_s1 + $0xc8] sm:$0xf] %vm2006_vm14, %v3656_v48  ;;  %v1775_v49 = vpack.c.bf16 %v1699_v52, %v1696_v13  ;;  %v3657_v54 = vpack.c.bf16 %v1699_v52, %v1699_v52 }
 0x243   : > { %2055 = vst.msk [vmem:[%s4486_s1 + $0xc0] sm:$0xf] %vm2006_vm14, %v3654_v61  ;;  %v1774_v42 = vpack.c.bf16 %v1691_v37, %v1688_v25  ;;  %v3655_v57 = vpack.c.bf16 %v1691_v37, %v1691_v37 }
 0x244   : > { %2058 = vst.msk [vmem:[%s4486_s1 + $0xcc] sm:$0xf] %vm2006_vm14, %v3657_v54 }
 0x245   : > { %2056 = vst.msk [vmem:[%s4486_s1 + $0xc4] sm:$0xf] %vm2006_vm14, %v3655_v57  ;;  %v4049_v34 = vpop.f32.mrb[52].mxu1  ;;  %3815 = vmatprep.subr.bf16.mxu0 %v1774_v42  ;;  %4177 = vmatprep.subr.bf16.mxu1 %v1774_v42 }
 0x246   : > { %v1712_v45 = vadd.f32 %v4049_v34, %v4722_v35  ;;  %v1703_v50 = vpop.f32.mrb[53].mxu1  ;;  %3816 = vmatpush3.bf16.msra.mxu0 %v4991_v40  ;;  %4185 = vmatpush3.bf16.msra.mxu1 %v4991_v40 }
 0x247   : > { %v1704_v51 = vadd.f32 %v4722_v35, %v1703_v50  ;;  %v4050_v55 = vpop.f32.mrb[54].mxu1  ;;  %3817 = vmatprep.subr.bf16.mxu0 %v1775_v49  ;;  %4178 = vmatprep.subr.bf16.mxu1 %v1775_v49 }
 0x248   : > { %v3660_v0 = vpack.c.bf16 %v1712_v45, %v1712_v45  ;;  %v1715_v2 = vadd.f32 %v4050_v55, %v4722_v35  ;;  %v1706_v24 = vpop.f32.mrb[55].mxu1 }
 0x249   : > { %v3658_v47 = vpack.c.bf16 %v1704_v51, %v1704_v51  ;;  %v1707_v53 = vadd.f32 %v4722_v35, %v1706_v24 }
 0x24a   : > { %2061 = vst.msk [vmem:[%s4486_s1 + $0xd8] sm:$0xf] %vm2006_vm14, %v3660_v0  ;;  %v1777_v4 = vpack.c.bf16 %v1715_v2, %v1712_v45  ;;  %v3661_v6 = vpack.c.bf16 %v1715_v2, %v1715_v2  ;;  %3818 = vmatpush3.bf16.msra.mxu0 %v4984_v59  ;;  %4186 = vmatpush3.bf16.msra.mxu1 %v4984_v59 }
 0x24b   : > { %2059 = vst.msk [vmem:[%s4486_s1 + $0xd0] sm:$0xf] %vm2006_vm14, %v3658_v47  ;;  %v1776_v40 = vpack.c.bf16 %v1707_v53, %v1704_v51  ;;  %v3659_v9 = vpack.c.bf16 %v1707_v53, %v1707_v53 }
 0x24c   : > { %2062 = vst.msk [vmem:[%s4486_s1 + $0xdc] sm:$0xf] %vm2006_vm14, %v3661_v6 }
 0x24d   : > { %2060 = vst.msk [vmem:[%s4486_s1 + $0xd4] sm:$0xf] %vm2006_vm14, %v3659_v9  ;;  %v4053_v11 = vpop.f32.mrb[56].mxu1  ;;  %3819 = vmatprep.subr.bf16.mxu0 %v1776_v40  ;;  %4179 = vmatprep.subr.bf16.mxu1 %v1776_v40  ;;  %v2211_v40 = vld [vmem:[#allocation2 + $0x10] sm:$0xff] }
 0x24e   : > { %v1728_v12 = vadd.f32 %v4053_v11, %v4722_v35  ;;  %v1719_v14 = vpop.f32.mrb[57].mxu1  ;;  %3820 = vmatpush3.bf16.msra.mxu0 %v5013_v27  ;;  %4187 = vmatpush3.bf16.msra.mxu1 %v5013_v27 }
 0x24f   : > { %v1720_v59 = vadd.f32 %v4722_v35, %v1719_v14  ;;  %v4054_v63 = vpop.f32.mrb[58].mxu1  ;;  %3821 = vmatprep.subr.bf16.mxu0 %v1777_v4  ;;  %4180 = vmatprep.subr.bf16.mxu1 %v1777_v4  ;;  %v2209_v4 = vld [vmem:[#allocation2] sm:$0xff] }
 0x250   : > { %v3664_v7 = vpack.c.bf16 %v1728_v12, %v1728_v12  ;;  %v1731_v10 = vadd.f32 %v4054_v63, %v4722_v35  ;;  %v1722_v28 = vpop.f32.mrb[59].mxu1  ;;  %v2210_v63 = vld [vmem:[#allocation2 + $0x8] sm:$0xff] }
 0x251   : > { %v3662_v19 = vpack.c.bf16 %v1720_v59, %v1720_v59  ;;  %v1723_v60 = vadd.f32 %v4722_v35, %v1722_v28 }
 0x252   : > { %2065 = vst.msk [vmem:[%s4486_s1 + $0xe8] sm:$0xf] %vm2006_vm14, %v3664_v7  ;;  %v1779_v3 = vpack.c.bf16 %v1731_v10, %v1728_v12  ;;  %v3665_v8 = vpack.c.bf16 %v1731_v10, %v1731_v10  ;;  %3822 = vmatpush3.bf16.msra.mxu0 %v5009_v39  ;;  %4188 = vmatpush3.bf16.msra.mxu1 %v5009_v39  ;;  %v2212_v7 = vld [vmem:[#allocation2 + $0x18] sm:$0xff] }
 0x253   : > { %2063 = vst.msk [vmem:[%s4486_s1 + $0xe0] sm:$0xf] %vm2006_vm14, %v3662_v19  ;;  %v1778_v27 = vpack.c.bf16 %v1723_v60, %v1720_v59  ;;  %v3663_v20 = vpack.c.bf16 %v1723_v60, %v1723_v60 }
 0x254   : > { %2066 = vst.msk [vmem:[%s4486_s1 + $0xec] sm:$0xf] %vm2006_vm14, %v3665_v8 }
 0x255   : > { %2064 = vst.msk [vmem:[%s4486_s1 + $0xe4] sm:$0xf] %vm2006_vm14, %v3663_v20  ;;  %v4057_v21 = vpop.f32.mrb[60].mxu1  ;;  %3823 = vmatprep.subr.bf16.mxu0 %v1778_v27  ;;  %4181 = vmatprep.subr.bf16.mxu1 %v1778_v27 }
 0x256   : > { %v1744_v26 = vadd.f32 %v4057_v21, %v4722_v35  ;;  %v1735_v30 = vpop.f32.mrb[61].mxu1  ;;  %3824 = vmatpush3.bf16.msra.mxu0 %v5035_v31  ;;  %4189 = vmatpush3.bf16.msra.mxu1 %v5035_v31 }
 0x257   : > { %v1736_v39 = vadd.f32 %v4722_v35, %v1735_v30  ;;  %v4058_v33 = vpop.f32.mrb[62].mxu1  ;;  %3825 = vmatprep.subr.bf16.mxu0 %v1779_v3  ;;  %4182 = vmatprep.subr.bf16.mxu1 %v1779_v3  ;;  %v2213_v30 = vld [vmem:[#allocation2 + $0x20] sm:$0xff] }
 0x258   : > { %v3668_v38 = vpack.c.bf16 %v1744_v26, %v1744_v26  ;;  %v1747_v16 = vadd.f32 %v4058_v33, %v4722_v35  ;;  %v1738_v32 = vpop.f32.mrb[63].mxu1 }
 0x259   : > { %v3666_v29 = vpack.c.bf16 %v1736_v39, %v1736_v39  ;;  %v1739_v41 = vadd.f32 %v4722_v35, %v1738_v32 }
 0x25a   : > { %2069 = vst.msk [vmem:[%s4486_s1 + $0xf8] sm:$0xf] %vm2006_vm14, %v3668_v38  ;;  %v1781_v43 = vpack.c.bf16 %v1747_v16, %v1744_v26  ;;  %v3669_v13 = vpack.c.bf16 %v1747_v16, %v1747_v16  ;;  %3826 = vmatpush3.bf16.msra.mxu0 %v5031_v17  ;;  %4190 = vmatpush3.bf16.msra.mxu1 %v5031_v17  ;;  %v2214_v16 = vld [vmem:[#allocation2 + $0x28] sm:$0xff] }
 0x25b   : > { %2067 = vst.msk [vmem:[%s4486_s1 + $0xf0] sm:$0xf] %vm2006_vm14, %v3666_v29  ;;  %v1780_v31 = vpack.c.bf16 %v1739_v41, %v1736_v39  ;;  %v3667_v44 = vpack.c.bf16 %v1739_v41, %v1739_v41 }
 0x25c   : > { %2070 = vst.msk [vmem:[%s4486_s1 + $0xfc] sm:$0xf] %vm2006_vm14, %v3669_v13 }
 0x25d   : > { %2068 = vst.msk [vmem:[%s4486_s1 + $0xf4] sm:$0xf] %vm2006_vm14, %v3667_v44  ;;  %3827 = vmatprep.subr.bf16.mxu0 %v1780_v31  ;;  %4183 = vmatprep.subr.bf16.mxu1 %v1780_v31  ;;  %s5492_s1 = sld [smem:[#allocation9_spill]] (!%p3543_p6)  ;;  %vm2593_vm14 = vcmask (!%p3543_p6), 64512  }
 0x25e   : > { %3828 = vmatpush3.bf16.msra.mxu0 %v5057_v36  ;;  %4191 = vmatpush3.bf16.msra.mxu1 %v5057_v36 }
 0x25f   : > { %3829 = vmatprep.subr.bf16.mxu0 %v1781_v43  ;;  %4184 = vmatprep.subr.bf16.mxu1 %v1781_v43 }
 0x262   : > { %3830 = vmatpush3.bf16.msra.mxu0 %v5053_v22  ;;  %4192 = vmatpush3.bf16.msra.mxu1 %v5053_v22 }
 0x263   : > { %s5493_s29 = smov (!%p3543_p6), %s5492_s1 }
 0x265   : > { %3530 = vmatmul.mubr.msk.bf16.vlgmr.msra.gmra.mrb[80].mxu0 %vm4774_vm9, %v4350_v23  ;;  %3534 = vmatmul.mubr.msk.bf16.vlgmr.msra.gmra.mrb[64].mxu1 %vm4790_vm5, %v4350_v23  ;;  %vm4353_vm9 = vmmov (!%p3543_p6), 0  }
 0x266   : > { %3536 = vmatprep.mubr.msk.bf16.mxu1 %vm4799_vm11, %v4350_v23 }
 0x26d   : > { %3538 = vmatmul.mubr.msk.bf16.gmra.mrb[68].mxu1 %vm4808_vm12, %v4350_v23 }
 0x26e   : > { %3540 = vmatprep.mubr.msk.bf16.mxu1 %vm4838_vm15, %v4350_v23 }
 0x275   : > { %3542 = vmatmul.mubr.msk.bf16.gmra.mrb[72].mxu1 %vm4847_vm0, %v4350_v23 }
 0x2f8   : > { %v3791_v35 = vpop.f32.mrb[64].mxu0 }
 0x2f9   : > { %v3792_v58 = vpop.f32.mrb[65].mxu0 }
 0x2fa   : > { %v3793_v62 = vadd.f32 %v3792_v58, %v3791_v35  ;;  %v3794_v17 = vpop.f32.mrb[66].mxu0  ;;  %v2215_v35 = vld [vmem:[#allocation2 + $0x30] sm:$0xff] }
 0x2fb   : > { %v3795_v22 = vpop.f32.mrb[67].mxu0 }
 0x2fc   : > { %v3796_v36 = vadd.f32 %v3795_v22, %v3794_v17  ;;  %v2216_v22 = vld [vmem:[#allocation2 + $0x38] sm:$0xff] }
 0x300   : > { %v3797_v1 = vpop.f32.mrb[68].mxu0 }
 0x301   : > { %v3798_v25 = vpop.f32.mrb[69].mxu0 }
 0x302   : > { %v3799_v46 = vadd.f32 %v3798_v25, %v3797_v1  ;;  %v3800_v48 = vpop.f32.mrb[70].mxu0 }
 0x303   : > { %v3801_v5 = vpop.f32.mrb[71].mxu0 }
 0x304   : > { %v3802_v52 = vadd.f32 %v3801_v5, %v3800_v48  ;;  %v2375_v48 = vld [vmem:[%s5489_s0] sm:$0xff] (!%p3543_p6)  ;;  %v4351_v5 = vmov (!%p3543_p6), 0  }
 0x305   : > { %4266 = vset.pattern.permute.xlu1 (!%p3543_p6), %v4351_v5  ;;  %4265 = vset.pattern.permute.xlu0 (!%p3543_p6), %v4351_v5 }
 0x306   : > { %2385 = vperm.xlu0 (!%p3543_p6), %4265, %v2375_v48  }
 0x308   : > { %v3803_v56 = vpop.f32.mrb[72].mxu0 }
 0x309   : > { %v3804_v61 = vpop.f32.mrb[73].mxu0 }
 0x30a   : > { %v3805_v15 = vadd.f32 %v3804_v61, %v3803_v56  ;;  %v3806_v37 = vpop.f32.mrb[74].mxu0  ;;  %v2376_v56 = vld [vmem:[%s5489_s0 + $0x8] sm:$0xff] (!%p3543_p6)  ;;  %v4267_v61 = vld [vmem:[%s5431_s9] sm:$0xff] (!%p3543_p6)  }
 0x30b   : > { %v3807_v49 = vpop.f32.mrb[75].mxu0  ;;  %4059 = vmatprep.subr.bf16.mxu0 (!%p3543_p6), %v4267_v61  ;;  %2390 = vperm.xlu0 (!%p3543_p6), %4265, %v2376_v56  }
 0x30c   : > { %v3808_v54 = vadd.f32 %v3807_v49, %v3806_v37  ;;  %v2380_v37 = vld [vmem:[%s5489_s0 + $0x28] sm:$0xff] (!%p3543_p6)  ;;  %v2379_v49 = vld [vmem:[%s5489_s0 + $0x20] sm:$0xff] (!%p3543_p6)  ;;  %4060 = vmatpush3.bf16.msra.mxu0 (!%p3543_p6), %v4267_v61 }
 0x30f   : > { %2405 = vperm.xlu0 (!%p3543_p6), %4265, %v2379_v49  }
 0x310   : > { %v3809_v18 = vpop.f32.mrb[76].mxu0 }
 0x311   : > { %v3810_v23 = vpop.f32.mrb[77].mxu0 }
 0x312   : > { %v3811_v42 = vadd.f32 %v3810_v23, %v3809_v18  ;;  %v3812_v57 = vpop.f32.mrb[78].mxu0  ;;  %v2382_v18 = vld [vmem:[%s5489_s0 + $0x38] sm:$0xff] (!%p3543_p6)  ;;  %v2381_v23 = vld [vmem:[%s5489_s0 + $0x30] sm:$0xff] (!%p3543_p6) }
 0x313   : > { %v3813_v34 = vpop.f32.mrb[79].mxu0  ;;  %2415 = vperm.xlu0 (!%p3543_p6), %4265, %v2381_v23  }
 0x314   : > { %v3814_v45 = vadd.f32 %v3813_v34, %v3812_v57  ;;  %v4271_v57 = vld [vmem:[%s5431_s9 + $0x20] sm:$0xff] (!%p3543_p6)   ;;  %v4272_v34 = vld [vmem:[%s5431_s9 + $0x28] sm:$0xff] (!%p3543_p6)  }
 0x338   : > { %v3831_v50 = vpop.f32.mrb[80].mxu0  ;;  %v3837_v51 = vpop.f32.mrb[64].mxu1 }
 0x339   : > { %v3832_v55 = vpop.f32.mrb[81].mxu0  ;;  %v3838_v0 = vpop.f32.mrb[65].mxu1 }
 0x33a   : > { %v3833_v2 = vadd.f32 %v3832_v55, %v3831_v50  ;;  %v3834_v24 = vpop.f32.mrb[82].mxu0  ;;  %v3839_v47 = vadd.f32 %v3838_v0, %v3837_v51  ;;  %v3840_v53 = vpop.f32.mrb[66].mxu1  ;;  %v4274_v50 = vld [vmem:[%s5431_s9 + $0x38] sm:$0xff] (!%p3543_p6)   ;;  %v2443_v51 = vld [vmem:[%s5430_s8] sm:$0xf] (!%p3543_p6)  ;;  %v4280_v0 = vld [vmem:[%s5433_s11 + $0x8] sm:$0xff] (!%p3543_p6)  }
 0x33b   : > { %v3835_v6 = vpop.f32.mrb[83].mxu0  ;;  %v3841_v9 = vpop.f32.mrb[67].mxu1  ;;  %v4279_v55 = vld [vmem:[%s5433_s11] sm:$0xff] (!%p3543_p6)  }
 0x33c   : > { %v2317_v11 = vadd.f32 %v3833_v2, %v3793_v62  ;;  %v3836_v12 = vadd.f32 %v3835_v6, %v3834_v24  ;;  %v2325_v14 = vadd.f32 %v3839_v47, %v3799_v46  ;;  %v3842_v59 = vadd.f32 %v3841_v9, %v3840_v53  ;;  %v2377_v46 = vld [vmem:[%s5489_s0 + $0x10] sm:$0xff] (!%p3543_p6)  ;;  %4093 = vmatprep.subr.bf16.mxu1 (!%p3543_p6), %v4279_v55  ;;  %v4282_v24 = vld [vmem:[%s5433_s11 + $0x18] sm:$0xff] (!%p3543_p6)   ;;  %v4283_v47 = vld [vmem:[%s5433_s11 + $0x20] sm:$0xff] (!%p3543_p6)  }
 0x33d   : > { %2395 = vperm.xlu1 (!%p3543_p6), %4266, %v2377_v46   ;;  %v4281_v2 = vld [vmem:[%s5433_s11 + $0x10] sm:$0xff] (!%p3543_p6)   ;;  %4094 = vmatpush3.bf16.msra.mxu1 (!%p3543_p6), %v4279_v55  ;;  %v4284_v53 = vld [vmem:[%s5433_s11 + $0x28] sm:$0xff] (!%p3543_p6)  }
 0x33e   : > { %v2347_v10 = vadd.f32 %v2317_v11, %v2209_v4  ;;  %v2320_v28 = vadd.f32 %v3836_v12, %v3796_v36  ;;  %v2349_v19 = vadd.f32 %v2325_v14, %v2211_v40  ;;  %v2328_v60 = vadd.f32 %v3842_v59, %v3802_v52  ;;  %v2378_v52 = vld [vmem:[%s5489_s0 + $0x18] sm:$0xff] (!%p3543_p6)  ;;  %4095 = vmatprep.subr.bf16.mxu1 (!%p3543_p6), %v4280_v0 }
 0x340   : > { %2355 = vst [vmem:[#allocation2] sm:$0xff] %v2347_v10  ;;  %v2348_v3 = vadd.f32 %v2320_v28, %v2210_v63  ;;  %2357 = vst [vmem:[#allocation2 + $0x10] sm:$0xff] %v2349_v19  ;;  %v2350_v8 = vadd.f32 %v2328_v60, %v2212_v7  ;;  %v3843_v27 = vpop.f32.mrb[68].mxu1 }
 0x341   : > { %v3844_v20 = vpop.f32.mrb[69].mxu1  ;;  %2400 = vperm.xlu1 (!%p3543_p6), %4266, %v2378_v52   ;;  %4096 = vmatpush3.bf16.msra.mxu1 (!%p3543_p6), %v4280_v0 }
 0x342   : > { %2356 = vst [vmem:[#allocation2 + $0x8] sm:$0xff] %v2348_v3  ;;  %2358 = vst [vmem:[#allocation2 + $0x18] sm:$0xff] %v2350_v8  ;;  %v3845_v21 = vadd.f32 %v3844_v20, %v3843_v27  ;;  %v3846_v26 = vpop.f32.mrb[70].mxu1  ;;  %4097 = vmatprep.subr.bf16.mxu1 (!%p3543_p6), %v4281_v2 }
 0x343   : > { %v3847_v39 = vpop.f32.mrb[71].mxu1 }
 0x344   : > { %v2333_v33 = vadd.f32 %v3845_v21, %v3805_v15  ;;  %v3848_v38 = vadd.f32 %v3847_v39, %v3846_v26  ;;  %v4268_v15 = vld [vmem:[%s5431_s9 + $0x8] sm:$0xff] (!%p3543_p6)   ;;  %v2607_v21 = vsel (!%p3543_p6), %vm5491_vm4, %v2443_v51, 0 }
 0x345   : > { %4061 = vmatprep.subr.bf16.mxu0 (!%p3543_p6), %v4268_v15  ;;  %2410 = vperm.xlu1 (!%p3543_p6), %4266, %v2380_v37  }
 0x346   : > { %v2351_v32 = vadd.f32 %v2333_v33, %v2213_v30  ;;  %v2336_v29 = vadd.f32 %v3848_v38, %v3808_v54  ;;  %v4269_v54 = vld [vmem:[%s5431_s9 + $0x10] sm:$0xff] (!%p3543_p6)   ;;  %4062 = vmatpush3.bf16.msra.mxu0 (!%p3543_p6), %v4268_v15  ;;  %4098 = vmatpush3.bf16.msra.mxu1 (!%p3543_p6), %v4281_v2 }
 0x347   : > { %4063 = vmatprep.subr.bf16.mxu0 (!%p3543_p6), %v4269_v54  ;;  %4099 = vmatprep.subr.bf16.mxu1 (!%p3543_p6), %v4282_v24  ;;  %v5222_v40 = vld [vmem:[#allocation2 + $0x10] sm:$0xff] (!%p3543_p6)  ;;  %v5224_v9 = vld [vmem:[#allocation2] sm:$0xff] (!%p3543_p6) }
 0x348   : > { %2359 = vst [vmem:[#allocation2 + $0x20] sm:$0xff] %v2351_v32  ;;  %v2352_v41 = vadd.f32 %v2336_v29, %v2214_v16  ;;  %v3849_v43 = vpop.f32.mrb[72].mxu1 }
 0x349   : > { %v3850_v13 = vpop.f32.mrb[73].mxu1  ;;  %2420 = vperm.xlu1 (!%p3543_p6), %4266, %v2382_v18   ;;  %v5226_v11 = vld [vmem:[#allocation2 + $0x18] sm:$0xff] (!%p3543_p6)  ;;  %v5228_v12 = vld [vmem:[#allocation2 + $0x8] sm:$0xff] (!%p3543_p6) }
 0x34a   : > { %2360 = vst [vmem:[#allocation2 + $0x28] sm:$0xff] %v2352_v41  ;;  %v3851_v31 = vadd.f32 %v3850_v13, %v3849_v43  ;;  %v3852_v44 = vpop.f32.mrb[74].mxu1  ;;  %4064 = vmatpush3.bf16.msra.mxu0 (!%p3543_p6), %v4269_v54  ;;  %4100 = vmatpush3.bf16.msra.mxu1 (!%p3543_p6), %v4282_v24  ;;  %v4275_v13 = vld [vmem:[%s5492_s1] sm:$0xff] (!%p3543_p6)  }
 0x34b   : > { %v3853_v58 = vpop.f32.mrb[75].mxu1  ;;  %4101 = vmatprep.subr.bf16.mxu1 (!%p3543_p6), %v4283_v47 }
 0x34c   : > { %v2341_v62 = vadd.f32 %v3851_v31, %v3811_v42  ;;  %v3854_v17 = vadd.f32 %v3853_v58, %v3852_v44  ;;  %2366 = sbr.rel (%p3543_p6) target bundleno = 1885 (0x75d), region = 100  ;;  %v4270_v42 = vld [vmem:[%s5431_s9 + $0x18] sm:$0xff] (!%p3543_p6)   ;;  %v4276_v31 = vld [vmem:[%s5493_s29 + $0x8] sm:$0xff] (!%p3543_p6)   ;;  %v4277_v44 = vld [vmem:[%s5493_s29 + $0x10] sm:$0xff] (!%p3543_p6)  }
 0x34d   : > { %4065 = vmatprep.subr.bf16.mxu0 (!%p3543_p6), %v4270_v42  ;;  %v4285_v58 = vld [vmem:[%s5433_s11 + $0x30] sm:$0xff] (!%p3543_p6)  }
 0x34e   : > { %v2353_v36 = vadd.f32 %v2341_v62, %v2215_v35  ;;  %v2344_v1 = vadd.f32 %v3854_v17, %v3814_v45  ;;  %4066 = vmatpush3.bf16.msra.mxu0 (!%p3543_p6), %v4270_v42  ;;  %v4273_v45 = vld [vmem:[%s5431_s9 + $0x30] sm:$0xff] (!%p3543_p6)   ;;  %4102 = vmatpush3.bf16.msra.mxu1 (!%p3543_p6), %v4283_v47  ;;  %v4278_v35 = vld [vmem:[%s5493_s29 + $0x18] sm:$0xff] (!%p3543_p6)   ;;  %v3560_v17 = vld [vmem:[%s5432_s10] ss:$0 sm:$0xff] (!%p3543_p6) }
 0x34f   : > { %4067 = vmatprep.subr.bf16.mxu0 (!%p3543_p6), %v4271_v57  ;;  %4103 = vmatprep.subr.bf16.mxu1 (!%p3543_p6), %v4284_v53  ;;  %v5236_v60 = vld [vmem:[#allocation2 + $0x20] sm:$0xff] (!%p3543_p6)  ;;  %v4286_v62 = vld [vmem:[%s5433_s11 + $0x38] sm:$0xff] (!%p3543_p6)  }
 0x350   : > { %2361 = vst [vmem:[#allocation2 + $0x30] sm:$0xff] %v2353_v36  ;;  %v2354_v25 = vadd.f32 %v2344_v1, %v2216_v22 }
 0x351   : > { %v5234_v19 = vld [vmem:[#allocation2 + $0x28] sm:$0xff] (!%p3543_p6) }
 0x352   : > { %2362 = vst [vmem:[#allocation2 + $0x38] sm:$0xff] %v2354_v25  ;;  %4068 = vmatpush3.bf16.msra.mxu0 (!%p3543_p6), %v4271_v57  ;;  %4104 = vmatpush3.bf16.msra.mxu1 (!%p3543_p6), %v4284_v53 }
 0x353   : > { %4069 = vmatprep.subr.bf16.mxu0 %v4272_v34  ;;  %4105 = vmatprep.subr.bf16.mxu1 %v4285_v58 }
 0x356   : > { %4070 = vmatpush3.bf16.msra.mxu0 %v4272_v34  ;;  %4106 = vmatpush3.bf16.msra.mxu1 %v4285_v58  ;;  %v4304_v58 = vld [vmem:[%s5438_s16 + $0x8] sm:$0xff]  }
 0x357   : > { %4071 = vmatprep.subr.bf16.mxu0 %v4273_v45  ;;  %v5243_v33 = vld [vmem:[#allocation2 + $0x30] sm:$0xff]  ;;  %4107 = vmatprep.subr.bf16.mxu1 %v4286_v62 }
 0x359   : > { %v5241_v39 = vld [vmem:[#allocation2 + $0x38] sm:$0xff] }
 0x35a   : > { %4072 = vmatpush3.bf16.msra.mxu0 %v4273_v45  ;;  %4108 = vmatpush3.bf16.msra.mxu1 %v4286_v62  ;;  %v4305_v62 = vld [vmem:[%s5438_s16 + $0x10] sm:$0xff]  }
 0x35b   : > { %4073 = vmatprep.subr.bf16.mxu0 %v4274_v50 }
 0x35e   : > { %4074 = vmatpush3.bf16.msra.mxu0 %v4274_v50 }
 0x35f   : > { %4202 = vmatprep.subr.msk.bf16.mxu0 %vm5490_vm1, %v2443_v51 }
 0x385   : > { %v2386_v6 = vpop.permute.xlu0 %2385 }
 0x386   : > { %v2423_v7 = vmul.f32 %v2386_v6, %v5224_v9  ;;  %v4352_v6 = vmov 0.0  }
 0x387   : > { %4117 = vmatprep.subr.bf16.mxu1 %v4352_v6 }
 0x38a   : > { %v2391_v59 = vpop.permute.xlu0 %2390 }
 0x38b   : > { %v2424_v28 = vmul.f32 %v2391_v59, %v5228_v12  ;;  %v2885_v59 = vadd.f32 %v5228_v12, %v5224_v9  ;;  %v4291_v9 = vld [vmem:[%s5436_s14 + $0x10] sm:$0xff]  }
 0x38d   : > { %v2431_v8 = vpack.c.bf16 %v2424_v28, %v2423_v7  ;;  %v2886_v7 = vadd.f32 %v2885_v59, %v5222_v40 }
 0x38e   : > { %v2406_v20 = vpop.permute.xlu0 %2405 }
 0x38f   : > { %v2427_v30 = vmul.f32 %v2406_v20, %v5236_v60  ;;  %4075 = vmatprep.mubr.bf16.mxu0 %v2431_v8  ;;  %v2887_v28 = vadd.f32 %v2886_v7, %v5226_v11 }
 0x391   : > { %v2888_v12 = vadd.f32 %v2887_v28, %v5236_v60  ;;  %v4294_v60 = vld [vmem:[%s5435_s13 + $0x18] sm:$0xff]  }
 0x392   : > { %v2416_v32 = vpop.permute.xlu0 %2415 }
 0x393   : > { %v2429_v41 = vmul.f32 %v2416_v32, %v5243_v33 }
 0x3bc   : > { %v2396_v4 = vpop.permute.xlu1 %2395 }
 0x3bd   : > { %v2425_v63 = vmul.f32 %v2396_v4, %v5222_v40  ;;  %v4287_v4 = vld [vmem:[%s5436_s14] sm:$0xff]   ;;  %v4292_v40 = vld [vmem:[%s5435_s13 + $0x10] sm:$0xff]  }
 0x3c0   : > { %v2401_v14 = vpop.permute.xlu1 %2400 }
 0x3c1   : > { %v2426_v10 = vmul.f32 %v2401_v14, %v5226_v11  ;;  %v4288_v14 = vld [vmem:[%s5435_s13] sm:$0xff]   ;;  %v4293_v11 = vld [vmem:[%s5436_s14 + $0x18] sm:$0xff]  }
 0x3c3   : > { %v2432_v3 = vpack.c.bf16 %v2426_v10, %v2425_v63  ;;  %v4289_v63 = vld [vmem:[%s5436_s14 + $0x8] sm:$0xff]  }
 0x3c4   : > { %v2411_v27 = vpop.permute.xlu1 %2410  ;;  %v4290_v10 = vld [vmem:[%s5435_s13 + $0x8] sm:$0xff]  }
 0x3c5   : > { %v2428_v26 = vmul.f32 %v2411_v27, %v5234_v19  ;;  %4076 = vmatmul.mubr.bf16.vlgmr.msra.gmra.mrb[0].mxu0 %v2432_v3  ;;  %v2889_v3 = vadd.f32 %v2888_v12, %v5234_v19  ;;  %v4295_v19 = vld [vmem:[%s5436_s14 + $0x20] sm:$0xff]  }
 0x3c6   : > { %4084 = vmatpush3.bf16.msra.mxu0 %v2607_v21  ;;  %v4296_v21 = vld [vmem:[%s5435_s13 + $0x20] sm:$0xff]  }
 0x3c7   : > { %v2433_v38 = vpack.c.bf16 %v2428_v26, %v2427_v30  ;;  %4137 = vmatprep.subr.bf16.mxu0 %v4352_v6  ;;  %v2890_v8 = vadd.f32 %v2889_v3, %v5243_v33  ;;  %v4297_v30 = vld [vmem:[%s5436_s14 + $0x28] sm:$0xff]  }
 0x3c8   : > { %v2421_v16 = vpop.permute.xlu1 %2420  ;;  %v4298_v33 = vld [vmem:[%s5435_s13 + $0x28] sm:$0xff]  }
 0x3c9   : > { %v2430_v29 = vmul.f32 %v2421_v16, %v5241_v39  ;;  %4079 = vmatprep.mubr.bf16.mxu0 %v2433_v38  ;;  %v2891_v27 = vadd.f32 %v2890_v8, %v5241_v39  ;;  %v4299_v16 = vld [vmem:[%s5436_s14 + $0x30] sm:$0xff]  }
 0x3cb   : > { %v2434_v43 = vpack.c.bf16 %v2430_v29, %v2429_v41  ;;  %v2892_v20 = vrot.slane %v2891_v27, 4  ;;  %v4300_v29 = vld [vmem:[%s5435_s13 + $0x30] sm:$0xff]  }
 0x3cd   : > { %4080 = vmatmul.mubr.bf16.gmra.mrb[4].mxu0 %v2434_v43  ;;  %v2893_v26 = vadd.f32 %v2892_v20, %v2891_v27  ;;  %v4301_v43 = vld [vmem:[%s5436_s14 + $0x38] sm:$0xff]   ;;  %v4309_v27 = vld [vmem:[%s5438_s16 + $0x30] sm:$0xff]  }
 0x3ce   : > { %4085 = vmatprep.mubr.msk.bf16.mxu0 %vm2593_vm14, %v4275_v13 }
 0x3cf   : > { %v2894_v39 = vrot.slane %v2893_v26, 2 }
 0x3d1   : > { %v2895_v38 = vadd.f32 %v2894_v39, %v2893_v26 }
 0x3d3   : > { %v2896_v32 = vrot.slane %v2895_v38, 1 }
 0x3d5   : > { %4086 = vmatmul.mubr.msk.bf16.vlgmr.msra.gmra.mrb[0].mxu0 %vm2593_vm14, %v4276_v31  ;;  %v2897_v41 = vadd.f32 %v2896_v32, %v2895_v38  ;;  %v4302_v31 = vld [vmem:[%s5435_s13 + $0x38] sm:$0xff]  }
 0x3d6   : > { %4089 = vmatprep.mubr.msk.bf16.mxu0 %vm2593_vm14, %v4277_v44  ;;  %4138 = vmatpush3.bf16.msra.mxu0 %v4288_v14 }
 0x3d7   : > { %4139 = vmatprep.subr.bf16.mxu0 %v4352_v6  ;;  %v2913_v13 = vmul.f32 0.00083333335, %v2897_v41 }
 0x3d9   : > { %v2914_v44 = vpack.c.bf16 %v2913_v13, %v2913_v13 }
 0x3da   : > { %4140 = vmatpush3.bf16.msra.mxu0 %v4290_v10 }
 0x3db   : > { %4141 = vmatprep.subr.bf16.mxu0 %v4352_v6 }
 0x3dd   : > { %4090 = vmatmul.mubr.msk.bf16.gmra.mrb[4].mxu0 %vm2593_vm14, %v4278_v35  ;;  %v4303_v35 = vld [vmem:[%s5438_s16] sm:$0xff]  }
 0x3de   : > { %4142 = vmatpush3.bf16.msra.mxu0 %v4292_v40  ;;  %4153 = vmatprep.mubr.msk.bf16.mxu0 %vm4353_vm9, %v4352_v6 }
 0x3df   : > { %4143 = vmatprep.subr.bf16.mxu0 %v4352_v6 }
 0x3e2   : > { %4144 = vmatpush3.bf16.msra.mxu0 %v4294_v60 }
 0x3e3   : > { %4145 = vmatprep.subr.bf16.mxu0 %v4352_v6 }
 0x3e6   : > { %4146 = vmatpush3.bf16.msra.mxu0 %v4296_v21  ;;  %v3123_v21 = vld [vmem:[%s5437_s15] sm:$0x1] }
 0x3e7   : > { %4147 = vmatprep.subr.bf16.mxu0 %v4352_v6 }
 0x3ea   : > { %4148 = vmatpush3.bf16.msra.mxu0 %v4298_v33 }
 0x3eb   : > { %4149 = vmatprep.subr.bf16.mxu0 %v4352_v6 }
 0x3ee   : > { %4150 = vmatpush3.bf16.msra.mxu0 %v4300_v29 }
 0x3ef   : > { %4151 = vmatprep.subr.bf16.mxu0 %v4352_v6 }
 0x3f2   : > { %4152 = vmatpush3.bf16.msra.mxu0 %v4302_v31 }
 0x4a8   : > { %v4087_v22 = vpop.f32.mrb[0].mxu0 }
 0x4a9   : > { %v2683_v36 = vadd.f32 %v4087_v22, %v3560_v17  ;;  %v2643_v1 = vpop.f32.mrb[1].mxu0  ;;  %v4307_v22 = vld [vmem:[%s5438_s16 + $0x20] sm:$0xff]  }
 0x4aa   : > { %v2681_v25 = vadd.f32 %v3560_v17, %v2643_v1  ;;  %v4088_v46 = vpop.f32.mrb[2].mxu0 }
 0x4ab   : > { %v2684_v48 = vadd.f32 %v4088_v46, %v3560_v17  ;;  %v2646_v5 = vpop.f32.mrb[3].mxu0  ;;  %v2691_v56 = vmax.f32 %v2683_v36, 0.0  ;;  %v4308_v36 = vld [vmem:[%s5438_s16 + $0x28] sm:$0xff]  }
 0x4ac   : > { %v2682_v52 = vadd.f32 %v3560_v17, %v2646_v5  ;;  %v2689_v15 = vmax.f32 %v2681_v25, 0.0  ;;  %v3561_v25 = vld [vmem:[%s5434_s12] ss:$0 sm:$0xff] }
 0x4ad   : > { %v2692_v61 = vmax.f32 %v2684_v48, 0.0 }
 0x4ae   : > { %v2690_v37 = vmax.f32 %v2682_v52, 0.0 }
 0x4af   : > { %v2698_v49 = vpack.c.bf16 %v2692_v61, %v2691_v56 }
 0x4b0   : > { %v4091_v54 = vpop.f32.mrb[4].mxu0  ;;  %v2697_v18 = vpack.c.bf16 %v2690_v37, %v2689_v15 }
 0x4b1   : > { %v2687_v23 = vadd.f32 %v4091_v54, %v3560_v17  ;;  %v2659_v42 = vpop.f32.mrb[5].mxu0 }
 0x4b2   : > { %v2685_v57 = vadd.f32 %v3560_v17, %v2659_v42  ;;  %v4092_v34 = vpop.f32.mrb[6].mxu0  ;;  %4109 = vmatprep.mubr.bf16.mxu1 %v2697_v18 }
 0x4b3   : > { %v2688_v45 = vadd.f32 %v4092_v34, %v3560_v17  ;;  %v2662_v50 = vpop.f32.mrb[7].mxu0  ;;  %4110 = vmatmul.mubr.bf16.vlgmr.msra.gmra.mrb[0].mxu1 %v2698_v49  ;;  %v2695_v55 = vmax.f32 %v2687_v23, 0.0 }
 0x4b4   : > { %v2686_v51 = vadd.f32 %v3560_v17, %v2662_v50  ;;  %v2693_v2 = vmax.f32 %v2685_v57, 0.0  ;;  %4118 = vmatpush3.bf16.msra.mxu1 %v4287_v4  ;;  %v4306_v17 = vld [vmem:[%s5438_s16 + $0x18] sm:$0xff]  }
 0x4b5   : > { %v2696_v0 = vmax.f32 %v2688_v45, 0.0  ;;  %4119 = vmatprep.subr.bf16.mxu1 %v4352_v6 }
 0x4b6   : > { %v2694_v24 = vmax.f32 %v2686_v51, 0.0 }
 0x4b7   : > { %v2700_v47 = vpack.c.bf16 %v2696_v0, %v2695_v55 }
 0x4b8   : > { %v2699_v53 = vpack.c.bf16 %v2694_v24, %v2693_v2  ;;  %4120 = vmatpush3.bf16.msra.mxu1 %v4289_v63 }
 0x4b9   : > { %4121 = vmatprep.subr.bf16.mxu1 %v4352_v6 }
 0x4ba   : > { %4113 = vmatprep.mubr.bf16.mxu1 %v2699_v53 }
 0x4bb   : > { %4114 = vmatmul.mubr.bf16.gmra.mrb[4].mxu1 %v2700_v47 }
 0x4bc   : > { %4122 = vmatpush3.bf16.msra.mxu1 %v4291_v9  ;;  %4133 = vmatprep.mubr.msk.bf16.mxu1 %vm4353_vm9, %v4352_v6 }
 0x4bd   : > { %4123 = vmatprep.subr.bf16.mxu1 %v4352_v6 }
 0x4c0   : > { %4124 = vmatpush3.bf16.msra.mxu1 %v4293_v11 }
 0x4c1   : > { %4125 = vmatprep.subr.bf16.mxu1 %v4352_v6 }
 0x4c4   : > { %4126 = vmatpush3.bf16.msra.mxu1 %v4295_v19  ;;  %v4310_v19 = vld [vmem:[%s5438_s16 + $0x38] sm:$0xff]  }
 0x4c5   : > { %4127 = vmatprep.subr.bf16.mxu1 %v4352_v6 }
 0x4c8   : > { %4128 = vmatpush3.bf16.msra.mxu1 %v4297_v30 }
 0x4c9   : > { %4129 = vmatprep.subr.bf16.mxu1 %v4352_v6 }
 0x4cc   : > { %4130 = vmatpush3.bf16.msra.mxu1 %v4299_v16 }
 0x4cd   : > { %4131 = vmatprep.subr.bf16.mxu1 %v4352_v6 }
 0x4d0   : > { %4132 = vmatpush3.bf16.msra.mxu1 %v4301_v43 }
 0x4d1   : > { %4157 = vmatprep.subr.bf16.mxu1 %v4352_v6 }
 0x4d3   : > { %4134 = vmatmul.mubr.bf16.vlgmr.msra.gmra.mrb[8].mxu1 %v2914_v44 }
 0x4d4   : > { %4173 = vmatprep.mubr.msk.bf16.mxu1 %vm4353_vm9, %v4352_v6  ;;  %4158 = vmatpush3.bf16.msra.mxu1 %v4303_v35 }
 0x4d5   : > { %4159 = vmatprep.subr.bf16.mxu1 %v4352_v6 }
 0x4d8   : > { %4160 = vmatpush3.bf16.msra.mxu1 %v4304_v58 }
 0x4d9   : > { %4161 = vmatprep.subr.bf16.mxu1 %v4352_v6 }
 0x4dc   : > { %4162 = vmatpush3.bf16.msra.mxu1 %v4305_v62 }
 0x4dd   : > { %4163 = vmatprep.subr.bf16.mxu1 %v4352_v6 }
 0x4e0   : > { %4164 = vmatpush3.bf16.msra.mxu1 %v4306_v17 }
 0x4e1   : > { %4165 = vmatprep.subr.bf16.mxu1 %v4352_v6 }
 0x4e4   : > { %4166 = vmatpush3.bf16.msra.mxu1 %v4307_v22 }
 0x4e5   : > { %4167 = vmatprep.subr.bf16.mxu1 %v4352_v6 }
 0x4e8   : > { %4168 = vmatpush3.bf16.msra.mxu1 %v4308_v36 }
 0x4e9   : > { %4169 = vmatprep.subr.bf16.mxu1 %v4352_v6 }
 0x4ec   : > { %4170 = vmatpush3.bf16.msra.mxu1 %v4309_v27 }
 0x4ed   : > { %4171 = vmatprep.subr.bf16.mxu1 %v4352_v6  ;;  %v3143_v6 = vld [vmem:[%s5439_s17] sm:$0x1] }
 0x4f0   : > { %4172 = vmatpush3.bf16.msra.mxu1 %v4310_v19 }
 0x586   : > { %v4111_v1 = vpop.f32.mrb[0].mxu1 }
 0x587   : > { %v2806_v46 = vpop.f32.mrb[1].mxu1  ;;  %v2815_v5 = vadd.f32 %v4111_v1, %v3561_v25 }
 0x588   : > { %v4112_v48 = vpop.f32.mrb[2].mxu1  ;;  %v2807_v61 = vadd.f32 %v3561_v25, %v2806_v46 }
 0x589   : > { %v2818_v52 = vadd.f32 %v4112_v48, %v3561_v25  ;;  %v2809_v56 = vpop.f32.mrb[3].mxu1 }
 0x58a   : > { %v2810_v15 = vadd.f32 %v3561_v25, %v2809_v56 }
 0x58b   : > { %v3686_v37 = vpack.c.bf16 %v2818_v52, %v2815_v5 }
 0x58c   : > { %v3681_v49 = vpack.c.bf16 %v2810_v15, %v2807_v61  ;;  %v2898_v54 = vadd.f32 %v2810_v15, %v2807_v61 }
 0x58d   : > { %3698 = vst [vmem:[%s5441_s19 + $0x8] sm:$0xff] %v3686_v37  }
 0x58e   : > { %3682 = vst [vmem:[%s5441_s19] sm:$0xff] %v3681_v49   ;;  %v2899_v18 = vadd.f32 %v2898_v54, %v2815_v5  ;;  %v4115_v23 = vpop.f32.mrb[4].mxu1 }
 0x58f   : > { %v2822_v42 = vpop.f32.mrb[5].mxu1  ;;  %v2831_v50 = vadd.f32 %v4115_v23, %v3561_v25 }
 0x590   : > { %v2823_v57 = vadd.f32 %v3561_v25, %v2822_v42  ;;  %v2900_v34 = vadd.f32 %v2899_v18, %v2818_v52  ;;  %v4116_v45 = vpop.f32.mrb[6].mxu1 }
 0x591   : > { %v2834_v51 = vadd.f32 %v4116_v45, %v3561_v25  ;;  %v2825_v55 = vpop.f32.mrb[7].mxu1 }
 0x592   : > { %v2901_v0 = vadd.f32 %v2900_v34, %v2823_v57  ;;  %v2826_v2 = vadd.f32 %v3561_v25, %v2825_v55 }
 0x593   : > { %v3696_v24 = vpack.c.bf16 %v2834_v51, %v2831_v50 }
 0x594   : > { %v3691_v47 = vpack.c.bf16 %v2826_v2, %v2823_v57  ;;  %v2902_v53 = vadd.f32 %v2901_v0, %v2826_v2 }
 0x595   : > { %3700 = vst [vmem:[%s5441_s19 + $0x18] sm:$0xff] %v3696_v24  }
 0x596   : > { %3699 = vst [vmem:[%s5441_s19 + $0x10] sm:$0xff] %v3691_v47   ;;  %v2903_v4 = vadd.f32 %v2902_v53, %v2831_v50 }
 0x598   : > { %v2904_v14 = vadd.f32 %v2903_v4, %v2834_v51 }
 0x59a   : > { %v2905_v59 = vrot.slane %v2904_v14, 4 }
 0x59c   : > { %v2906_v63 = vadd.f32 %v2905_v59, %v2904_v14 }
 0x59e   : > { %v2907_v7 = vrot.slane %v2906_v63, 2 }
 0x5a0   : > { %v2908_v10 = vadd.f32 %v2907_v7, %v2906_v63 }
 0x5a2   : > { %v2909_v28 = vrot.slane %v2908_v10, 1 }
 0x5a4   : > { %v2910_v9 = vadd.f32 %v2909_v28, %v2908_v10 }
 0x5a6   : > { %v2911_v12 = vmul.f32 0.015625, %v2910_v9  ;;  %v3029_v3 = vpop.f32.mrb[8].mxu1 }
 0x5a7   : > { %v4135_v11 = vpop.f32.mrb[9].mxu1 }
 0x5a8   : > { %v2912_v40 = vpack.c.bf16 %v2911_v12, %v2911_v12  ;;  %v3032_v8 = vpop.f32.mrb[10].mxu1 }
 0x5a9   : > { %v4136_v60 = vpop.f32.mrb[11].mxu1 }
 0x5aa   : > { %4154 = vmatmul.mubr.bf16.vlgmr.msra.gmra.mrb[8].mxu0 %v2912_v40 }
 0x67d   : > { %v3117_v20 = vpop.f32.mrb[8].mxu0 }
 0x67e   : > { %v3118_v26 = vadd.f32 %v3117_v20, %v3029_v3  ;;  %v4155_v30 = vpop.f32.mrb[9].mxu0 }
 0x67f   : > { %v3120_v39 = vpop.f32.mrb[10].mxu0 }
 0x680   : > { %v3124_v33 = vadd.f32 %v3123_v21, %v3118_v26  ;;  %v4156_v38 = vpop.f32.mrb[11].mxu0 }
 0x682   : > { %v3125_v16 = vmax.f32 %v3124_v33, 0.0 }
 0x684   : > { %v3126_v32 = vpack.c.bf16 %v3125_v16, %v3125_v16 }
 0x686   : > { %4174 = vmatmul.mubr.bf16.vlgmr.msra.gmra.mrb[12].mxu1 %v3126_v32 }
 0x759   : > { %v3226_v29 = vpop.f32.mrb[12].mxu1 }
 0x75a   : > { %v3227_v41 = vadd.f32 %v3226_v29, %v3143_v6  ;;  %v4175_v43 = vpop.f32.mrb[13].mxu1 }
 0x75b   : > { %v3229_v13 = vpop.f32.mrb[14].mxu1 }
 0x75c   : > { %3232 = vst [vmem:[#allocation3] sm:$0x1] %v3227_v41  ;;  %v4176_v31 = vpop.f32.mrb[15].mxu1 }
 0x75d PF: > { %p4207_p7 = scmp.eq.s32.totalorder %s4466_s22, 2  ;;  %s4354_s24 = smov [#allocation3]  }
 0x75e   : > { %s3252_s30 = sshll.u32 %s4354_s24, 4  ;;  %s3253_s30 = int_to_ptr.vmem [resolvable:$true] %s3252_s30 }
 0x75f   : > { %s4311_s1 = scalar_lea.vmem %s3253_s30, 16  ;;  %s4317_s21 = scalar_lea.vmem %s3253_s30, 32 }
 0x760   : > { %p4312_p8 = scmp.ne.s32.totalorder %s3253_s30, %s4311_s1  ;;  %p4318_p11 = scmp.lt.s32.totalorder %s3253_s30, %s3253_s30 }
 0x761   : > { %p4319_p12 = scmp.lt.s32.totalorder %s4317_s21, %s4311_s1 }
 0x762   : > { %p4313_p9 = pnand %p4312_p8, %p4207_p7 }
 0x763   : > { %p4320_p13 = por %p4319_p12, %p4318_p11 }
 0x764   : > { %p4314_p10 = pneg %p4313_p9 }
 0x766   : > { %p4321_p0 = pnand %p4320_p13, %p4314_p10 }
 0x768   : > { %4324 = shalt.err (!%p4321_p0)
}
 0x769   : > { %s4325_s2 = scalar_lea.hbm %s5442_s20, 16 }
 0x76a   : > { %p4326_p1 = scmp.ne.s32.totalorder %s5442_s20, %s4325_s2  ;;  %p4331_p4 = scmp.lt.u32.totalorder %s4325_s2, %s5442_s20 }
 0x76c   : > { %p4327_p2 = pnand %p4326_p1, %p4207_p7 }
 0x76e   : > { %p4328_p3 = pneg %p4327_p2 }
 0x770   : > { %p4333_p5 = pnand %p4331_p4, %p4328_p3 }
 0x772   : > { %4336 = shalt.err (!%p4333_p5)
}
 0x773   : > { %4204 = dma.vmem_to_hbm [thread:$0]  (%p4207_p7), %s3253_s30, 16, %s5442_s20, [#allocation4]  }
 0x774   : > { %4342 = dma.done.wait (%p4207_p7), [#allocation4], 16  }
 0x775   : > { %4344 = vsyncadd (%p4207_p7), [#allocation4], 4294967280 }
 0x776 PF: > { %s5494_s21 = sld [smem:[#allocation6_spill]] }
 0x77c   : > { %s32_s1 = sadd.s32 1, %s5494_s21  }
 0x77d   : > { %p29_p6 = scmp.ge.s32.totalorder %s32_s1, 5  }
 0x77f   :  { %31 = sbr.rel (!%p29_p6) target bundleno = 7 (0x7), region = 150 }
 0x786   :  { %3276 = vsyncpa [#allocation4], 1 }
 0x787   :  { %3278 = vsyncpa [#allocation4 + $0x1], 1 }

</bundles_post_ra>
